<compile_context>
chip_gen: v5e
topology: v5e:2x2
jax: 0.10.0
libtpu: 0.0.40
codegen_flags: <defaults>
</compile_context>

<pallas_src>
import functools

import jax
import jax.numpy as jnp
from jax import lax
from jax.experimental import pallas as pl
from jax.experimental.pallas import tpu as pltpu


# -----------------------------------------------------------------------------
# Fused text-encoder kernel
# -----------------------------------------------------------------------------
def _layernorm(x, w, b, eps=1e-5):
    # x: (M, D) f32; w, b: (1, D)
    mu = jnp.mean(x, axis=-1, keepdims=True)
    xc = x - mu
    var = jnp.mean(xc * xc, axis=-1, keepdims=True)
    return xc * lax.rsqrt(var + eps) * w + b


def _text_encoder_kernel(prompts_ref, pos_ref, tok_ref,
                         ln1w_ref, ln1b_ref, wqkv_ref, bqkv_ref, wo_ref, bo_ref,
                         ln2w_ref, ln2b_ref, w1_ref, b1_ref, w2_ref, b2_ref,
                         lnfw_ref, lnfb_ref, proj_ref,
                         out_ref, x_state, *, n_heads):
    R, L, D = prompts_ref.shape
    H = n_heads
    Dh = D // H
    M = R * L
    layer = pl.program_id(1)
    n_layers = pl.num_programs(1)

    # ---- first layer step: embed positional encoding into the resident state ----
    @pl.when(layer == 0)
    def _():
        x0 = prompts_ref[...].astype(jnp.float32) + pos_ref[...].astype(jnp.float32)
        x_state[...] = x0.reshape(M, D)

    x = x_state[...]                                            # (M, D) f32

    # ---- attention sublayer (pre-LN, causal, multi-head) ----
    y = _layernorm(x, ln1w_ref[0], ln1b_ref[0])
    qkv = jnp.dot(y, wqkv_ref[0], preferred_element_type=jnp.float32) + bqkv_ref[0]

    rr = lax.broadcasted_iota(jnp.int32, (L, L), 0)
    cc = lax.broadcasted_iota(jnp.int32, (L, L), 1)
    causal = jnp.where(cc <= rr, 0.0, -1e9).astype(jnp.float32)  # (L, L)

    scale = Dh ** -0.5
    wo = wo_ref[0]                                              # (D, D)
    attn = jnp.zeros((M, D), jnp.float32)
    for h in range(H):                                          # static, small loop
        qh = qkv[:, h * Dh:(h + 1) * Dh].reshape(R, L, Dh)
        kh = qkv[:, D + h * Dh:D + (h + 1) * Dh].reshape(R, L, Dh)
        vh = qkv[:, 2 * D + h * Dh:2 * D + (h + 1) * Dh].reshape(R, L, Dh)
        s = jnp.einsum("rqd,rkd->rqk", qh, kh,
                       preferred_element_type=jnp.float32) * scale + causal
        s = s - jnp.max(s, axis=-1, keepdims=True)
        p = jnp.exp(s)
        p = p / jnp.sum(p, axis=-1, keepdims=True)
        oh = jnp.einsum("rqk,rkd->rqd", p, vh,
                        preferred_element_type=jnp.float32)      # (R, L, Dh)
        # concat-of-heads @ Wo == sum over heads of (head @ Wo-slice); avoids concat.
        attn = attn + jnp.dot(oh.reshape(M, Dh), wo[h * Dh:(h + 1) * Dh, :],
                              preferred_element_type=jnp.float32)
    x = x + attn + bo_ref[0]

    # ---- MLP sublayer (pre-LN, QuickGELU) ----
    y2 = _layernorm(x, ln2w_ref[0], ln2b_ref[0])
    h1 = jnp.dot(y2, w1_ref[0], preferred_element_type=jnp.float32) + b1_ref[0]
    h1 = h1 * (1.0 / (1.0 + jnp.exp(-1.702 * h1)))               # QuickGELU
    x = x + jnp.dot(h1, w2_ref[0], preferred_element_type=jnp.float32) + b2_ref[0]

    x_state[...] = x

    # ---- last layer step: EOT gather + ln_final + text projection ----
    @pl.when(layer == n_layers - 1)
    def _():
        xf = x_state[...]                                        # (M, D)
        tok = tok_ref[...]                                       # (R, L) int32
        ids = lax.broadcasted_iota(jnp.int32, (R, L), 1)
        mx = jnp.max(tok, axis=-1, keepdims=True)
        eot = jnp.min(jnp.where(tok == mx, ids, L),
                      axis=-1, keepdims=True)                    # (R, 1) first argmax
        # one-hot over the flattened (R*L) rows: row r selects r*L + eot[r]
        col = lax.broadcasted_iota(jnp.int32, (R, M), 1)
        base = lax.broadcasted_iota(jnp.int32, (R, M), 0) * L
        onehot = (col == base + eot).astype(jnp.float32)         # (R, M)
        sel = jnp.dot(onehot, xf, preferred_element_type=jnp.float32)  # (R, D)
        sel = _layernorm(sel, lnfw_ref[...], lnfb_ref[...])
        out_ref[...] = jnp.dot(sel, proj_ref[...],
                               preferred_element_type=jnp.float32).astype(out_ref.dtype)


def text_encoder_forward(enc, prompts, tokenized_prompts, *, row_block=8):
    B, L, D = prompts.shape
    P = enc.proj.shape[1]
    NL = enc.layers
    R = min(row_block, B)
    assert B % R == 0, "pad the prompt batch to a multiple of the row block"
    assert L % 8 == 0, "pad seq_len to a multiple of 8 (CLIP: 77 -> 80)"
    assert tokenized_prompts.shape == (B, L)

    prompts = prompts.astype(jnp.float32)
    tok = tokenized_prompts.astype(jnp.int32)

    kernel = functools.partial(_text_encoder_kernel, n_heads=enc.heads)

    def wspec(d_in, d_out):        # per-layer weight, streamed over the layer axis
        return pl.BlockSpec((1, d_in, d_out), lambda b, l: (l, 0, 0))

    def vspec(d):                  # per-layer bias / LN vector, stored (NL, 1, d)
        return pl.BlockSpec((1, 1, d), lambda b, l: (l, 0, 0))

    return pl.pallas_call(
        kernel,
        out_shape=jax.ShapeDtypeStruct((B, P), jnp.float32),
        grid=(B // R, NL),
        in_specs=[
            pl.BlockSpec((R, L, D), lambda b, l: (b, 0, 0)),     # prompts
            pl.BlockSpec((L, D), lambda b, l: (0, 0)),           # positional embedding
            pl.BlockSpec((R, L), lambda b, l: (b, 0)),           # tokenized ids
            vspec(D), vspec(D),                                  # ln_1 w, b
            wspec(D, 3 * D), vspec(3 * D),                       # attn in_proj w, b
            wspec(D, D), vspec(D),                               # attn out_proj w, b
            vspec(D), vspec(D),                                  # ln_2 w, b
            wspec(D, 4 * D), vspec(4 * D),                       # mlp c_fc w, b
            wspec(4 * D, D), vspec(D),                           # mlp c_proj w, b
            pl.BlockSpec((1, D), lambda b, l: (0, 0)),           # ln_final w
            pl.BlockSpec((1, D), lambda b, l: (0, 0)),           # ln_final b
            pl.BlockSpec((D, P), lambda b, l: (0, 0)),           # text_projection
        ],
        out_specs=pl.BlockSpec((R, P), lambda b, l: (b, 0)),
        scratch_shapes=[pltpu.VMEM((R * L, D), jnp.float32)],    # resident hidden state
        compiler_params=pltpu.CompilerParams(
            dimension_semantics=("parallel", "arbitrary")),
        # NOTE: at real CLIP sizes (D=512, F=2048) use bf16 weights and/or set
        # vmem_limit_bytes here so double-buffered per-layer weights fit v5e/v7x scope.
    )(prompts, enc.pos, tok,
      enc.ln1_w, enc.ln1_b, enc.w_qkv, enc.b_qkv, enc.w_o, enc.b_o,
      enc.ln2_w, enc.ln2_b, enc.w1, enc.b1, enc.w2, enc.b2,
      enc.lnf_w, enc.lnf_b, enc.proj)


# -----------------------------------------------------------------------------
# Module wrapper with synthetic parameters (same shapes as the CLIP text stack)
# -----------------------------------------------------------------------------
class TextEncoderPallas:
    def __init__(self, key, *, seq_len, width, heads, layers, proj_dim):
        assert width % heads == 0
        self.seq_len, self.width, self.heads, self.layers = seq_len, width, heads, layers
        self.proj_dim = proj_dim
        D, F = width, 4 * width
        ks = jax.random.split(key, 16)

        def rnd(k, shape, scale):
            return scale * jax.random.normal(k, shape, jnp.float32)

        self.pos   = rnd(ks[0], (seq_len, D), 0.01)
        self.ln1_w = 1.0 + rnd(ks[1], (layers, 1, D), 0.02)
        self.ln1_b = rnd(ks[2], (layers, 1, D), 0.02)
        self.w_qkv = rnd(ks[3], (layers, D, 3 * D), D ** -0.5)
        self.b_qkv = rnd(ks[4], (layers, 1, 3 * D), 0.02)
        self.w_o   = rnd(ks[5], (layers, D, D), D ** -0.5)
        self.b_o   = rnd(ks[6], (layers, 1, D), 0.02)
        self.ln2_w = 1.0 + rnd(ks[7], (layers, 1, D), 0.02)
        self.ln2_b = rnd(ks[8], (layers, 1, D), 0.02)
        self.w1    = rnd(ks[9], (layers, D, F), D ** -0.5)
        self.b1    = rnd(ks[10], (layers, 1, F), 0.02)
        self.w2    = rnd(ks[11], (layers, F, D), F ** -0.5)
        self.b2    = rnd(ks[12], (layers, 1, D), 0.02)
        self.lnf_w = 1.0 + rnd(ks[13], (1, D), 0.02)
        self.lnf_b = rnd(ks[14], (1, D), 0.02)
        self.proj  = rnd(ks[15], (D, proj_dim), D ** -0.5)

    def forward(self, prompts, tokenized_prompts, *, row_block=8):
        return text_encoder_forward(self, prompts, tokenized_prompts,
                                    row_block=row_block)


# -----------------------------------------------------------------------------
# Pure-JAX reference (for correctness check)
# -----------------------------------------------------------------------------
def _ln_ref(x, w, b, eps=1e-5):
    mu = jnp.mean(x, axis=-1, keepdims=True)
    xc = x - mu
    var = jnp.mean(xc * xc, axis=-1, keepdims=True)
    return xc * lax.rsqrt(var + eps) * w + b


def reference_forward(enc, prompts, tokenized):
    B, L, D = prompts.shape
    H, Dh = enc.heads, D // enc.heads
    x = prompts + enc.pos
    row = jnp.arange(L)[:, None]
    col = jnp.arange(L)[None, :]
    mask = jnp.where(col <= row, 0.0, -1e9).astype(jnp.float32)
    for l in range(enc.layers):
        y = _ln_ref(x, enc.ln1_w[l], enc.ln1_b[l])
        qkv = jnp.einsum("bld,de->ble", y, enc.w_qkv[l]) + enc.b_qkv[l]
        q, k, v = jnp.split(qkv, 3, axis=-1)

        def heads(t):
            return t.reshape(B, L, H, Dh).transpose(0, 2, 1, 3)

        q, k, v = heads(q), heads(k), heads(v)
        s = jnp.einsum("bhqd,bhkd->bhqk", q, k) * (Dh ** -0.5) + mask
        p = jax.nn.softmax(s, axis=-1)
        o = jnp.einsum("bhqk,bhkd->bhqd", p, v).transpose(0, 2, 1, 3).reshape(B, L, D)
        x = x + jnp.einsum("bld,de->ble", o, enc.w_o[l]) + enc.b_o[l]
        y2 = _ln_ref(x, enc.ln2_w[l], enc.ln2_b[l])
        h1 = jnp.einsum("bld,de->ble", y2, enc.w1[l]) + enc.b1[l]
        h1 = h1 * jax.nn.sigmoid(1.702 * h1)
        x = x + jnp.einsum("bld,de->ble", h1, enc.w2[l]) + enc.b2[l]
    x = _ln_ref(x, enc.lnf_w, enc.lnf_b)
    eot = jnp.argmax(tokenized, axis=-1)
    sel = x[jnp.arange(B), eot]
    return sel @ enc.proj


if __name__ == "__main__":
    # Small shapes consistent with the module (lane-dense D and proj_dim):
    n_prompts, seq_len, width, heads, layers, proj_dim = 16, 8, 128, 4, 2, 128

    key = jax.random.PRNGKey(0)
    k_enc, k_prompt, k_tok, k_eot = jax.random.split(key, 4)

    enc = TextEncoderPallas(k_enc, seq_len=seq_len, width=width, heads=heads,
                            layers=layers, proj_dim=proj_dim)

    prompts = 0.02 * jax.random.normal(
        k_prompt, (n_prompts, seq_len, width), jnp.float32)
    base_tok = jax.random.randint(k_tok, (n_prompts, seq_len), 1, 400,
                                  dtype=jnp.int32)
    eot_pos = jax.random.randint(k_eot, (n_prompts,), 2, seq_len, dtype=jnp.int32)
    tokenized = base_tok.at[jnp.arange(n_prompts), eot_pos].set(49407)

    feats = enc.forward(prompts, tokenized, row_block=8)
    jax.block_until_ready(feats)

    ref = reference_forward(enc, prompts, tokenized)
    assert feats.shape == (n_prompts, proj_dim), feats.shape
    max_err = float(jnp.max(jnp.abs(feats - ref)))
    assert jnp.allclose(feats, ref, rtol=3e-2, atol=3e-2), max_err

    print("KERNEL_OK")
</pallas_src>

<mosaic_0001>
module attributes {stable_mosaic.version = 11 : i64} {
  func.func @_text_encoder_kernel(%arg0: i32, %arg1: i32, %arg2: memref<8x8x128xf32, #tpu.memory_space<vmem>>, %arg3: memref<8x128xf32, #tpu.memory_space<vmem>>, %arg4: memref<8x8xi32, #tpu.memory_space<vmem>>, %arg5: memref<1x1x128xf32, #tpu.memory_space<vmem>>, %arg6: memref<1x1x128xf32, #tpu.memory_space<vmem>>, %arg7: memref<1x128x384xf32, #tpu.memory_space<vmem>>, %arg8: memref<1x1x384xf32, #tpu.memory_space<vmem>>, %arg9: memref<1x128x128xf32, #tpu.memory_space<vmem>>, %arg10: memref<1x1x128xf32, #tpu.memory_space<vmem>>, %arg11: memref<1x1x128xf32, #tpu.memory_space<vmem>>, %arg12: memref<1x1x128xf32, #tpu.memory_space<vmem>>, %arg13: memref<1x128x512xf32, #tpu.memory_space<vmem>>, %arg14: memref<1x1x512xf32, #tpu.memory_space<vmem>>, %arg15: memref<1x512x128xf32, #tpu.memory_space<vmem>>, %arg16: memref<1x1x128xf32, #tpu.memory_space<vmem>>, %arg17: memref<1x128xf32, #tpu.memory_space<vmem>>, %arg18: memref<1x128xf32, #tpu.memory_space<vmem>>, %arg19: memref<128x128xf32, #tpu.memory_space<vmem>>, %arg20: memref<8x128xf32, #tpu.memory_space<vmem>>, %arg21: memref<64x128xf32, #tpu.memory_space<vmem>>) attributes {dimension_semantics = [#tpu.dimension_semantics<parallel>, #tpu.dimension_semantics<arbitrary>], iteration_bounds = array<i64: 2, 2>, scalar_prefetch = 0 : i64, scratch_operands = 1 : i64, tpu.core_type = #tpu.core_type<tc>, window_params = [{transform_indices = @transform_0, window_bounds = array<i64: 8, 8, 128>}, {pipeline_mode = #tpu.pipeline_mode<synchronous>, transform_indices = @transform_1, window_bounds = array<i64: 8, 128>}, {transform_indices = @transform_2, window_bounds = array<i64: 8, 8>}, {transform_indices = @transform_3, window_bounds = array<i64: 1, 1, 128>}, {transform_indices = @transform_4, window_bounds = array<i64: 1, 1, 128>}, {transform_indices = @transform_5, window_bounds = array<i64: 1, 128, 384>}, {transform_indices = @transform_6, window_bounds = array<i64: 1, 1, 384>}, {transform_indices = @transform_7, window_bounds = array<i64: 1, 128, 128>}, {transform_indices = @transform_8, window_bounds = array<i64: 1, 1, 128>}, {transform_indices = @transform_9, window_bounds = array<i64: 1, 1, 128>}, {transform_indices = @transform_10, window_bounds = array<i64: 1, 1, 128>}, {transform_indices = @transform_11, window_bounds = array<i64: 1, 128, 512>}, {transform_indices = @transform_12, window_bounds = array<i64: 1, 1, 512>}, {transform_indices = @transform_13, window_bounds = array<i64: 1, 512, 128>}, {transform_indices = @transform_14, window_bounds = array<i64: 1, 1, 128>}, {pipeline_mode = #tpu.pipeline_mode<synchronous>, transform_indices = @transform_15, window_bounds = array<i64: 1, 128>}, {pipeline_mode = #tpu.pipeline_mode<synchronous>, transform_indices = @transform_16, window_bounds = array<i64: 1, 128>}, {pipeline_mode = #tpu.pipeline_mode<synchronous>, transform_indices = @transform_17, window_bounds = array<i64: 128, 128>}, {transform_indices = @transform_18, window_bounds = array<i64: 8, 128>}]} {
    %c0_i32 = arith.constant 0 : i32
    %0 = arith.cmpi eq, %arg1, %c0_i32 : i32
    %1 = arith.extui %0 : i1 to i32
    %c0_i32_0 = arith.constant 0 : i32
    %2 = arith.cmpi ne, %1, %c0_i32_0 : i32
    scf.if %2 {
      %c0_83 = arith.constant 0 : index
      %c0_84 = arith.constant 0 : index
      %c0_85 = arith.constant 0 : index
      %204 = vector.load %arg2[%c0_83, %c0_84, %c0_85] : memref<8x8x128xf32, #tpu.memory_space<vmem>>, vector<8x8x128xf32>
      %c0_86 = arith.constant 0 : index
      %c0_87 = arith.constant 0 : index
      %205 = vector.load %arg3[%c0_86, %c0_87] : memref<8x128xf32, #tpu.memory_space<vmem>>, vector<8x128xf32>
      %206 = vector.shape_cast %205 : vector<8x128xf32> to vector<1x8x128xf32>
      %207 = vector.broadcast %206 : vector<1x8x128xf32> to vector<8x8x128xf32>
      %208 = arith.addf %204, %207 : vector<8x8x128xf32>
      %209 = vector.shape_cast %208 : vector<8x8x128xf32> to vector<64x128xf32>
      %c0_88 = arith.constant 0 : index
      %c0_89 = arith.constant 0 : index
      %210 = vector.load %arg21[%c0_88, %c0_89] : memref<64x128xf32, #tpu.memory_space<vmem>>, vector<64x128xf32>
      tpu.vector_store %arg21[%c0_88, %c0_89], %209 {strides = array<i32>} : memref<64x128xf32, #tpu.memory_space<vmem>>, vector<64x128xf32>,
    } else {
    }
    %c0 = arith.constant 0 : index
    %c0_1 = arith.constant 0 : index
    %3 = vector.load %arg21[%c0, %c0_1] : memref<64x128xf32, #tpu.memory_space<vmem>>, vector<64x128xf32>
    %c0_2 = arith.constant 0 : index
    %c0_3 = arith.constant 0 : index
    %c0_4 = arith.constant 0 : index
    %4 = vector.load %arg5[%c0_2, %c0_3, %c0_4] : memref<1x1x128xf32, #tpu.memory_space<vmem>>, vector<1x1x128xf32>
    %5 = vector.shape_cast %4 : vector<1x1x128xf32> to vector<1x128xf32>
    %c0_5 = arith.constant 0 : index
    %c0_6 = arith.constant 0 : index
    %c0_7 = arith.constant 0 : index
    %6 = vector.load %arg6[%c0_5, %c0_6, %c0_7] : memref<1x1x128xf32, #tpu.memory_space<vmem>>, vector<1x1x128xf32>
    %7 = vector.shape_cast %6 : vector<1x1x128xf32> to vector<1x128xf32>
    %cst = arith.constant dense<0.000000e+00> : vector<64xf32>
    %8 = vector.multi_reduction <add>, %3, %cst [1] : vector<64x128xf32> to vector<64xf32>
    %9 = vector.shape_cast %8 : vector<64xf32> to vector<64x1xf32>
    %cst_8 = arith.constant 1.280000e+02 : f32
    %10 = vector.broadcast %cst_8 : f32 to vector<64x1xf32>
    %11 = arith.divf %9, %10 : vector<64x1xf32>
    %12 = vector.broadcast %11 : vector<64x1xf32> to vector<64x128xf32>
    %13 = arith.subf %3, %12 : vector<64x128xf32>
    %14 = arith.mulf %13, %13 : vector<64x128xf32>
    %cst_9 = arith.constant dense<0.000000e+00> : vector<64xf32>
    %15 = vector.multi_reduction <add>, %14, %cst_9 [1] : vector<64x128xf32> to vector<64xf32>
    %16 = vector.shape_cast %15 : vector<64xf32> to vector<64x1xf32>
    %cst_10 = arith.constant 1.280000e+02 : f32
    %17 = vector.broadcast %cst_10 : f32 to vector<64x1xf32>
    %18 = arith.divf %16, %17 : vector<64x1xf32>
    %cst_11 = arith.constant 9.99999974E-6 : f32
    %19 = vector.broadcast %cst_11 : f32 to vector<64x1xf32>
    %20 = arith.addf %18, %19 : vector<64x1xf32>
    %21 = math.rsqrt %20 : vector<64x1xf32>
    %22 = vector.broadcast %21 : vector<64x1xf32> to vector<64x128xf32>
    %23 = arith.mulf %13, %22 : vector<64x128xf32>
    %24 = vector.broadcast %5 : vector<1x128xf32> to vector<64x128xf32>
    %25 = arith.mulf %23, %24 : vector<64x128xf32>
    %26 = vector.broadcast %7 : vector<1x128xf32> to vector<64x128xf32>
    %27 = arith.addf %25, %26 : vector<64x128xf32>
    %c0_12 = arith.constant 0 : index
    %c0_13 = arith.constant 0 : index
    %c0_14 = arith.constant 0 : index
    %28 = vector.load %arg7[%c0_12, %c0_13, %c0_14] : memref<1x128x384xf32, #tpu.memory_space<vmem>>, vector<1x128x384xf32>
    %29 = vector.shape_cast %28 : vector<1x128x384xf32> to vector<128x384xf32>
    %cst_15 = arith.constant dense<0.000000e+00> : vector<64x384xf32>
    %30 = tpu.matmul %27, %29, %cst_15 {dimension_numbers = #tpu.dot_dimension_numbers<[1], [0], [0], [1], [0, 0, 1, 1], [], []>} : vector<64x128xf32>, vector<128x384xf32>, vector<64x384xf32> -> vector<64x384xf32>
    %c0_16 = arith.constant 0 : index
    %c0_17 = arith.constant 0 : index
    %c0_18 = arith.constant 0 : index
    %31 = vector.load %arg8[%c0_16, %c0_17, %c0_18] : memref<1x1x384xf32, #tpu.memory_space<vmem>>, vector<1x1x384xf32>
    %32 = vector.shape_cast %31 : vector<1x1x384xf32> to vector<1x384xf32>
    %33 = vector.broadcast %32 : vector<1x384xf32> to vector<64x384xf32>
    %34 = arith.addf %30, %33 : vector<64x384xf32>
    %35 = tpu.iota {dimensions = array<i32: 0>} : vector<8x8xi32>
    %36 = tpu.iota {dimensions = array<i32: 1>} : vector<8x8xi32>
    %37 = arith.cmpi sle, %36, %35 : vector<8x8xi32>
    %cst_19 = arith.constant 0.000000e+00 : f32
    %cst_20 = arith.constant -1.000000e+09 : f32
    %38 = vector.broadcast %cst_19 : f32 to vector<8x8xf32>
    %39 = vector.broadcast %cst_20 : f32 to vector<8x8xf32>
    %40 = arith.select %37, %38, %39 : vector<8x8xi1>, vector<8x8xf32>
    %c0_21 = arith.constant 0 : index
    %c0_22 = arith.constant 0 : index
    %c0_23 = arith.constant 0 : index
    %41 = vector.load %arg9[%c0_21, %c0_22, %c0_23] : memref<1x128x128xf32, #tpu.memory_space<vmem>>, vector<1x128x128xf32>
    %42 = vector.shape_cast %41 : vector<1x128x128xf32> to vector<128x128xf32>
    %cst_24 = arith.constant 0.000000e+00 : f32
    %43 = vector.broadcast %cst_24 : f32 to vector<64x128xf32>
    %44 = vector.extract_strided_slice %34 {offsets = [0, 0], sizes = [64, 32], strides = [1, 1]} : vector<64x384xf32> to vector<64x32xf32>
    %45 = vector.shape_cast %44 : vector<64x32xf32> to vector<8x8x32xf32>
    %46 = vector.extract_strided_slice %34 {offsets = [0, 128], sizes = [64, 32], strides = [1, 1]} : vector<64x384xf32> to vector<64x32xf32>
    %47 = vector.shape_cast %46 : vector<64x32xf32> to vector<8x8x32xf32>
    %48 = vector.extract_strided_slice %34 {offsets = [0, 256], sizes = [64, 32], strides = [1, 1]} : vector<64x384xf32> to vector<64x32xf32>
    %49 = vector.shape_cast %48 : vector<64x32xf32> to vector<8x8x32xf32>
    "tpu.trace_start"() <{level = 10 : i32, message = "rqd,rkd->rqk"}> : () -> ()
    %cst_25 = arith.constant dense<0.000000e+00> : vector<8x8x8xf32>
    %50 = tpu.matmul %45, %47, %cst_25 {dimension_numbers = #tpu.dot_dimension_numbers<[2], [2], [1], [1], [0, 0, 0, 1, 1, 1], [0], [0]>} : vector<8x8x32xf32>, vector<8x8x32xf32>, vector<8x8x8xf32> -> vector<8x8x8xf32>
    "tpu.trace_stop"() : () -> ()
    %cst_26 = arith.constant 0.176776692 : f32
    %51 = vector.broadcast %cst_26 : f32 to vector<8x8x8xf32>
    %52 = arith.mulf %50, %51 : vector<8x8x8xf32>
    %53 = vector.shape_cast %40 : vector<8x8xf32> to vector<1x8x8xf32>
    %54 = vector.broadcast %53 : vector<1x8x8xf32> to vector<8x8x8xf32>
    %55 = arith.addf %52, %54 : vector<8x8x8xf32>
    %cst_27 = arith.constant dense<0xFF800000> : vector<8x8xf32>
    %56 = vector.multi_reduction <maximumf>, %55, %cst_27 [2] : vector<8x8x8xf32> to vector<8x8xf32>
    %57 = vector.shape_cast %56 : vector<8x8xf32> to vector<8x8x1xf32>
    %58 = vector.broadcast %57 : vector<8x8x1xf32> to vector<8x8x8xf32>
    %59 = arith.subf %55, %58 : vector<8x8x8xf32>
    %60 = math.exp %59 : vector<8x8x8xf32>
    %cst_28 = arith.constant dense<0.000000e+00> : vector<8x8xf32>
    %61 = vector.multi_reduction <add>, %60, %cst_28 [2] : vector<8x8x8xf32> to vector<8x8xf32>
    %62 = vector.shape_cast %61 : vector<8x8xf32> to vector<8x8x1xf32>
    %63 = vector.broadcast %62 : vector<8x8x1xf32> to vector<8x8x8xf32>
    %64 = arith.divf %60, %63 : vector<8x8x8xf32>
    "tpu.trace_start"() <{level = 10 : i32, message = "rqk,rkd->rqd"}> : () -> ()
    %cst_29 = arith.constant dense<0.000000e+00> : vector<8x8x32xf32>
    %65 = tpu.matmul %64, %49, %cst_29 {dimension_numbers = #tpu.dot_dimension_numbers<[2], [1], [1], [2], [0, 0, 0, 1, 1, 2], [0], [0]>} : vector<8x8x8xf32>, vector<8x8x32xf32>, vector<8x8x32xf32> -> vector<8x8x32xf32>
    "tpu.trace_stop"() : () -> ()
    %66 = vector.shape_cast %65 : vector<8x8x32xf32> to vector<64x32xf32>
    %67 = vector.extract_strided_slice %42 {offsets = [0, 0], sizes = [32, 128], strides = [1, 1]} : vector<128x128xf32> to vector<32x128xf32>
    %cst_30 = arith.constant dense<0.000000e+00> : vector<64x128xf32>
    %68 = tpu.matmul %66, %67, %cst_30 {dimension_numbers = #tpu.dot_dimension_numbers<[1], [0], [0], [1], [0, 0, 1, 1], [], []>} : vector<64x32xf32>, vector<32x128xf32>, vector<64x128xf32> -> vector<64x128xf32>
    %69 = arith.addf %43, %68 : vector<64x128xf32>
    %70 = vector.extract_strided_slice %34 {offsets = [0, 32], sizes = [64, 32], strides = [1, 1]} : vector<64x384xf32> to vector<64x32xf32>
    %71 = vector.shape_cast %70 : vector<64x32xf32> to vector<8x8x32xf32>
    %72 = vector.extract_strided_slice %34 {offsets = [0, 160], sizes = [64, 32], strides = [1, 1]} : vector<64x384xf32> to vector<64x32xf32>
    %73 = vector.shape_cast %72 : vector<64x32xf32> to vector<8x8x32xf32>
    %74 = vector.extract_strided_slice %34 {offsets = [0, 288], sizes = [64, 32], strides = [1, 1]} : vector<64x384xf32> to vector<64x32xf32>
    %75 = vector.shape_cast %74 : vector<64x32xf32> to vector<8x8x32xf32>
    "tpu.trace_start"() <{level = 10 : i32, message = "rqd,rkd->rqk"}> : () -> ()
    %cst_31 = arith.constant dense<0.000000e+00> : vector<8x8x8xf32>
    %76 = tpu.matmul %71, %73, %cst_31 {dimension_numbers = #tpu.dot_dimension_numbers<[2], [2], [1], [1], [0, 0, 0, 1, 1, 1], [0], [0]>} : vector<8x8x32xf32>, vector<8x8x32xf32>, vector<8x8x8xf32> -> vector<8x8x8xf32>
    "tpu.trace_stop"() : () -> ()
    %cst_32 = arith.constant 0.176776692 : f32
    %77 = vector.broadcast %cst_32 : f32 to vector<8x8x8xf32>
    %78 = arith.mulf %76, %77 : vector<8x8x8xf32>
    %79 = vector.shape_cast %40 : vector<8x8xf32> to vector<1x8x8xf32>
    %80 = vector.broadcast %79 : vector<1x8x8xf32> to vector<8x8x8xf32>
    %81 = arith.addf %78, %80 : vector<8x8x8xf32>
    %cst_33 = arith.constant dense<0xFF800000> : vector<8x8xf32>
    %82 = vector.multi_reduction <maximumf>, %81, %cst_33 [2] : vector<8x8x8xf32> to vector<8x8xf32>
    %83 = vector.shape_cast %82 : vector<8x8xf32> to vector<8x8x1xf32>
    %84 = vector.broadcast %83 : vector<8x8x1xf32> to vector<8x8x8xf32>
    %85 = arith.subf %81, %84 : vector<8x8x8xf32>
    %86 = math.exp %85 : vector<8x8x8xf32>
    %cst_34 = arith.constant dense<0.000000e+00> : vector<8x8xf32>
    %87 = vector.multi_reduction <add>, %86, %cst_34 [2] : vector<8x8x8xf32> to vector<8x8xf32>
    %88 = vector.shape_cast %87 : vector<8x8xf32> to vector<8x8x1xf32>
    %89 = vector.broadcast %88 : vector<8x8x1xf32> to vector<8x8x8xf32>
    %90 = arith.divf %86, %89 : vector<8x8x8xf32>
    "tpu.trace_start"() <{level = 10 : i32, message = "rqk,rkd->rqd"}> : () -> ()
    %cst_35 = arith.constant dense<0.000000e+00> : vector<8x8x32xf32>
    %91 = tpu.matmul %90, %75, %cst_35 {dimension_numbers = #tpu.dot_dimension_numbers<[2], [1], [1], [2], [0, 0, 0, 1, 1, 2], [0], [0]>} : vector<8x8x8xf32>, vector<8x8x32xf32>, vector<8x8x32xf32> -> vector<8x8x32xf32>
    "tpu.trace_stop"() : () -> ()
    %92 = vector.shape_cast %91 : vector<8x8x32xf32> to vector<64x32xf32>
    %93 = vector.extract_strided_slice %42 {offsets = [32, 0], sizes = [32, 128], strides = [1, 1]} : vector<128x128xf32> to vector<32x128xf32>
    %cst_36 = arith.constant dense<0.000000e+00> : vector<64x128xf32>
    %94 = tpu.matmul %92, %93, %cst_36 {dimension_numbers = #tpu.dot_dimension_numbers<[1], [0], [0], [1], [0, 0, 1, 1], [], []>} : vector<64x32xf32>, vector<32x128xf32>, vector<64x128xf32> -> vector<64x128xf32>
    %95 = arith.addf %69, %94 : vector<64x128xf32>
    %96 = vector.extract_strided_slice %34 {offsets = [0, 64], sizes = [64, 32], strides = [1, 1]} : vector<64x384xf32> to vector<64x32xf32>
    %97 = vector.shape_cast %96 : vector<64x32xf32> to vector<8x8x32xf32>
    %98 = vector.extract_strided_slice %34 {offsets = [0, 192], sizes = [64, 32], strides = [1, 1]} : vector<64x384xf32> to vector<64x32xf32>
    %99 = vector.shape_cast %98 : vector<64x32xf32> to vector<8x8x32xf32>
    %100 = vector.extract_strided_slice %34 {offsets = [0, 320], sizes = [64, 32], strides = [1, 1]} : vector<64x384xf32> to vector<64x32xf32>
    %101 = vector.shape_cast %100 : vector<64x32xf32> to vector<8x8x32xf32>
    "tpu.trace_start"() <{level = 10 : i32, message = "rqd,rkd->rqk"}> : () -> ()
    %cst_37 = arith.constant dense<0.000000e+00> : vector<8x8x8xf32>
    %102 = tpu.matmul %97, %99, %cst_37 {dimension_numbers = #tpu.dot_dimension_numbers<[2], [2], [1], [1], [0, 0, 0, 1, 1, 1], [0], [0]>} : vector<8x8x32xf32>, vector<8x8x32xf32>, vector<8x8x8xf32> -> vector<8x8x8xf32>
    "tpu.trace_stop"() : () -> ()
    %cst_38 = arith.constant 0.176776692 : f32
    %103 = vector.broadcast %cst_38 : f32 to vector<8x8x8xf32>
    %104 = arith.mulf %102, %103 : vector<8x8x8xf32>
    %105 = vector.shape_cast %40 : vector<8x8xf32> to vector<1x8x8xf32>
    %106 = vector.broadcast %105 : vector<1x8x8xf32> to vector<8x8x8xf32>
    %107 = arith.addf %104, %106 : vector<8x8x8xf32>
    %cst_39 = arith.constant dense<0xFF800000> : vector<8x8xf32>
    %108 = vector.multi_reduction <maximumf>, %107, %cst_39 [2] : vector<8x8x8xf32> to vector<8x8xf32>
    %109 = vector.shape_cast %108 : vector<8x8xf32> to vector<8x8x1xf32>
    %110 = vector.broadcast %109 : vector<8x8x1xf32> to vector<8x8x8xf32>
    %111 = arith.subf %107, %110 : vector<8x8x8xf32>
    %112 = math.exp %111 : vector<8x8x8xf32>
    %cst_40 = arith.constant dense<0.000000e+00> : vector<8x8xf32>
    %113 = vector.multi_reduction <add>, %112, %cst_40 [2] : vector<8x8x8xf32> to vector<8x8xf32>
    %114 = vector.shape_cast %113 : vector<8x8xf32> to vector<8x8x1xf32>
    %115 = vector.broadcast %114 : vector<8x8x1xf32> to vector<8x8x8xf32>
    %116 = arith.divf %112, %115 : vector<8x8x8xf32>
    "tpu.trace_start"() <{level = 10 : i32, message = "rqk,rkd->rqd"}> : () -> ()
    %cst_41 = arith.constant dense<0.000000e+00> : vector<8x8x32xf32>
    %117 = tpu.matmul %116, %101, %cst_41 {dimension_numbers = #tpu.dot_dimension_numbers<[2], [1], [1], [2], [0, 0, 0, 1, 1, 2], [0], [0]>} : vector<8x8x8xf32>, vector<8x8x32xf32>, vector<8x8x32xf32> -> vector<8x8x32xf32>
    "tpu.trace_stop"() : () -> ()
    %118 = vector.shape_cast %117 : vector<8x8x32xf32> to vector<64x32xf32>
    %119 = vector.extract_strided_slice %42 {offsets = [64, 0], sizes = [32, 128], strides = [1, 1]} : vector<128x128xf32> to vector<32x128xf32>
    %cst_42 = arith.constant dense<0.000000e+00> : vector<64x128xf32>
    %120 = tpu.matmul %118, %119, %cst_42 {dimension_numbers = #tpu.dot_dimension_numbers<[1], [0], [0], [1], [0, 0, 1, 1], [], []>} : vector<64x32xf32>, vector<32x128xf32>, vector<64x128xf32> -> vector<64x128xf32>
    %121 = arith.addf %95, %120 : vector<64x128xf32>
    %122 = vector.extract_strided_slice %34 {offsets = [0, 96], sizes = [64, 32], strides = [1, 1]} : vector<64x384xf32> to vector<64x32xf32>
    %123 = vector.shape_cast %122 : vector<64x32xf32> to vector<8x8x32xf32>
    %124 = vector.extract_strided_slice %34 {offsets = [0, 224], sizes = [64, 32], strides = [1, 1]} : vector<64x384xf32> to vector<64x32xf32>
    %125 = vector.shape_cast %124 : vector<64x32xf32> to vector<8x8x32xf32>
    %126 = vector.extract_strided_slice %34 {offsets = [0, 352], sizes = [64, 32], strides = [1, 1]} : vector<64x384xf32> to vector<64x32xf32>
    %127 = vector.shape_cast %126 : vector<64x32xf32> to vector<8x8x32xf32>
    "tpu.trace_start"() <{level = 10 : i32, message = "rqd,rkd->rqk"}> : () -> ()
    %cst_43 = arith.constant dense<0.000000e+00> : vector<8x8x8xf32>
    %128 = tpu.matmul %123, %125, %cst_43 {dimension_numbers = #tpu.dot_dimension_numbers<[2], [2], [1], [1], [0, 0, 0, 1, 1, 1], [0], [0]>} : vector<8x8x32xf32>, vector<8x8x32xf32>, vector<8x8x8xf32> -> vector<8x8x8xf32>
    "tpu.trace_stop"() : () -> ()
    %cst_44 = arith.constant 0.176776692 : f32
    %129 = vector.broadcast %cst_44 : f32 to vector<8x8x8xf32>
    %130 = arith.mulf %128, %129 : vector<8x8x8xf32>
    %131 = vector.shape_cast %40 : vector<8x8xf32> to vector<1x8x8xf32>
    %132 = vector.broadcast %131 : vector<1x8x8xf32> to vector<8x8x8xf32>
    %133 = arith.addf %130, %132 : vector<8x8x8xf32>
    %cst_45 = arith.constant dense<0xFF800000> : vector<8x8xf32>
    %134 = vector.multi_reduction <maximumf>, %133, %cst_45 [2] : vector<8x8x8xf32> to vector<8x8xf32>
    %135 = vector.shape_cast %134 : vector<8x8xf32> to vector<8x8x1xf32>
    %136 = vector.broadcast %135 : vector<8x8x1xf32> to vector<8x8x8xf32>
    %137 = arith.subf %133, %136 : vector<8x8x8xf32>
    %138 = math.exp %137 : vector<8x8x8xf32>
    %cst_46 = arith.constant dense<0.000000e+00> : vector<8x8xf32>
    %139 = vector.multi_reduction <add>, %138, %cst_46 [2] : vector<8x8x8xf32> to vector<8x8xf32>
    %140 = vector.shape_cast %139 : vector<8x8xf32> to vector<8x8x1xf32>
    %141 = vector.broadcast %140 : vector<8x8x1xf32> to vector<8x8x8xf32>
    %142 = arith.divf %138, %141 : vector<8x8x8xf32>
    "tpu.trace_start"() <{level = 10 : i32, message = "rqk,rkd->rqd"}> : () -> ()
    %cst_47 = arith.constant dense<0.000000e+00> : vector<8x8x32xf32>
    %143 = tpu.matmul %142, %127, %cst_47 {dimension_numbers = #tpu.dot_dimension_numbers<[2], [1], [1], [2], [0, 0, 0, 1, 1, 2], [0], [0]>} : vector<8x8x8xf32>, vector<8x8x32xf32>, vector<8x8x32xf32> -> vector<8x8x32xf32>
    "tpu.trace_stop"() : () -> ()
    %144 = vector.shape_cast %143 : vector<8x8x32xf32> to vector<64x32xf32>
    %145 = vector.extract_strided_slice %42 {offsets = [96, 0], sizes = [32, 128], strides = [1, 1]} : vector<128x128xf32> to vector<32x128xf32>
    %cst_48 = arith.constant dense<0.000000e+00> : vector<64x128xf32>
    %146 = tpu.matmul %144, %145, %cst_48 {dimension_numbers = #tpu.dot_dimension_numbers<[1], [0], [0], [1], [0, 0, 1, 1], [], []>} : vector<64x32xf32>, vector<32x128xf32>, vector<64x128xf32> -> vector<64x128xf32>
    %147 = arith.addf %121, %146 : vector<64x128xf32>
    %148 = arith.addf %3, %147 : vector<64x128xf32>
    %c0_49 = arith.constant 0 : index
    %c0_50 = arith.constant 0 : index
    %c0_51 = arith.constant 0 : index
    %149 = vector.load %arg10[%c0_49, %c0_50, %c0_51] : memref<1x1x128xf32, #tpu.memory_space<vmem>>, vector<1x1x128xf32>
    %150 = vector.shape_cast %149 : vector<1x1x128xf32> to vector<1x128xf32>
    %151 = vector.broadcast %150 : vector<1x128xf32> to vector<64x128xf32>
    %152 = arith.addf %148, %151 : vector<64x128xf32>
    %c0_52 = arith.constant 0 : index
    %c0_53 = arith.constant 0 : index
    %c0_54 = arith.constant 0 : index
    %153 = vector.load %arg11[%c0_52, %c0_53, %c0_54] : memref<1x1x128xf32, #tpu.memory_space<vmem>>, vector<1x1x128xf32>
    %154 = vector.shape_cast %153 : vector<1x1x128xf32> to vector<1x128xf32>
    %c0_55 = arith.constant 0 : index
    %c0_56 = arith.constant 0 : index
    %c0_57 = arith.constant 0 : index
    %155 = vector.load %arg12[%c0_55, %c0_56, %c0_57] : memref<1x1x128xf32, #tpu.memory_space<vmem>>, vector<1x1x128xf32>
    %156 = vector.shape_cast %155 : vector<1x1x128xf32> to vector<1x128xf32>
    %cst_58 = arith.constant dense<0.000000e+00> : vector<64xf32>
    %157 = vector.multi_reduction <add>, %152, %cst_58 [1] : vector<64x128xf32> to vector<64xf32>
    %158 = vector.shape_cast %157 : vector<64xf32> to vector<64x1xf32>
    %cst_59 = arith.constant 1.280000e+02 : f32
    %159 = vector.broadcast %cst_59 : f32 to vector<64x1xf32>
    %160 = arith.divf %158, %159 : vector<64x1xf32>
    %161 = vector.broadcast %160 : vector<64x1xf32> to vector<64x128xf32>
    %162 = arith.subf %152, %161 : vector<64x128xf32>
    %163 = arith.mulf %162, %162 : vector<64x128xf32>
    %cst_60 = arith.constant dense<0.000000e+00> : vector<64xf32>
    %164 = vector.multi_reduction <add>, %163, %cst_60 [1] : vector<64x128xf32> to vector<64xf32>
    %165 = vector.shape_cast %164 : vector<64xf32> to vector<64x1xf32>
    %cst_61 = arith.constant 1.280000e+02 : f32
    %166 = vector.broadcast %cst_61 : f32 to vector<64x1xf32>
    %167 = arith.divf %165, %166 : vector<64x1xf32>
    %cst_62 = arith.constant 9.99999974E-6 : f32
    %168 = vector.broadcast %cst_62 : f32 to vector<64x1xf32>
    %169 = arith.addf %167, %168 : vector<64x1xf32>
    %170 = math.rsqrt %169 : vector<64x1xf32>
    %171 = vector.broadcast %170 : vector<64x1xf32> to vector<64x128xf32>
    %172 = arith.mulf %162, %171 : vector<64x128xf32>
    %173 = vector.broadcast %154 : vector<1x128xf32> to vector<64x128xf32>
    %174 = arith.mulf %172, %173 : vector<64x128xf32>
    %175 = vector.broadcast %156 : vector<1x128xf32> to vector<64x128xf32>
    %176 = arith.addf %174, %175 : vector<64x128xf32>
    %c0_63 = arith.constant 0 : index
    %c0_64 = arith.constant 0 : index
    %c0_65 = arith.constant 0 : index
    %177 = vector.load %arg13[%c0_63, %c0_64, %c0_65] : memref<1x128x512xf32, #tpu.memory_space<vmem>>, vector<1x128x512xf32>
    %178 = vector.shape_cast %177 : vector<1x128x512xf32> to vector<128x512xf32>
    %cst_66 = arith.constant dense<0.000000e+00> : vector<64x512xf32>
    %179 = tpu.matmul %176, %178, %cst_66 {dimension_numbers = #tpu.dot_dimension_numbers<[1], [0], [0], [1], [0, 0, 1, 1], [], []>} : vector<64x128xf32>, vector<128x512xf32>, vector<64x512xf32> -> vector<64x512xf32>
    %c0_67 = arith.constant 0 : index
    %c0_68 = arith.constant 0 : index
    %c0_69 = arith.constant 0 : index
    %180 = vector.load %arg14[%c0_67, %c0_68, %c0_69] : memref<1x1x512xf32, #tpu.memory_space<vmem>>, vector<1x1x512xf32>
    %181 = vector.shape_cast %180 : vector<1x1x512xf32> to vector<1x512xf32>
    %182 = vector.broadcast %181 : vector<1x512xf32> to vector<64x512xf32>
    %183 = arith.addf %179, %182 : vector<64x512xf32>
    %cst_70 = arith.constant -1.702000e+00 : f32
    %184 = vector.broadcast %cst_70 : f32 to vector<64x512xf32>
    %185 = arith.mulf %184, %183 : vector<64x512xf32>
    %186 = math.exp %185 : vector<64x512xf32>
    %cst_71 = arith.constant 1.000000e+00 : f32
    %187 = vector.broadcast %cst_71 : f32 to vector<64x512xf32>
    %188 = arith.addf %187, %186 : vector<64x512xf32>
    %cst_72 = arith.constant 1.000000e+00 : f32
    %189 = vector.broadcast %cst_72 : f32 to vector<64x512xf32>
    %190 = arith.divf %189, %188 : vector<64x512xf32>
    %191 = arith.mulf %183, %190 : vector<64x512xf32>
    %c0_73 = arith.constant 0 : index
    %c0_74 = arith.constant 0 : index
    %c0_75 = arith.constant 0 : index
    %192 = vector.load %arg15[%c0_73, %c0_74, %c0_75] : memref<1x512x128xf32, #tpu.memory_space<vmem>>, vector<1x512x128xf32>
    %193 = vector.shape_cast %192 : vector<1x512x128xf32> to vector<512x128xf32>
    %cst_76 = arith.constant dense<0.000000e+00> : vector<64x128xf32>
    %194 = tpu.matmul %191, %193, %cst_76 {dimension_numbers = #tpu.dot_dimension_numbers<[1], [0], [0], [1], [0, 0, 1, 1], [], []>} : vector<64x512xf32>, vector<512x128xf32>, vector<64x128xf32> -> vector<64x128xf32>
    %195 = arith.addf %152, %194 : vector<64x128xf32>
    %c0_77 = arith.constant 0 : index
    %c0_78 = arith.constant 0 : index
    %c0_79 = arith.constant 0 : index
    %196 = vector.load %arg16[%c0_77, %c0_78, %c0_79] : memref<1x1x128xf32, #tpu.memory_space<vmem>>, vector<1x1x128xf32>
    %197 = vector.shape_cast %196 : vector<1x1x128xf32> to vector<1x128xf32>
    %198 = vector.broadcast %197 : vector<1x128xf32> to vector<64x128xf32>
    %199 = arith.addf %195, %198 : vector<64x128xf32>
    %c0_80 = arith.constant 0 : index
    %c0_81 = arith.constant 0 : index
    %200 = vector.load %arg21[%c0_80, %c0_81] : memref<64x128xf32, #tpu.memory_space<vmem>>, vector<64x128xf32>
    tpu.vector_store %arg21[%c0_80, %c0_81], %199 {strides = array<i32>} : memref<64x128xf32, #tpu.memory_space<vmem>>, vector<64x128xf32>,
    %c1_i32 = arith.constant 1 : i32
    %201 = arith.cmpi eq, %arg1, %c1_i32 : i32
    %202 = arith.extui %201 : i1 to i32
    %c0_i32_82 = arith.constant 0 : i32
    %203 = arith.cmpi ne, %202, %c0_i32_82 : i32
    scf.if %203 {
      %c0_83 = arith.constant 0 : index
      %c0_84 = arith.constant 0 : index
      %204 = vector.load %arg21[%c0_83, %c0_84] : memref<64x128xf32, #tpu.memory_space<vmem>>, vector<64x128xf32>
      %c0_85 = arith.constant 0 : index
      %c0_86 = arith.constant 0 : index
      %205 = vector.load %arg4[%c0_85, %c0_86] : memref<8x8xi32, #tpu.memory_space<vmem>>, vector<8x8xi32>
      %206 = tpu.iota {dimensions = array<i32: 1>} : vector<8x8xi32>
      %cst_87 = arith.constant dense<-2147483648> : vector<8xi32>
      %207 = vector.multi_reduction <maxsi>, %205, %cst_87 [1] : vector<8x8xi32> to vector<8xi32>
      %208 = vector.shape_cast %207 : vector<8xi32> to vector<8x1xi32>
      %209 = vector.broadcast %208 : vector<8x1xi32> to vector<8x8xi32>
      %210 = arith.cmpi eq, %205, %209 : vector<8x8xi32>
      %c8_i32 = arith.constant 8 : i32
      %211 = vector.broadcast %c8_i32 : i32 to vector<8x8xi32>
      %212 = arith.select %210, %206, %211 : vector<8x8xi1>, vector<8x8xi32>
      %cst_88 = arith.constant dense<2147483647> : vector<8xi32>
      %213 = vector.multi_reduction <minsi>, %212, %cst_88 [1] : vector<8x8xi32> to vector<8xi32>
      %214 = vector.shape_cast %213 : vector<8xi32> to vector<8x1xi32>
      %215 = tpu.iota {dimensions = array<i32: 1>} : vector<8x64xi32>
      %216 = tpu.iota {dimensions = array<i32: 0>} : vector<8x64xi32>
      %c8_i32_89 = arith.constant 8 : i32
      %217 = vector.broadcast %c8_i32_89 : i32 to vector<8x64xi32>
      %218 = arith.muli %216, %217 : vector<8x64xi32>
      %219 = vector.broadcast %214 : vector<8x1xi32> to vector<8x64xi32>
      %220 = arith.addi %218, %219 : vector<8x64xi32>
      %221 = arith.cmpi eq, %215, %220 : vector<8x64xi32>
      %222 = arith.extui %221 : vector<8x64xi1> to vector<8x64xi32>
      %223 = arith.sitofp %222 : vector<8x64xi32> to vector<8x64xf32>
      %cst_90 = arith.constant dense<0.000000e+00> : vector<8x128xf32>
      %224 = tpu.matmul %223, %204, %cst_90 {dimension_numbers = #tpu.dot_dimension_numbers<[1], [0], [0], [1], [0, 0, 1, 1], [], []>} : vector<8x64xf32>, vector<64x128xf32>, vector<8x128xf32> -> vector<8x128xf32>
      %c0_91 = arith.constant 0 : index
      %c0_92 = arith.constant 0 : index
      %225 = vector.load %arg17[%c0_91, %c0_92] : memref<1x128xf32, #tpu.memory_space<vmem>>, vector<1x128xf32>
      %c0_93 = arith.constant 0 : index
      %c0_94 = arith.constant 0 : index
      %226 = vector.load %arg18[%c0_93, %c0_94] : memref<1x128xf32, #tpu.memory_space<vmem>>, vector<1x128xf32>
      %cst_95 = arith.constant dense<0.000000e+00> : vector<8xf32>
      %227 = vector.multi_reduction <add>, %224, %cst_95 [1] : vector<8x128xf32> to vector<8xf32>
      %228 = vector.shape_cast %227 : vector<8xf32> to vector<8x1xf32>
      %cst_96 = arith.constant 1.280000e+02 : f32
      %229 = vector.broadcast %cst_96 : f32 to vector<8x1xf32>
      %230 = arith.divf %228, %229 : vector<8x1xf32>
      %231 = vector.broadcast %230 : vector<8x1xf32> to vector<8x128xf32>
      %232 = arith.subf %224, %231 : vector<8x128xf32>
      %233 = arith.mulf %232, %232 : vector<8x128xf32>
      %cst_97 = arith.constant dense<0.000000e+00> : vector<8xf32>
      %234 = vector.multi_reduction <add>, %233, %cst_97 [1] : vector<8x128xf32> to vector<8xf32>
      %235 = vector.shape_cast %234 : vector<8xf32> to vector<8x1xf32>
      %cst_98 = arith.constant 1.280000e+02 : f32
      %236 = vector.broadcast %cst_98 : f32 to vector<8x1xf32>
      %237 = arith.divf %235, %236 : vector<8x1xf32>
      %cst_99 = arith.constant 9.99999974E-6 : f32
      %238 = vector.broadcast %cst_99 : f32 to vector<8x1xf32>
      %239 = arith.addf %237, %238 : vector<8x1xf32>
      %240 = math.rsqrt %239 : vector<8x1xf32>
      %241 = vector.broadcast %240 : vector<8x1xf32> to vector<8x128xf32>
      %242 = arith.mulf %232, %241 : vector<8x128xf32>
      %243 = vector.broadcast %225 : vector<1x128xf32> to vector<8x128xf32>
      %244 = arith.mulf %242, %243 : vector<8x128xf32>
      %245 = vector.broadcast %226 : vector<1x128xf32> to vector<8x128xf32>
      %246 = arith.addf %244, %245 : vector<8x128xf32>
      %c0_100 = arith.constant 0 : index
      %c0_101 = arith.constant 0 : index
      %247 = vector.load %arg19[%c0_100, %c0_101] : memref<128x128xf32, #tpu.memory_space<vmem>>, vector<128x128xf32>
      %cst_102 = arith.constant dense<0.000000e+00> : vector<8x128xf32>
      %248 = tpu.matmul %246, %247, %cst_102 {dimension_numbers = #tpu.dot_dimension_numbers<[1], [0], [0], [1], [0, 0, 1, 1], [], []>} : vector<8x128xf32>, vector<128x128xf32>, vector<8x128xf32> -> vector<8x128xf32>
      %c0_103 = arith.constant 0 : index
      %c0_104 = arith.constant 0 : index
      %249 = vector.load %arg20[%c0_103, %c0_104] : memref<8x128xf32, #tpu.memory_space<vmem>>, vector<8x128xf32>
      tpu.vector_store %arg20[%c0_103, %c0_104], %248 {strides = array<i32>} : memref<8x128xf32, #tpu.memory_space<vmem>>, vector<8x128xf32>,
    } else {
    }
    return
  }
  func.func @transform_0(%arg0: i32, %arg1: i32) -> (i32, i32, i32) {
    %c0_i32 = arith.constant 0 : i32
    %c0_i32_0 = arith.constant 0 : i32
    %c0_i32_1 = arith.constant 0 : i32
    return %arg0, %c0_i32, %c0_i32_0 : i32, i32, i32
  }
  func.func @transform_1(%arg0: i32, %arg1: i32) -> (i32, i32) {
    %c0_i32 = arith.constant 0 : i32
    %c0_i32_0 = arith.constant 0 : i32
    %c0_i32_1 = arith.constant 0 : i32
    return %c0_i32, %c0_i32_0 : i32, i32
  }
  func.func @transform_2(%arg0: i32, %arg1: i32) -> (i32, i32) {
    %c0_i32 = arith.constant 0 : i32
    %c0_i32_0 = arith.constant 0 : i32
    return %arg0, %c0_i32 : i32, i32
  }
  func.func @transform_3(%arg0: i32, %arg1: i32) -> (i32, i32, i32) {
    %c0_i32 = arith.constant 0 : i32
    %c0_i32_0 = arith.constant 0 : i32
    %c0_i32_1 = arith.constant 0 : i32
    return %arg1, %c0_i32, %c0_i32_0 : i32, i32, i32
  }
  func.func @transform_4(%arg0: i32, %arg1: i32) -> (i32, i32, i32) {
    %c0_i32 = arith.constant 0 : i32
    %c0_i32_0 = arith.constant 0 : i32
    %c0_i32_1 = arith.constant 0 : i32
    return %arg1, %c0_i32, %c0_i32_0 : i32, i32, i32
  }
  func.func @transform_5(%arg0: i32, %arg1: i32) -> (i32, i32, i32) {
    %c0_i32 = arith.constant 0 : i32
    %c0_i32_0 = arith.constant 0 : i32
    %c0_i32_1 = arith.constant 0 : i32
    return %arg1, %c0_i32, %c0_i32_0 : i32, i32, i32
  }
  func.func @transform_6(%arg0: i32, %arg1: i32) -> (i32, i32, i32) {
    %c0_i32 = arith.constant 0 : i32
    %c0_i32_0 = arith.constant 0 : i32
    %c0_i32_1 = arith.constant 0 : i32
    return %arg1, %c0_i32, %c0_i32_0 : i32, i32, i32
  }
  func.func @transform_7(%arg0: i32, %arg1: i32) -> (i32, i32, i32) {
    %c0_i32 = arith.constant 0 : i32
    %c0_i32_0 = arith.constant 0 : i32
    %c0_i32_1 = arith.constant 0 : i32
    return %arg1, %c0_i32, %c0_i32_0 : i32, i32, i32
  }
  func.func @transform_8(%arg0: i32, %arg1: i32) -> (i32, i32, i32) {
    %c0_i32 = arith.constant 0 : i32
    %c0_i32_0 = arith.constant 0 : i32
    %c0_i32_1 = arith.constant 0 : i32
    return %arg1, %c0_i32, %c0_i32_0 : i32, i32, i32
  }
  func.func @transform_9(%arg0: i32, %arg1: i32) -> (i32, i32, i32) {
    %c0_i32 = arith.constant 0 : i32
    %c0_i32_0 = arith.constant 0 : i32
    %c0_i32_1 = arith.constant 0 : i32
    return %arg1, %c0_i32, %c0_i32_0 : i32, i32, i32
  }
  func.func @transform_10(%arg0: i32, %arg1: i32) -> (i32, i32, i32) {
    %c0_i32 = arith.constant 0 : i32
    %c0_i32_0 = arith.constant 0 : i32
    %c0_i32_1 = arith.constant 0 : i32
    return %arg1, %c0_i32, %c0_i32_0 : i32, i32, i32
  }
  func.func @transform_11(%arg0: i32, %arg1: i32) -> (i32, i32, i32) {
    %c0_i32 = arith.constant 0 : i32
    %c0_i32_0 = arith.constant 0 : i32
    %c0_i32_1 = arith.constant 0 : i32
    return %arg1, %c0_i32, %c0_i32_0 : i32, i32, i32
  }
  func.func @transform_12(%arg0: i32, %arg1: i32) -> (i32, i32, i32) {
    %c0_i32 = arith.constant 0 : i32
    %c0_i32_0 = arith.constant 0 : i32
    %c0_i32_1 = arith.constant 0 : i32
    return %arg1, %c0_i32, %c0_i32_0 : i32, i32, i32
  }
  func.func @transform_13(%arg0: i32, %arg1: i32) -> (i32, i32, i32) {
    %c0_i32 = arith.constant 0 : i32
    %c0_i32_0 = arith.constant 0 : i32
    %c0_i32_1 = arith.constant 0 : i32
    return %arg1, %c0_i32, %c0_i32_0 : i32, i32, i32
  }
  func.func @transform_14(%arg0: i32, %arg1: i32) -> (i32, i32, i32) {
    %c0_i32 = arith.constant 0 : i32
    %c0_i32_0 = arith.constant 0 : i32
    %c0_i32_1 = arith.constant 0 : i32
    return %arg1, %c0_i32, %c0_i32_0 : i32, i32, i32
  }
  func.func @transform_15(%arg0: i32, %arg1: i32) -> (i32, i32) {
    %c0_i32 = arith.constant 0 : i32
    %c0_i32_0 = arith.constant 0 : i32
    %c0_i32_1 = arith.constant 0 : i32
    return %c0_i32, %c0_i32_0 : i32, i32
  }
  func.func @transform_16(%arg0: i32, %arg1: i32) -> (i32, i32) {
    %c0_i32 = arith.constant 0 : i32
    %c0_i32_0 = arith.constant 0 : i32
    %c0_i32_1 = arith.constant 0 : i32
    return %c0_i32, %c0_i32_0 : i32, i32
  }
  func.func @transform_17(%arg0: i32, %arg1: i32) -> (i32, i32) {
    %c0_i32 = arith.constant 0 : i32
    %c0_i32_0 = arith.constant 0 : i32
    %c0_i32_1 = arith.constant 0 : i32
    return %c0_i32, %c0_i32_0 : i32, i32
  }
  func.func @transform_18(%arg0: i32, %arg1: i32) -> (i32, i32) {
    %c0_i32 = arith.constant 0 : i32
    %c0_i32_0 = arith.constant 0 : i32
    return %arg0, %c0_i32 : i32, i32
  }
}

</mosaic_0001>

<bundles_post_ra>
// kernel: tpu_custom_call.1
= control target key start
LH: loop header
LB: loop body
LE: loop exit
PB: predicated region body
PF: predicated region fallthrough
CT: control target
= control target key end

     0   :  { %s9532_s0 = inlined_call_operand.hbm [shape: f32[16,8,128], index: 0, kind: input, shape index: {}]   ;;  %s9533_s1 = inlined_call_operand.vmem [shape: f32[8,128], index: 1, kind: input, shape index: {}]   ;;  %s9534_s2 = inlined_call_operand.vmem [shape: s32[16,8], index: 2, kind: input, shape index: {}]   ;;  %s9535_s3 = inlined_call_operand.vmem [shape: f32[2,1,128], index: 3, kind: input, shape index: {}]   ;;  %s9536_s4 = inlined_call_operand.vmem [shape: f32[2,1,128], index: 4, kind: input, shape index: {}]   ;;  %s9537_s5 = inlined_call_operand.hbm [shape: f32[2,128,384], index: 5, kind: input, shape index: {}]   ;;  %s9538_s6 = inlined_call_operand.vmem [shape: f32[2,1,384], index: 6, kind: input, shape index: {}]   ;;  %s9539_s7 = inlined_call_operand.hbm [shape: f32[2,128,128], index: 7, kind: input, shape index: {}]   ;;  %s9540_s8 = inlined_call_operand.vmem [shape: f32[2,1,128], index: 8, kind: input, shape index: {}]   ;;  %s9541_s9 = inlined_call_operand.vmem [shape: f32[2,1,128], index: 9, kind: input, shape index: {}]   ;;  %s9542_s10 = inlined_call_operand.vmem [shape: f32[2,1,128], index: 10, kind: input, shape index: {}]   ;;  %s9543_s11 = inlined_call_operand.hbm [shape: f32[2,128,512], index: 11, kind: input, shape index: {}]   ;;  %s9544_s12 = inlined_call_operand.vmem [shape: f32[2,1,512], index: 12, kind: input, shape index: {}]   ;;  %s9545_s13 = inlined_call_operand.hbm [shape: f32[2,512,128], index: 13, kind: input, shape index: {}]   ;;  %s9546_s14 = inlined_call_operand.vmem [shape: f32[2,1,128], index: 14, kind: input, shape index: {}]   ;;  %s9547_s15 = inlined_call_operand.vmem [shape: f32[1,128], index: 15, kind: input, shape index: {}]   ;;  %s9548_s16 = inlined_call_operand.vmem [shape: f32[1,128], index: 16, kind: input, shape index: {}]   ;;  %s9549_s17 = inlined_call_operand.hbm [shape: f32[128,128], index: 17, kind: input, shape index: {}]   ;;  %s9550_s18 = inlined_call_operand.hbm [shape: f32[16,128], index: 18, kind: output, shape index: {}]  }
   0x1   :  { %9577 = sst [smem:[#allocation39_spill]] %s9532_s0 }
   0x2   :  { %9578 = sst [smem:[#allocation40_spill]] %s9533_s1 }
   0x3   :  { %9579 = sst [smem:[#allocation41_spill]] %s9534_s2 }
   0x4   :  { %9580 = sst [smem:[#allocation42_spill]] %s9535_s3 }
   0x5   :  { %9581 = sst [smem:[#allocation43_spill]] %s9536_s4 }
   0x6   :  { %9582 = sst [smem:[#allocation44_spill]] %s9537_s5 }
   0x7   :  { %9583 = sst [smem:[#allocation45_spill]] %s9538_s6 }
   0x8   :  { %9584 = sst [smem:[#allocation46_spill]] %s9539_s7 }
   0x9   :  { %9585 = sst [smem:[#allocation47_spill]] %s9540_s8 }
   0xa   :  { %9586 = sst [smem:[#allocation48_spill]] %s9541_s9 }
   0xb   :  { %9587 = sst [smem:[#allocation49_spill]] %s9542_s10 }
   0xc   :  { %9588 = sst [smem:[#allocation50_spill]] %s9543_s11 }
   0xd   :  { %9589 = sst [smem:[#allocation51_spill]] %s9544_s12 }
   0xe   :  { %9590 = sst [smem:[#allocation52_spill]] %s9545_s13 }
   0xf   :  { %9591 = sst [smem:[#allocation53_spill]] %s9546_s14 }
  0x10   :  { %9592 = sst [smem:[#allocation54_spill]] %s9547_s15 }
  0x11   :  { %9593 = sst [smem:[#allocation55_spill]] %s9548_s16 }
  0x12   :  { %9594 = sst [smem:[#allocation56_spill]] %s9549_s17 }
  0x13   :  { %9595 = sst [smem:[#allocation57_spill]] %s9550_s18 }
  0x14   :  { %23 = vsyncpa [#allocation4], 0 }
  0x15   :  { %25 = vsyncpa [#allocation4 + $0x1], 0 }
  0x16   :  { %26 = vsyncpa [#allocation7], 0 }
  0x17   :  { %28 = vsyncpa [#allocation7 + $0x1], 0 }
  0x18   :  { %29 = vsyncpa [#allocation10], 0 }
  0x19   :  { %31 = vsyncpa [#allocation10 + $0x1], 0 }
  0x1a   :  { %32 = vsyncpa [#allocation13], 0 }
  0x1b   :  { %33 = vsyncpa [#allocation5], 0 }
  0x1c   :  { %35 = vsyncpa [#allocation5 + $0x1], 0  ;;  %s7039_s27 = smov 0   ;;  %s7041_s28 = smov 0  }
  0x1d   :  { %s7043_s29 = smov 0   ;;  %s7045_s30 = smov 0  }
  0x1e   :  { %s7047_s0 = smov 0   ;;  %s7049_s19 = smov 0  }
  0x1f   :  { %s7051_s1 = smov 0   ;;  %s7053_s20 = smov 0  }
  0x20   :  { %s7055_s21 = smov 0   ;;  %s7057_s22 = smov 0  }
  0x21   :  { %s7059_s2 = smov 0  }
  0x22 LB: > { %9596 = sst [smem:[#allocation20_spill]] %s6893_s28  ;;  %s50_s23 = sadd.s32 1, %s6921_s21  ;;  %s6929_s2 = sphi %s7059_s2, %s41_s2   ;;  %s6925_s22 = sphi %s7057_s22, %s9746_s22   ;;  %s6921_s21 = sphi %s7055_s21, %s9745_s21   ;;  %s6917_s20 = sphi %s7053_s20, %s9744_s20   ;;  %s6913_s1 = sphi %s7051_s1, %s9743_s1   ;;  %s6909_s19 = sphi %s7049_s19, %s9742_s19   ;;  %s6905_s0 = sphi %s7047_s0, %s9741_s0   ;;  %s6901_s30 = sphi %s7045_s30, %s9740_s30   ;;  %s6897_s29 = sphi %s7043_s29, %s9739_s29   ;;  %s6893_s28 = sphi %s7041_s28, %s9738_s28   ;;  %s6889_s27 = sphi %s7039_s27, %s9737_s27  }
  0x23   : > { %9597 = sst [smem:[#allocation21_spill]] %s6897_s29  ;;  %p68_p0 = scmp.eq.s32.totalorder %s6929_s2, 0 }
  0x24   : > { %9598 = sst [smem:[#allocation22_spill]] %s6901_s30  ;;  %p7096_p1 = scmp.ge.s32.totalorder %s50_s23, 2 }
  0x25   : > { %9599 = sst [smem:[#allocation23_spill]] %s6905_s0  ;;  %s185_s25 = sadd.s32 1, %s6897_s29 }
  0x26   : > { %9600 = sst [smem:[#allocation24_spill]] %s6909_s19  ;;  %p192_p2 = scmp.ne.s32.totalorder %s6897_s29, %s6893_s28 }
  0x27   : > { %9601 = sst [smem:[#allocation25_spill]] %s6913_s1  ;;  %p198_p3 = scmp.ne.s32.totalorder %s6893_s28, %s6889_s27 }
  0x28   : > { %9602 = sst [smem:[#allocation26_spill]] %s6917_s20  ;;  %s9748_s23 = smov (%p7096_p1, %s50_s23), 0 }
  0x29   : > { %9603 = sst [smem:[#allocation27_spill]] %s6921_s21  ;;  %p194_p4 = por %p192_p2, %p68_p0 }
  0x2a   : > { %9604 = sst [smem:[#allocation28_spill]] %s6925_s22  ;;  %s182_s26 = ssub.s32 %s6921_s21, %s9748_s23 }
  0x2b   : > { %9605 = sst [smem:[#allocation29_spill]] %s6929_s2  ;;  %p9556_p5 = scmp.lt.s32.totalorder %s6929_s2, 4 }
  0x2c   : > { %9607 = sst [smem:[#allocation30_spill]] %s9748_s23  ;;  %p183_p6 = scmp.eq.s32.totalorder %s182_s26, 0 }
  0x2d   : > { %s609_s18 = sand.u32 1, %s6929_s2   ;;  %s7116_s16 = sand.u32 1, %s6897_s29  }
  0x2e   : > { %s7119_s15 = scalar_select %p183_p6, %s6897_s29, %s185_s25  }
  0x2f   : > { %s6103_s12 = smul.u32 384, %s7116_s16  ;;  %p7124_p7 = pnand %p9556_p5, %p194_p4 }
  0x30   : > { %9608 = sst [smem:[#allocation31_spill]] %s7119_s15  ;;  %s6104_s10 = smul.u32 384, %s6921_s21 }
  0x31   : > { %s9610_s5 = sld [smem:[#allocation44_spill]]  ;;  %s613_s9 = scalar_lea.vmem [#allocation6], %s6103_s12 }
  0x32   : > { %s621_s8 = sshll.u32 %s613_s9, 4  ;;  %s7132_s25 = scalar_lea.sflag [#allocation7], %s609_s18  ;;  %s622_s8 = int_to_ptr.vmem [resolvable:$true] %s621_s8 }
  0x33   : > { %s6931_s15 = smov 384   ;;  %s6932_s29 = smov 24  }
  0x34   : > { %s5932_s3 = sshll.u32 %s7116_s16, 9  ;;  %s6085_s1 = sshll.u32 %s6921_s21, 9 }
  0x35   : > { %s9611_s11 = sld [smem:[#allocation50_spill]]  ;;  %s7142_s23 = scalar_lea.sflag [#allocation10], %s609_s18 }
  0x36   : > { %s9612_s13 = sld [smem:[#allocation52_spill]]  ;;  %s711_s20 = scalar_lea.vmem [#allocation11], %s5932_s3 }
  0x37   : > { %s618_s26 = scalar_lea.hbm %s9610_s5, %s6104_s10  ;;  %s682_s10 = scalar_lea.vmem [#allocation9], %s5932_s3 }
  0x38   : > { %s619_s4 = sshll.u32 %s618_s26, 4  ;;  %s690_s9 = sshll.u32 %s682_s10, 4  ;;  %s620_s4 = int_to_ptr.hbm [resolvable:$true] %s619_s4  ;;  %s691_s9 = int_to_ptr.vmem [resolvable:$true] %s690_s9 }
  0x39   : > { %6133 = dma.hbm_to_vmem [thread:$0]  (!%p7124_p7), %s620_s4, 6144, %s622_s8, %s7132_s25, %s6931_s15, %s6931_s15, %s6932_s29  }
  0x3a   : > { %s6933_s4 = smov 512   ;;  %s6934_s8 = smov 32  }
  0x3b   : > { %s687_s6 = scalar_lea.hbm %s9611_s11, %s6085_s1  ;;  %s719_s26 = sshll.u32 %s711_s20, 4  ;;  %s7150_s26 = int_to_ptr.vmem [resolvable:$true] %s719_s26 }
  0x3c   : > { %s688_s12 = sshll.u32 %s687_s6, 4  ;;  %s716_s29 = scalar_lea.hbm %s9612_s13, %s6085_s1  ;;  %s689_s12 = int_to_ptr.hbm [resolvable:$true] %s688_s12 }
  0x3d   : > { %6139 = dma.hbm_to_vmem [thread:$0]  (!%p7124_p7), %s689_s12, 8192, %s691_s9, %s7142_s23, %s6933_s4, %s6933_s4, %s6934_s8  }
  0x3e   : > { %s717_s6 = sshll.u32 %s716_s29, 4  ;;  %s7155_s10 = sadd.s32 4294967295, %s6929_s2   ;;  %s7152_s6 = int_to_ptr.hbm [resolvable:$true] %s717_s6 }
  0x3f   : > { %p74_p8 = scmp.eq.s32.totalorder %s7155_s10, 0  ;;  %p519_p9 = scmp.eq.s32.totalorder %s7155_s10, 3 }
  0x40   : > { %p5922_p10 = scmp.ge.s32.totalorder %s6929_s2, 1  ;;  %p532_p11 = scmp.lt.s32.totalorder %s6929_s2, 5 }
  0x41   : > { %p7166_p12 = por %p198_p3, %p74_p8  ;;  %s9615_s17 = sld [smem:[#allocation56_spill]] }
  0x42   : > { %p7170_p13 = pnand %p5922_p10, %p532_p11  ;;  %s6935_s27 = smov [#allocation12]  }
  0x43   : > { %s554_s4 = sshll.u32 %s6935_s27, 4  ;;  %s9557_s8 = smov 128   ;;  %s555_s4 = int_to_ptr.vmem [resolvable:$true] %s554_s4 }
  0x44   : > { %p6123_p2 = pneg %p7170_p13  ;;  %s9559_s15 = smov 8  }
  0x45   : > { %s5921_s7 = sadd.s32 4294967294, %s6929_s2   ;;  %s53_s29 = sadd.s32 1, %s6925_s22 }
  0x46   : > { %p6124_p3 = pnand %p6123_p2, %p74_p8  ;;  %s60_s20 = sadd.s32 1, %s6909_s19 }
  0x47   : > { %s552_s12 = sshll.u32 %s9615_s17, 4  ;;  %s9750_s29 = smov (!%p7096_p1, %s53_s29), %s6925_s22  ;;  %s553_s12 = int_to_ptr.hbm [resolvable:$true] %s552_s12 }
  0x48   : > { %6126 = dma.hbm_to_vmem [thread:$0]  (!%p6124_p3), %s553_s12, 2048, %s555_s4, [#allocation13], %s9557_s8, %s9557_s8, %s9559_s15  }
  0x49   : > { %p67_p4 = scmp.ne.s32.totalorder %s6909_s19, %s6905_s0  ;;  %p73_p6 = scmp.ne.s32.totalorder %s6905_s0, %s6901_s30 }
  0x4a   : > { %p55_p10 = scmp.ge.s32.totalorder %s9750_s29, 2  ;;  %p525_p11 = scmp.eq.s32.totalorder %s5921_s7, 3 }
  0x4b   : > { %p7196_p2 = por %p68_p0, %p67_p4  ;;  %p7202_p5 = por %p74_p8, %p73_p6 }
  0x4c   : > { %s9752_s29 = smov (%p55_p10, %s9750_s29), 0  ;;  %p7210_p1 = por %p519_p9, %p67_p4 }
  0x4d   : > { %9618 = sst [smem:[#allocation32_spill]] %s9752_s29  ;;  %p7214_p0 = por %p525_p11, %p73_p6 }
  0x4e   : > { %s9619_s24 = scalar_select %p7210_p1, 1, 0 }
  0x4f   : > { %s9621_s12 = scalar_select %p7214_p0, 1, 0 }
  0x50   : > { %9620 = sst [smem:[#allocation33_spill]] %s9619_s24  ;;  %s57_s27 = ssub.s32 %s6925_s22, %s9752_s29 }
  0x51   : > { %9622 = sst [smem:[#allocation34_spill]] %s9621_s12  ;;  %s568_s4 = sand.u32 1, %s6909_s19  }
  0x52   : > { %p58_p3 = scmp.eq.s32.totalorder %s57_s27, 0  ;;  %s5925_s7 = sshll.u32 %s568_s4, 6 }
  0x53   : > { %s6083_s8 = sshll.u32 %s6925_s22, 6  ;;  %s9624_s13 = sld [smem:[#allocation39_spill]] }
  0x54   : > { %s7223_s15 = scalar_select %p58_p3, %s6909_s19, %s60_s20  }
  0x55   : > { %s572_s24 = scalar_lea.vmem [#allocation3], %s5925_s7  ;;  %p9625_p9 = scmp.lt.s32.totalorder %s6929_s2, 4 }
  0x56   : > { %9623 = sst [smem:[#allocation35_spill]] %s7223_s15  ;;  %s580_s12 = sshll.u32 %s572_s24, 4  ;;  %s581_s12 = int_to_ptr.vmem [resolvable:$true] %s580_s12 }
  0x57   : > { %p6128_p4 = pnand %p9625_p9, %p7196_p2  ;;  %s5929_s20 = sshll.u32 %s7116_s16, 7 }
  0x58   : > { %s6084_s27 = sshll.u32 %s6921_s21, 7  ;;  %s9626_s5 = sld [smem:[#allocation46_spill]] }
  0x59   : > { %s577_s17 = scalar_lea.hbm %s9624_s13, %s6083_s8  ;;  %s569_s13 = scalar_lea.sflag [#allocation4], %s568_s4 }
  0x5a   : > { %s578_s30 = sshll.u32 %s577_s17, 4  ;;  %s9627_s17 = smov 8   ;;  %s579_s30 = int_to_ptr.hbm [resolvable:$true] %s578_s30 }
  0x5b   : > { %s9628_s8 = smov 128   ;;  %s642_s15 = scalar_lea.vmem [#allocation8], %s5929_s20 }
  0x5c   : > { %6130 = dma.hbm_to_vmem [thread:$0]  (!%p6128_p4), %s579_s30, 1024, %s581_s12, %s569_s13, %s9628_s8, %s9628_s8, %s9627_s17  }
  0x5d   : > { %s650_s19 = sshll.u32 %s642_s15, 4  ;;  %737 = sbr.rel (%p7170_p13) target bundleno = 4358 (0x1106), region = 92  ;;  %s651_s19 = int_to_ptr.vmem [resolvable:$true] %s650_s19 }
  0x5e   : > { %s647_s11 = scalar_lea.hbm %s9626_s5, %s6084_s27 }
  0x5f   : > { %s648_s7 = sshll.u32 %s647_s11, 4  ;;  %s649_s7 = int_to_ptr.hbm [resolvable:$true] %s648_s7 }
  0x60   : > { %6136 = dma.hbm_to_vmem [thread:$0]  (!%p7124_p7), %s649_s7, 2048, %s651_s19, %s7132_s25, %s9628_s8, %s9628_s8, %s9627_s17  }
  0x61   : > { %6142 = dma.hbm_to_vmem [thread:$0]  (!%p7124_p7), %s7152_s6, 8192, %s7150_s26, %s7142_s23, %s9628_s8, %s9628_s8, %s9627_s17  }
  0x62   : > { %s7257_s16 = sand.u32 1, %s6905_s0  }
  0x63   : > { %9629 = sst [smem:[#allocation36_spill]] %s7257_s16  ;;  %s5939_s30 = sshll.u32 %s7257_s16, 6 }
  0x64   : > { %s740_s22 = scalar_lea.sflag [#allocation4], %s7257_s16  ;;  %s7261_s15 = scalar_lea.vmem [#allocation3], %s5939_s30 }
  0x65   : > { %6868 = dma.done.wait (%p7202_p5), %s740_s22, 1024  }
  0x66   : > { %6870 = vsyncadd (%p7202_p5), %s740_s22, 4294966272  ;;  %s749_s14 = sand.u32 1, %s7155_s10   ;;  %s751_s19 = sand.u32 1, %s6893_s28  }
  0x67   : > { %s6105_s25 = smul.u32 384, %s751_s19  ;;  %s750_s23 = scalar_lea.sflag [#allocation7], %s749_s14 }
  0x69   : > { %s7269_s26 = scalar_lea.vmem [#allocation6], %s6105_s25 }
  0x6a   : > { %6872 = dma.done.wait (%p7166_p12), %s750_s23, 8192  }
  0x6b   : > { %6874 = vsyncadd (%p7166_p12), %s750_s23, 4294959104  ;;  %s5940_s6 = sshll.u32 %s751_s19, 7  ;;  %s5941_s18 = sshll.u32 %s751_s19, 9 }
  0x6c   : > { %s7275_s29 = scalar_lea.vmem [#allocation8], %s5940_s6  ;;  %s770_s1 = scalar_lea.sflag [#allocation10], %s749_s14 }
  0x6d   : > { %s7277_s9 = scalar_lea.vmem [#allocation9], %s5941_s18 }
  0x6e   : > { %6876 = dma.done.wait (%p7166_p12), %s770_s1, 16384  }
  0x6f   : > { %6878 = vsyncadd (%p7166_p12), %s770_s1, 4294950912  ;;  %s7283_s24 = scalar_lea.vmem [#allocation11], %s5941_s18 }
  0x70   : > { %6880 = dma.done.wait (%p74_p8), [#allocation13], 2048  }
  0x71   : > { %6882 = vsyncadd (%p74_p8), [#allocation13], 4294965248  ;;  %s9630_s12 = sld [smem:[#allocation26_spill]]  ;;  %s5944_s20 = sshll.u32 %s7257_s16, 3 }
  0x72   : > { %s9631_s4 = sld [smem:[#allocation25_spill]] }
  0x73   : > { %s9632_s11 = sld [smem:[#allocation41_spill]] }
  0x74   : > { %s9636_s28 = sld [smem:[#allocation48_spill]] }
  0x75   : > { %s9637_s5 = sld [smem:[#allocation45_spill]] }
  0x76   : > { %s9638_s7 = sld [smem:[#allocation49_spill]] }
  0x77   : > { %p893_p5 = scmp.lt.s32.totalorder %s9630_s12, 1  ;;  %s9639_s25 = sld [smem:[#allocation53_spill]] }
  0x78   : > { %p897_p7 = scmp.lt.s32.totalorder %s9631_s4, 1  ;;  %s9640_s1 = sld [smem:[#allocation51_spill]] }
  0x79   : > { %s9754_s12 = smov (!%p893_p5, %s9630_s12), 1  ;;  %p5947_p8 = scmp.ne.s32.totalorder %s9631_s4, 0 }
  0x7a   : > { %s7294_s27 = scalar_select %p897_p7, %s9631_s4, 1 }
  0x7b   : > { %s5945_s10 = sshll.u32 %s9754_s12, 3 }
  0x7c   : > { %s7299_s13 = scalar_lea.vmem %s9632_s11, %s5945_s10  ;;  %s6106_s23 = smul.u32 3, %s7294_s27 }
  0x7d   : > { %s912_s2 = scalar_lea.vmem %s9636_s28, %s7294_s27  ;;  %s915_s30 = scalar_lea.vmem %s9638_s7, %s7294_s27 }
  0x7e   : > { %s7321_s11 = scalar_lea.vmem %s9637_s5, %s6106_s23  ;;  %s5946_s22 = sshll.u32 %s7294_s27, 2 }
  0x7f   : > { %s922_s16 = scalar_lea.vmem %s9639_s25, %s7294_s27  ;;  %s7335_s21 = scalar_lea.vmem %s9640_s1, %s5946_s22 }
  0x80   : > { %s7337_s28 = scalar_lea.vmem [#allocation14], %s5944_s20  ;;  %926 = sbr.rel (%p5947_p8) target bundleno = 146 (0x92), region = 120 }
  0x81   : > { %s9641_s23 = sld [smem:[#allocation40_spill]] (!%p5947_p8) }
  0x85   : > { %v927_v0 = vld [vmem:[%s7261_s15] sm:$0xff]  ;;  %v928_v2 = vld [vmem:[%s7261_s15 + $0x8] sm:$0xff]  ;;  %v929_v5 = vld [vmem:[%s7261_s15 + $0x10] sm:$0xff] }
  0x86   : > { %v930_v6 = vld [vmem:[%s7261_s15 + $0x18] sm:$0xff]  ;;  %v931_v7 = vld [vmem:[%s7261_s15 + $0x20] sm:$0xff]  ;;  %v932_v10 = vld [vmem:[%s7261_s15 + $0x28] sm:$0xff] }
  0x87   : > { %v935_v1 = vld [vmem:[%s9641_s23] sm:$0xff]  ;;  %v933_v11 = vld [vmem:[%s7261_s15 + $0x30] sm:$0xff]  ;;  %v934_v13 = vld [vmem:[%s7261_s15 + $0x38] sm:$0xff] }
  0x88   : > { %v936_v3 = vadd.f32 %v935_v1, %v927_v0  ;;  %v937_v4 = vadd.f32 %v935_v1, %v928_v2  ;;  %v938_v8 = vadd.f32 %v935_v1, %v929_v5  ;;  %v939_v9 = vadd.f32 %v935_v1, %v930_v6 }
  0x89   : > { %v940_v12 = vadd.f32 %v935_v1, %v931_v7  ;;  %v941_v14 = vadd.f32 %v935_v1, %v932_v10  ;;  %v942_v15 = vadd.f32 %v935_v1, %v933_v11  ;;  %v943_v16 = vadd.f32 %v935_v1, %v934_v13 }
  0x8a   : > { %944 = vst [vmem:[#allocation2 + $0x30] sm:$0xff] %v936_v3 }
  0x8b   : > { %945 = vst [vmem:[#allocation2] sm:$0xff] %v937_v4 }
  0x8c   : > { %946 = vst [vmem:[#allocation2 + $0x18] sm:$0xff] %v938_v8 }
  0x8d   : > { %947 = vst [vmem:[#allocation2 + $0x10] sm:$0xff] %v939_v9 }
  0x8e   : > { %948 = vst [vmem:[#allocation2 + $0x8] sm:$0xff] %v940_v12 }
  0x8f   : > { %949 = vst [vmem:[#allocation2 + $0x20] sm:$0xff] %v941_v14 }
  0x90   : > { %950 = vst [vmem:[#allocation2 + $0x28] sm:$0xff] %v942_v15 }
  0x91   : > { %951 = vst [vmem:[#allocation2 + $0x38] sm:$0xff] %v943_v16 }
  0x92 PF: > { %v952_v19 = vld [vmem:[#allocation2 + $0x30] sm:$0xff]  ;;  %v953_v22 = vld [vmem:[#allocation2] sm:$0xff]  ;;  %v6938_v24 = vmov 128.0   ;;  %v1196_v33 = vld [vmem:[%s7269_s26 + $0x168] sm:$0xff]  ;;  %s9642_s4 = sld [smem:[#allocation42_spill]]  ;;  %s6941_s17 = smov 64  }
  0x93   : > { %v954_v18 = vld [vmem:[#allocation2 + $0x18] sm:$0xff]  ;;  %962 = vadd.xlane.f32.xlu0 %v952_v19  ;;  %6313 = vrcp.f32 %v6938_v24  ;;  %v1197_v34 = vld [vmem:[%s7269_s26 + $0x170] sm:$0xff]  ;;  %1207 = vmatpush.msra.mxu0 %v1196_v33  ;;  %v1191_v1 = vld [vmem:[%s7269_s26 + $0x140] sm:$0xff]  ;;  %s9644_s10 = sld [smem:[#allocation43_spill]]  ;;  %s6942_s8 = smov 32  }
  0x94   : > { %966 = vadd.xlane.f32.xlu1 %v954_v18  ;;  %v955_v21 = vld [vmem:[#allocation2 + $0x10] sm:$0xff]  ;;  %1248 = vmatpush.msra.mxu1 %v1197_v34  ;;  %v1194_v38 = vld [vmem:[%s7269_s26 + $0x158] sm:$0xff]  ;;  %v1187_v2 = vld [vmem:[%s7269_s26 + $0x120] sm:$0xff]  ;;  %s9664_s22 = sld [smem:[#allocation47_spill]] }
  0x95   : > { %v956_v17 = vld [vmem:[#allocation2 + $0x8] sm:$0xff]  ;;  %v1193_v35 = vld [vmem:[%s7269_s26 + $0x150] sm:$0xff]  ;;  %v1190_v0 = vld [vmem:[%s7269_s26 + $0x138] sm:$0xff] }
  0x96   : > { %970 = vadd.xlane.f32.xlu2 %v956_v17  ;;  %v957_v20 = vld [vmem:[#allocation2 + $0x20] sm:$0xff]  ;;  %1208 = vmatpush.msra.mxu0 %v1193_v35  ;;  %v1188_v3 = vld [vmem:[%s7269_s26 + $0x128] sm:$0xff]  ;;  %v1185_v5 = vld [vmem:[%s7269_s26 + $0x110] sm:$0xff] }
  0x97   : > { %v958_v23 = vld [vmem:[#allocation2 + $0x28] sm:$0xff]  ;;  %1249 = vmatpush.msra.mxu1 %v1194_v38  ;;  %v1181_v6 = vld [vmem:[%s7269_s26 + $0xf0] sm:$0xff]  ;;  %v1182_v7 = vld [vmem:[%s7269_s26 + $0xf8] sm:$0xff] }
  0x98   : > { %v7377_v54 = vld [vmem:[#allocation2 + $0x38] sm:$0xff]  ;;  %1209 = vmatpush.msra.mxu0 %v1190_v0  ;;  %v1184_v4 = vld [vmem:[%s7269_s26 + $0x108] sm:$0xff]  ;;  %v1179_v9 = vld [vmem:[%s7269_s26 + $0xe0] sm:$0xff]  ;;  %s9643_s20 = scalar_lea.vmem %s9642_s4, %s7294_s27 }
  0x99   : > { %v6314_v25 = vpop.eup %6313  ;;  %1250 = vmatpush.msra.mxu1 %v1191_v1  ;;  %v1178_v8 = vld [vmem:[%s7269_s26 + $0xd8] sm:$0xff]  ;;  %v1175_v10 = vld [vmem:[%s7269_s26 + $0xc0] sm:$0xff]  ;;  %v1176_v11 = vld [vmem:[%s7269_s26 + $0xc8] sm:$0xff]  ;;  %s9645_s5 = scalar_lea.vmem %s9644_s10, %s7294_s27 }
  0x9a   : > { %v979_v26 = vmul.f32 128.0, %v6314_v25  ;;  %vm983_vm0 = vweird.f32 %v6314_v25  ;;  %1210 = vmatpush.msra.mxu0 %v1187_v2  ;;  %v1172_v12 = vld [vmem:[%s7269_s26 + $0xa8] sm:$0xff]  ;;  %v1173_v13 = vld [vmem:[%s7269_s26 + $0xb0] sm:$0xff]  ;;  %v1198_v14 = vld [vmem:[%s7269_s26 + $0x178] sm:$0xff]  ;;  %s9665_s14 = scalar_lea.vmem %s9664_s22, %s7294_s27 }
  0x9b   : > { %964 = vadd.xlane.f32.xlu0 %v953_v22  ;;  %1251 = vmatpush.msra.mxu1 %v1188_v3  ;;  %v1169_v15 = vld [vmem:[%s7269_s26 + $0x90] sm:$0xff]  ;;  %v1170_v16 = vld [vmem:[%s7269_s26 + $0x98] sm:$0xff]  ;;  %v1160_v24 = vld [vmem:[%s7269_s26 + $0x48] sm:$0xff] }
  0x9c   : > { %968 = vadd.xlane.f32.xlu1 %v955_v21  ;;  %v980_v27 = vsub.f32 1.0, %v979_v26  ;;  %1211 = vmatpush.msra.mxu0 %v1184_v4  ;;  %v1186_v26 = vld [vmem:[%s7269_s26 + $0x118] sm:$0xff]  ;;  %v1180_v33 = vld [vmem:[%s7269_s26 + $0xe8] sm:$0xff]  ;;  %v1151_v34 = vld [vmem:[%s7269_s26] sm:$0xff] }
  0x9d   : > { %1252 = vmatpush.msra.mxu1 %v1185_v5  ;;  %6087 = vmatpush.msra.mxu2 %v1198_v14  ;;  %v1152_v35 = vld [vmem:[%s7269_s26 + $0x8] sm:$0xff] }
  0x9e   : > { %972 = vadd.xlane.f32.xlu2 %v957_v20  ;;  %v981_v28 = vmul.f32 %v6314_v25, %v980_v27  ;;  %1212 = vmatpush.msra.mxu0 %v1181_v6  ;;  %v1157_v27 = vld [vmem:[%s7269_s26 + $0x30] sm:$0xff] }
  0x9f   : > { %1253 = vmatpush.msra.mxu1 %v1182_v7  ;;  %v1153_v6 = vld [vmem:[%s7269_s26 + $0x10] sm:$0xff] }
  0xa0   : > { %v982_v29 = vadd.f32 %v6314_v25, %v981_v28  ;;  %1213 = vmatpush.msra.mxu0 %v1178_v8  ;;  %v1158_v28 = vld [vmem:[%s7269_s26 + $0x38] sm:$0xff] }
  0xa1   : > { %1254 = vmatpush.msra.mxu1 %v1179_v9 }
  0xa2   : > { %v7351_v30 = vsel %vm983_vm0, %v6314_v25, %v982_v29  ;;  %1214 = vmatpush.msra.mxu0 %v1175_v10  ;;  %v1161_v25 = vld [vmem:[%s7269_s26 + $0x50] sm:$0xff]  ;;  %v1183_v29 = vld [vmem:[%s7269_s26 + $0x100] sm:$0xff] }
  0xa3   : > { %1255 = vmatpush.msra.mxu1 %v1176_v11 }
  0xa4   : > { %974 = vadd.xlane.f32.xlu1 %v958_v23  ;;  %1215 = vmatpush.msra.mxu0 %v1172_v12 }
  0xa5   : > { %1256 = vmatpush.msra.mxu1 %v1173_v13 }
  0xa6   : > { %1216 = vmatpush.msra.mxu0 %v1169_v15 }
  0xa7   : > { %1257 = vmatpush.msra.mxu1 %v1170_v16 }
 0x106   : > { %v963_v37 = vpop.xlane.xlu0 %962 }
 0x107   : > { %v967_v32 = vpop.xlane.xlu1 %966  ;;  %v985_v39 = vmul.f32 %v7351_v30, %v963_v37  ;;  %v1174_v37 = vld [vmem:[%s7269_s26 + $0xb8] sm:$0xff] }
 0x108   : > { %v987_v36 = vmul.f32 %v7351_v30, %v967_v32  ;;  %v1155_v32 = vld [vmem:[%s7269_s26 + $0x20] sm:$0xff] }
 0x109   : > { %v971_v31 = vpop.xlane.xlu2 %970  ;;  %v7361_v41 = vsub.f32 %v952_v19, %v985_v39  ;;  %v1167_v19 = vld [vmem:[%s7269_s26 + $0x80] sm:$0xff] }
 0x10a   : > { %v7359_v40 = vsub.f32 %v954_v18, %v987_v36  ;;  %v989_v50 = vmul.f32 %v7351_v30, %v971_v31  ;;  %v1166_v18 = vld [vmem:[%s7269_s26 + $0x78] sm:$0xff]  ;;  %1258 = vmatpush.msra.mxu1 %v1167_v19  ;;  %v1177_v36 = vld [vmem:[%s7269_s26 + $0xd0] sm:$0xff] }
 0x10b   : > { %v1001_v43 = vmul.f32 %v7361_v41, %v7361_v41  ;;  %1217 = vmatpush.msra.mxu0 %v1166_v18  ;;  %v1154_v31 = vld [vmem:[%s7269_s26 + $0x18] sm:$0xff] }
 0x10c   : > { %v1003_v42 = vmul.f32 %v7359_v40, %v7359_v40  ;;  %v7382_v56 = vsub.f32 %v956_v17, %v989_v50  ;;  %v1195_v17 = vld [vmem:[%s7269_s26 + $0x160] sm:$0xff]  ;;  %v1162_v50 = vld [vmem:[%s7269_s26 + $0x58] sm:$0xff] }
 0x10d   : > { %1009 = vadd.xlane.f32.xlu0 %v1001_v43  ;;  %6088 = vmatpush.msra.mxu2 %v1195_v17  ;;  %v1171_v43 = vld [vmem:[%s7269_s26 + $0xa0] sm:$0xff] }
 0x10e   : > { %1013 = vadd.xlane.f32.xlu1 %v1003_v42  ;;  %v965_v47 = vpop.xlane.xlu0 %964  ;;  %v1005_v59 = vmul.f32 %v7382_v56, %v7382_v56 }
 0x10f   : > { %v969_v45 = vpop.xlane.xlu1 %968  ;;  %v986_v48 = vmul.f32 %v7351_v30, %v965_v47 }
 0x110   : > { %v988_v52 = vmul.f32 %v7351_v30, %v969_v45 }
 0x111   : > { %v973_v44 = vpop.xlane.xlu2 %972  ;;  %v7372_v51 = vsub.f32 %v953_v22, %v986_v48  ;;  %v1164_v22 = vld [vmem:[%s7269_s26 + $0x68] sm:$0xff]  ;;  %v1165_v48 = vld [vmem:[%s7269_s26 + $0x70] sm:$0xff] }
 0x112   : > { %v990_v46 = vmul.f32 %v7351_v30, %v973_v44  ;;  %v7384_v57 = vsub.f32 %v955_v21, %v988_v52  ;;  %v1163_v21 = vld [vmem:[%s7269_s26 + $0x60] sm:$0xff]  ;;  %1259 = vmatpush.msra.mxu1 %v1164_v22 }
 0x113   : > { %v1002_v55 = vmul.f32 %v7372_v51, %v7372_v51  ;;  %1218 = vmatpush.msra.mxu0 %v1163_v21  ;;  %v7469_v22 = vld [vmem:[%s9643_s20] ss:$0 sm:$0xff] }
 0x114   : > { %v7369_v49 = vsub.f32 %v957_v20, %v990_v46  ;;  %v1004_v60 = vmul.f32 %v7384_v57, %v7384_v57  ;;  %v1192_v20 = vld [vmem:[%s7269_s26 + $0x148] sm:$0xff]  ;;  %1260 = vmatpush.msra.mxu1 %v1161_v25 }
 0x115   : > { %976 = vadd.xlane.f32.xlu0 %v7377_v54  ;;  %1011 = vadd.xlane.f32.xlu2 %v1002_v55  ;;  %v1168_v46 = vld [vmem:[%s7269_s26 + $0x88] sm:$0xff] }
 0x116   : > { %v1006_v53 = vmul.f32 %v7369_v49, %v7369_v49  ;;  %6089 = vmatpush.msra.mxu2 %v1192_v20  ;;  %1219 = vmatpush.msra.mxu0 %v1160_v24 }
 0x117   : > { %v975_v58 = vpop.xlane.xlu1 %974  ;;  %1261 = vmatpush.msra.mxu1 %v1158_v28 }
 0x118   : > { %1019 = vadd.xlane.f32.xlu1 %v1006_v53  ;;  %v991_v61 = vmul.f32 %v7351_v30, %v975_v58  ;;  %1220 = vmatpush.msra.mxu0 %v1157_v27  ;;  %v1159_v58 = vld [vmem:[%s7269_s26 + $0x40] sm:$0xff] }
 0x119   : > { %1262 = vmatpush.msra.mxu1 %v1155_v32 }
 0x11a   : > { %v7391_v62 = vsub.f32 %v958_v23, %v991_v61  ;;  %v1189_v23 = vld [vmem:[%s7269_s26 + $0x130] sm:$0xff]  ;;  %1221 = vmatpush.msra.mxu0 %v1154_v31 }
 0x11b   : > { %6090 = vmatpush.msra.mxu2 %v1189_v23  ;;  %1263 = vmatpush.msra.mxu1 %v1152_v35  ;;  %v1199_v35 = vld [vmem:[%s7321_s11] sm:$0x7]  ;;  %s6939_s11 = smov 96  }
 0x11c   : > { %v1007_v63 = vmul.f32 %v7391_v62, %v7391_v62  ;;  %1222 = vmatpush.msra.mxu0 %v1151_v34 }
 0x11d   : > { %1017 = vadd.xlane.f32.xlu0 %v1005_v59  ;;  %1015 = vadd.xlane.f32.xlu2 %v1004_v60 }
 0x11e   : > { %6091 = vmatpush.msra.mxu2 %v1186_v26  ;;  %1289 = vmatpush.msrb.mxu0 %v1198_v14 }
 0x120   : > { %6092 = vmatpush.msra.mxu2 %v1183_v29  ;;  %1290 = vmatpush.msrb.mxu0 %v1195_v17 }
 0x122   : > { %6093 = vmatpush.msra.mxu2 %v1180_v33  ;;  %1291 = vmatpush.msrb.mxu0 %v1192_v20 }
 0x124   : > { %6094 = vmatpush.msra.mxu2 %v1177_v36  ;;  %1292 = vmatpush.msrb.mxu0 %v1189_v23 }
 0x125   : > { %1021 = vadd.xlane.f32.xlu2 %v1007_v63  ;;  %v1156_v63 = vld [vmem:[%s7269_s26 + $0x28] sm:$0xff] }
 0x126   : > { %6095 = vmatpush.msra.mxu2 %v1174_v37  ;;  %1293 = vmatpush.msrb.mxu0 %v1186_v26  ;;  %v7478_v26 = vld [vmem:[%s9645_s5] ss:$0 sm:$0xff] }
 0x128   : > { %6096 = vmatpush.msra.mxu2 %v1171_v43  ;;  %1294 = vmatpush.msrb.mxu0 %v1183_v29 }
 0x12a   : > { %6097 = vmatpush.msra.mxu2 %v1168_v46  ;;  %1295 = vmatpush.msrb.mxu0 %v1180_v33 }
 0x12c   : > { %6098 = vmatpush.msra.mxu2 %v1165_v48  ;;  %1296 = vmatpush.msrb.mxu0 %v1177_v36 }
 0x12e   : > { %6099 = vmatpush.msra.mxu2 %v1162_v50  ;;  %1297 = vmatpush.msrb.mxu0 %v1174_v37 }
 0x130   : > { %6100 = vmatpush.msra.mxu2 %v1159_v58  ;;  %1298 = vmatpush.msrb.mxu0 %v1171_v43 }
 0x132   : > { %6101 = vmatpush.msra.mxu2 %v1156_v63  ;;  %1299 = vmatpush.msrb.mxu0 %v1168_v46 }
 0x134   : > { %6102 = vmatpush.msra.mxu2 %v1153_v6  ;;  %1300 = vmatpush.msrb.mxu0 %v1165_v48 }
 0x136   : > { %1301 = vmatpush.msrb.mxu0 %v1162_v50 }
 0x138   : > { %1302 = vmatpush.msrb.mxu0 %v1159_v58 }
 0x13a   : > { %1303 = vmatpush.msrb.mxu0 %v1156_v63 }
 0x13c   : > { %1304 = vmatpush.msrb.mxu0 %v1153_v6 }
 0x180   : > { %v1010_v42 = vpop.xlane.xlu0 %1009 }
 0x181   : > { %v1014_v38 = vpop.xlane.xlu1 %1013  ;;  %v1025_v44 = vmul.f32 %v1010_v42, %v7351_v30 }
 0x182   : > { %v1027_v39 = vmul.f32 %v1014_v38, %v7351_v30 }
 0x183   : > { %v1033_v47 = vadd.f32 1e-05, %v1025_v44 }
 0x184   : > { %v7435_v45 = vadd.f32 1e-05, %v1027_v39 }
 0x185   : > { %vm1047_vm2 = vweird.f32 %v1033_v47 }
 0x186   : > { %6315 = vrsqrt.f32 %v7435_v45  ;;  %vm1067_vm6 = vweird.f32 %v7435_v45 }
 0x187   : > { %6317 = vrsqrt.f32 %v1033_v47 }
 0x188   : > { %v1012_v53 = vpop.xlane.xlu2 %1011  ;;  %v977_v55 = vpop.xlane.xlu0 %976 }
 0x189   : > { %v1026_v59 = vmul.f32 %v1012_v53, %v7351_v30  ;;  %v992_v60 = vmul.f32 %v7351_v30, %v977_v55 }
 0x18b   : > { %v1020_v52 = vpop.xlane.xlu1 %1019  ;;  %v1034_v2 = vadd.f32 1e-05, %v1026_v59  ;;  %v7449_v3 = vsub.f32 %v7377_v54, %v992_v60 }
 0x18c   : > { %v7444_v61 = vpop.eup %6315  ;;  %v1030_v1 = vmul.f32 %v1020_v52, %v7351_v30 }
 0x18d   : > { %v6318_v0 = vpop.eup %6317  ;;  %v1062_v4 = vmul.f32 %v7444_v61, %v7435_v45  ;;  %6319 = vrsqrt.f32 %v1034_v2  ;;  %v1008_v7 = vmul.f32 %v7449_v3, %v7449_v3  ;;  %vm1057_vm4 = vweird.f32 %v1034_v2 }
 0x18e   : > { %v1042_v5 = vmul.f32 %v6318_v0, %v1033_v47  ;;  %v7456_v9 = vadd.f32 1e-05, %v1030_v1  ;;  %vm1048_vm1 = vweird.f32 %v6318_v0  ;;  %vm1068_vm7 = vweird.f32 %v7444_v61 }
 0x18f   : > { %1023 = vadd.xlane.f32.xlu0 %v1008_v7  ;;  %v1063_v54 = vmul.f32 %v7444_v61, %v1062_v4  ;;  %vm1049_vm3 = vmor %vm1047_vm2, %vm1048_vm1 }
 0x190   : > { %v1043_v8 = vmul.f32 %v6318_v0, %v1042_v5  ;;  %v1016_v11 = vpop.xlane.xlu2 %1015  ;;  %v1018_v12 = vpop.xlane.xlu0 %1017  ;;  %6321 = vrsqrt.f32 %v7456_v9  ;;  %vm7496_vm9 = vmor %vm1067_vm6, %vm1068_vm7  ;;  %vm1097_vm0 = vweird.f32 %v7456_v9 }
 0x191   : > { %v1028_v13 = vmul.f32 %v1016_v11, %v7351_v30  ;;  %v1029_v14 = vmul.f32 %v1018_v12, %v7351_v30  ;;  %v1064_v18 = vmul.f32 0.5, %v1063_v54 }
 0x192   : > { %v1044_v10 = vmul.f32 0.5, %v1043_v8 }
 0x193   : > { %v6320_v16 = vpop.eup %6319  ;;  %v1036_v17 = vadd.f32 1e-05, %v1028_v13  ;;  %v7462_v21 = vadd.f32 1e-05, %v1029_v14  ;;  %v1065_v27 = vsub.f32 1.5, %v1064_v18 }
 0x194   : > { %v1045_v15 = vsub.f32 1.5, %v1044_v10  ;;  %v1052_v20 = vmul.f32 %v6320_v16, %v1034_v2  ;;  %vm1058_vm5 = vweird.f32 %v6320_v16 }
 0x195   : > { %6323 = vrsqrt.f32 %v1036_v17  ;;  %vm7486_vm8 = vmor %vm1057_vm4, %vm1058_vm5  ;;  %v1066_v39 = vmul.f32 %v7444_v61, %v1065_v27  ;;  %vm1077_vm10 = vweird.f32 %v1036_v17  ;;  %vm1087_vm12 = vweird.f32 %v7462_v21 }
 0x196   : > { %v1046_v19 = vmul.f32 %v6318_v0, %v1045_v15  ;;  %v1053_v23 = vmul.f32 %v6320_v16, %v1052_v20  ;;  %6325 = vrsqrt.f32 %v7462_v21  ;;  %v7480_v31 = vpop.eup %6321 }
 0x197   : > { %v1092_v45 = vmul.f32 %v7480_v31, %v7456_v9  ;;  %v1070_v55 = vsel %vm7496_vm9, %v7444_v61, %v1066_v39  ;;  %vm1098_vm1 = vweird.f32 %v7480_v31  ;;  %vm1352_vm9 = vcmask 261120  }
 0x198   : > { %v1050_v24 = vsel %vm1049_vm3, %v6318_v0, %v1046_v19  ;;  %v1054_v28 = vmul.f32 0.5, %v1053_v23  ;;  %v1022_v29 = vpop.xlane.xlu2 %1021  ;;  %v1123_v2 = vmul.f32 %v1070_v55, %v7359_v40  ;;  %vm1099_vm2 = vmor %vm1097_vm0, %vm1098_vm1 }
 0x199   : > { %v1121_v25 = vmul.f32 %v1050_v24, %v7361_v41  ;;  %v1031_v32 = vmul.f32 %v1022_v29, %v7351_v30  ;;  %v1093_v58 = vmul.f32 %v7480_v31, %v1092_v45 }
 0x19a   : > { %v1055_v41 = vsub.f32 1.5, %v1054_v28  ;;  %v1134_v8 = vmul.f32 %v7469_v22, %v1123_v2 }
 0x19b   : > { %v1132_v33 = vmul.f32 %v7469_v22, %v1121_v25  ;;  %v6324_v34 = vpop.eup %6323  ;;  %v7490_v36 = vadd.f32 1e-05, %v1031_v32  ;;  %v1094_v5 = vmul.f32 0.5, %v1093_v58 }
 0x19c   : > { %v6326_v38 = vpop.eup %6325  ;;  %v1056_v42 = vmul.f32 %v6320_v16, %v1055_v41  ;;  %v1072_v43 = vmul.f32 %v6324_v34, %v1036_v17  ;;  %vm1078_vm11 = vweird.f32 %v6324_v34  ;;  %v7528_v13 = vadd.f32 %v7478_v26, %v1134_v8 }
 0x19d   : > { %v7493_v37 = vadd.f32 %v7478_v26, %v1132_v33  ;;  %v1082_v46 = vmul.f32 %v6326_v38, %v7462_v21  ;;  %6327 = vrsqrt.f32 %v7490_v36  ;;  %vm1079_vm13 = vmor %vm1077_vm10, %vm1078_vm11  ;;  %vm1088_vm14 = vweird.f32 %v6326_v38 }
 0x19e   : > { %v1060_v47 = vsel %vm7486_vm8, %v6320_v16, %v1056_v42  ;;  %v1073_v48 = vmul.f32 %v6324_v34, %v1072_v43  ;;  %vm1089_vm15 = vmor %vm1087_vm12, %vm1088_vm14  ;;  %v1095_v10 = vsub.f32 1.5, %v1094_v5  ;;  %vm1107_vm3 = vweird.f32 %v7490_v36 }
 0x19f   : > { %1223 = vmatmul.f32.vlgmr.msra.gmra.mxu0 %v7493_v37  ;;  %1264 = vmatmul.f32.vlgmr.msra.gmra.mxu1 %v7493_v37  ;;  %v1083_v50 = vmul.f32 %v6326_v38, %v1082_v46  ;;  %v1122_v52 = vmul.f32 %v1060_v47, %v7372_v51  ;;  %v7550_v43 = vperm.slane %v1199_v35, 0  ;;  %vm1577_vm11 = vcmask 64512  }
 0x1a0   : > { %v1074_v53 = vmul.f32 0.5, %v1073_v48  ;;  %v1096_v16 = vmul.f32 %v7480_v31, %v1095_v10 }
 0x1a1   : > { %v1084_v59 = vmul.f32 0.5, %v1083_v50  ;;  %v1133_v60 = vmul.f32 %v7469_v22, %v1122_v52 }
 0x1a2   : > { %v1075_v63 = vsub.f32 1.5, %v1074_v53  ;;  %v1100_v18 = vsel %vm1099_vm2, %v7480_v31, %v1096_v16 }
 0x1a3   : > { %v6328_v0 = vpop.eup %6327  ;;  %v1085_v1 = vsub.f32 1.5, %v1084_v59  ;;  %v7516_v51 = vadd.f32 %v7478_v26, %v1133_v60 }
 0x1a4   : > { %v1076_v4 = vmul.f32 %v6324_v34, %v1075_v63  ;;  %v1102_v6 = vmul.f32 %v6328_v0, %v7490_v36  ;;  %vm1108_vm4 = vweird.f32 %v6328_v0 }
 0x1a5   : > { %v1086_v61 = vmul.f32 %v6326_v38, %v1085_v1  ;;  %vm1109_vm5 = vmor %vm1107_vm3, %vm1108_vm4 }
 0x1a6   : > { %v1080_v7 = vsel %vm1079_vm13, %v6324_v34, %v1076_v4  ;;  %v1103_v12 = vmul.f32 %v6328_v0, %v1102_v6  ;;  %v7611_v6 = vperm.slane %v1199_v35, 2 }
 0x1a7   : > { %1226 = vmatmul.f32.gmra.mxu0 %v7516_v51  ;;  %1267 = vmatmul.f32.gmra.mxu1 %v7516_v51  ;;  %v1124_v54 = vmul.f32 %v1080_v7, %v7384_v57  ;;  %v1090_v11 = vsel %vm1089_vm15, %v6326_v38, %v1086_v61  ;;  %v7547_v38 = vperm.slane %v1199_v35, 1 }
 0x1a8   : > { %v1125_v15 = vmul.f32 %v1090_v11, %v7382_v56  ;;  %v1104_v17 = vmul.f32 0.5, %v1103_v12  ;;  %v1126_v56 = vmul.f32 %v1100_v18, %v7369_v49 }
 0x1a9   : > { %v1135_v40 = vmul.f32 %v7469_v22, %v1124_v54 }
 0x1aa   : > { %v1136_v57 = vmul.f32 %v7469_v22, %v1125_v15  ;;  %v1105_v9 = vsub.f32 1.5, %v1104_v17  ;;  %v1137_v21 = vmul.f32 %v7469_v22, %v1126_v56 }
 0x1ab   : > { %v1146_v14 = vadd.f32 %v7478_v26, %v1135_v40 }
 0x1ac   : > { %v1147_v19 = vadd.f32 %v7478_v26, %v1136_v57  ;;  %v1106_v20 = vmul.f32 %v6328_v0, %v1105_v9  ;;  %v1148_v24 = vadd.f32 %v7478_v26, %v1137_v21  ;;  %v1330_v57 = vlaneseq }
 0x1ad   : > { %1314 = vmatmul.f32.vlgmr.msra.gmra.mxu2 %v1146_v14 }
 0x1ae   : > { %v1110_v23 = vsel %vm1109_vm5, %v6328_v0, %v1106_v20  ;;  %v7645_v56 = vand.u32 127, %v1330_v57 }
 0x1af   : > { %1229 = vmatmul.f32.gmra.mxu0 %v7528_v13  ;;  %1270 = vmatmul.f32.gmra.mxu1 %v7528_v13  ;;  %v1127_v25 = vmul.f32 %v1110_v23, %v7391_v62 }
 0x1b0   : > { %9651 = vst [vmem:[#allocation38_spill] sm:$0xff] %v7645_v56 }
 0x1b1   : > { %v1138_v27 = vmul.f32 %v7469_v22, %v1127_v25  ;;  %v6940_v25 = vmov -1e+09  }
 0x1b3   : > { %v1149_v28 = vadd.f32 %v7478_v26, %v1138_v27 }
 0x1b5   : > { %1317 = vmatmul.f32.gmra.mxu2 %v1147_v19 }
 0x1b7   : > { %1232 = vmatmul.f32.gmra.mxu0 %v1146_v14  ;;  %1273 = vmatmul.f32.gmra.mxu1 %v1146_v14 }
 0x1bd   : > { %1320 = vmatmul.f32.gmra.mxu2 %v1148_v24 }
 0x1bf   : > { %1235 = vmatmul.f32.gmra.mxu0 %v1147_v19  ;;  %1276 = vmatmul.f32.gmra.mxu1 %v1147_v19  ;;  %v7643_v19 = vshrl.u32 %v1330_v57, 7 }
 0x1c1   : > { %9650 = vst [vmem:[#allocation37_spill] sm:$0xff] %v7643_v19  ;;  %vm1334_vm10 = vcmp.le.s32.totalorder %v7645_v56, %v7643_v19 }
 0x1c2   : > { %v7660_v27 = vsel %vm1334_vm10, 0.0, %v6940_v25 }
 0x1c5   : > { %1323 = vmatmul.f32.gmra.mxu2 %v1149_v28 }
 0x1c7   : > { %1238 = vmatmul.f32.gmra.mxu0 %v1148_v24  ;;  %1279 = vmatmul.f32.gmra.mxu1 %v1148_v24 }
 0x1cf   : > { %1241 = vmatmul.f32.gmra.mxu0 %v1149_v28  ;;  %1282 = vmatmul.f32.gmra.mxu1 %v1149_v28 }
 0x202   : > { %v1024_v49 = vpop.xlane.xlu0 %1023 }
 0x203   : > { %v1032_v29 = vmul.f32 %v1024_v49, %v7351_v30 }
 0x205   : > { %v1040_v31 = vadd.f32 1e-05, %v1032_v29 }
 0x207   : > { %6329 = vrsqrt.f32 %v1040_v31  ;;  %vm1117_vm7 = vweird.f32 %v1040_v31 }
 0x20d   : > { %v6330_v32 = vpop.eup %6329 }
 0x20e   : > { %v1112_v62 = vmul.f32 %v6330_v32, %v1040_v31  ;;  %vm1118_vm6 = vweird.f32 %v6330_v32 }
 0x20f   : > { %vm1119_vm8 = vmor %vm1117_vm7, %vm1118_vm6 }
 0x210   : > { %v1113_v33 = vmul.f32 %v6330_v32, %v1112_v62 }
 0x212   : > { %v1114_v41 = vmul.f32 0.5, %v1113_v33 }
 0x214   : > { %v1115_v34 = vsub.f32 1.5, %v1114_v41 }
 0x216   : > { %v1116_v36 = vmul.f32 %v6330_v32, %v1115_v34 }
 0x218   : > { %v1120_v39 = vsel %vm1119_vm8, %v6330_v32, %v1116_v36 }
 0x219   : > { %v1128_v42 = vmul.f32 %v1120_v39, %v7449_v3 }
 0x21b   : > { %v1139_v47 = vmul.f32 %v7469_v22, %v1128_v42 }
 0x21c   : > { %v1224_v44 = vpop.f32.mrf.mxu0  ;;  %v1265_v45 = vpop.f32.mrf.mxu1 }
 0x21d   : > { %v7553_v46 = vadd.f32 %v1265_v45, %v7547_v38  ;;  %v1150_v48 = vadd.f32 %v7478_v26, %v1139_v47  ;;  %v7560_v50 = vadd.f32 %v1224_v44, %v7550_v43 }
 0x21f   : > { %5948 = vmatpush.xpose.msk.msra.mxu3 %vm1352_vm9, %v7553_v46  ;;  %1244 = vmatmul.f32.gmra.mxu0 %v1150_v48 }
 0x220   : > { %1285 = vmatmul.f32.gmra.mxu1 %v1150_v48  ;;  %1326 = vmatmul.f32.gmra.mxu2 %v1150_v48 }
 0x222   : > { %5949 = vmatmul.msk.f32.vlgmr.msra.gmra.mxu3 %vm1352_vm9, %v7560_v50 }
 0x224   : > { %v1227_v3 = vpop.f32.mrf.mxu0  ;;  %v1268_v52 = vpop.f32.mrf.mxu1 }
 0x225   : > { %v7565_v53 = vadd.f32 %v1268_v52, %v7547_v38  ;;  %v7570_v22 = vadd.f32 %v1227_v3, %v7550_v43 }
 0x227   : > { %5950 = vmatpush.xpose.msk.msrb.mxu3 %vm1352_vm9, %v7565_v53  ;;  %1305 = vmatmul.f32.vlgmr.msrb.gmra.mxu0 %v7493_v37 }
 0x22a   : > { %5951 = vmatmul.msk.f32.vlgmr.msrb.gmra.mxu3 %vm1352_vm9, %v7570_v22 }
 0x22c   : > { %v1230_v26 = vpop.f32.mrf.mxu0  ;;  %v1271_v55 = vpop.f32.mrf.mxu1 }
 0x22d   : > { %v7576_v58 = vadd.f32 %v1271_v55, %v7547_v38  ;;  %v7583_v59 = vadd.f32 %v1230_v26, %v7550_v43 }
 0x22f   : > { %5952 = vmatpush.xpose.msk.msra.mxu3 %vm1352_vm9, %v7576_v58  ;;  %2012 = vrot.lane.b32.xlu0 %v7576_v58, %s6939_s11 }
 0x230   : > { %1308 = vmatmul.f32.gmra.mxu0 %v7516_v51  ;;  %v7588_v37 = vpop.f32.mrf.mxu2 }
 0x232   : > { %5953 = vmatmul.msk.f32.vlgmr.msra.gmra.mxu3 %vm1352_vm9, %v7583_v59 }
 0x234   : > { %v1233_v60 = vpop.f32.mrf.mxu0  ;;  %v1274_v63 = vpop.f32.mrf.mxu1 }
 0x235   : > { %v7591_v0 = vadd.f32 %v1274_v63, %v7547_v38  ;;  %v7596_v1 = vadd.f32 %v1233_v60, %v7550_v43 }
 0x237   : > { %5954 = vmatpush.xpose.msk.msrb.mxu3 %vm1352_vm9, %v7591_v0 }
 0x238   : > { %1311 = vmatmul.f32.gmra.mxu0 %v7528_v13  ;;  %v7601_v51 = vpop.f32.mrf.mxu2 }
 0x23a   : > { %5955 = vmatmul.msk.f32.vlgmr.msrb.gmra.mxu3 %vm1352_vm9, %v7596_v1 }
 0x23c   : > { %v1236_v2 = vpop.f32.mrf.mxu0  ;;  %v1277_v4 = vpop.f32.mrf.mxu1 }
 0x23d   : > { %v7604_v5 = vadd.f32 %v1277_v4, %v7547_v38  ;;  %v7609_v61 = vadd.f32 %v1236_v2, %v7550_v43 }
 0x23f   : > { %5956 = vmatpush.xpose.msk.msra.mxu3 %vm1352_vm9, %v7604_v5 }
 0x240   : > { %v1321_v7 = vpop.f32.mrf.mxu2 }
 0x241   : > { %v7616_v8 = vadd.f32 %v1321_v7, %v7611_v6 }
 0x242   : > { %5957 = vmatmul.msk.f32.vlgmr.msra.gmra.mxu3 %vm1352_vm9, %v7609_v61 }
 0x243   : > { %1903 = vmatpush.msrb.mxu1 %v7616_v8 }
 0x244   : > { %v1239_v54 = vpop.f32.mrf.mxu0  ;;  %v1280_v10 = vpop.f32.mrf.mxu1 }
 0x245   : > { %v7619_v11 = vadd.f32 %v1280_v10, %v7547_v38  ;;  %v7625_v12 = vadd.f32 %v1239_v54, %v7550_v43 }
 0x247   : > { %5958 = vmatpush.xpose.msk.msrb.mxu3 %vm1352_vm9, %v7619_v11 }
 0x248   : > { %v1324_v40 = vpop.f32.mrf.mxu2 }
 0x249   : > { %v7630_v13 = vadd.f32 %v1324_v40, %v7611_v6 }
 0x24a   : > { %5959 = vmatmul.msk.f32.vlgmr.msrb.gmra.mxu3 %vm1352_vm9, %v7625_v12 }
 0x24b   : > { %1926 = vmatpush.msrb.mxu2 %v7630_v13 }
 0x24c   : > { %v1283_v14 = vpop.f32.mrf.mxu1  ;;  %v1242_v15 = vpop.f32.mrf.mxu0 }
 0x24d   : > { %v7633_v16 = vadd.f32 %v1283_v14, %v7547_v38  ;;  %v7639_v17 = vadd.f32 %v1242_v15, %v7550_v43 }
 0x24f   : > { %5960 = vmatpush.xpose.msk.msra.mxu3 %vm1352_vm9, %v7633_v16 }
 0x252   : > { %5961 = vmatmul.msk.f32.vlgmr.msra.gmra.mxu3 %vm1352_vm9, %v7639_v17 }
 0x29c   : > { %v1245_v9 = vpop.f32.mrf.mxu0 }
 0x29d   : > { %v1286_v18 = vpop.f32.mrf.mxu1  ;;  %v7653_v23 = vadd.f32 %v1245_v9, %v7550_v43 }
 0x29e   : > { %v7648_v20 = vadd.f32 %v1286_v18, %v7547_v38 }
 0x2a0   : > { %5962 = vmatpush.xpose.msk.msrb.mxu3 %vm1352_vm9, %v7648_v20 }
 0x2a1   : > { %v2013_v21 = vpop.permute.xlu0 %2012 }
 0x2a2   : > { %5976 = vmatpush.xpose.msk.msra.mxu2 %vm1352_vm9, %v2013_v21 }
 0x2a3   : > { %5963 = vmatmul.msk.f32.vlgmr.msrb.gmra.mxu3 %vm1352_vm9, %v7653_v23 }
 0x2a4   : > { %v1306_v49 = vpop.f32.mrf.mxu0 }
 0x2a5   : > { %v1376_v24 = vpop.f32.mrf.mxu3  ;;  %v7663_v29 = vadd.f32 %v1306_v49, %v7611_v6 }
 0x2a6   : > { %v1561_v28 = vmul.f32 0.17677669, %v1376_v24 }
 0x2a7   : > { %1788 = vmatpush.msra.mxu3 %v7663_v29 }
 0x2a8   : > { %v1569_v31 = vadd.f32 %v1561_v28, %v7660_v27 }
 0x2aa   : > { %v1578_v32 = vsel %vm1577_vm11, %v1569_v31, -inf }
 0x2ab   : > { %1579 = vmax.xlane.f32.xlu1 %v1578_v32 }
 0x2ad   : > { %v1402_v62 = vpop.f32.mrf.mxu3  ;;  %v1309_v41 = vpop.f32.mrf.mxu0 }
 0x2ae   : > { %v1562_v33 = vmul.f32 0.17677669, %v1402_v62  ;;  %v7669_v34 = vadd.f32 %v1309_v41, %v7611_v6 }
 0x2b0   : > { %v1570_v35 = vadd.f32 %v1562_v33, %v7660_v27  ;;  %1811 = vmatpush.msrb.mxu3 %v7669_v34  ;;  %v7675_v36 = vpack.i.bf16 %v7669_v34, %v7663_v29 }
 0x2b2   : > { %v1581_v38 = vsel %vm1577_vm11, %v1570_v35, -inf }
 0x2b3   : > { %1582 = vmax.xlane.f32.xlu2 %v1581_v38 }
 0x2b5   : > { %v1428_v39 = vpop.f32.mrf.mxu3 }
 0x2b6   : > { %v1563_v42 = vmul.f32 0.17677669, %v1428_v39 }
 0x2b8   : > { %v1571_v43 = vadd.f32 %v1563_v42, %v7660_v27 }
 0x2ba   : > { %v1584_v44 = vsel %vm1577_vm11, %v1571_v43, -inf }
 0x2bb   : > { %1585 = vmax.xlane.f32.xlu0 %v1584_v44 }
 0x2bd   : > { %v1454_v45 = vpop.f32.mrf.mxu3 }
 0x2be   : > { %v1564_v47 = vmul.f32 0.17677669, %v1454_v45 }
 0x2c0   : > { %v1572_v48 = vadd.f32 %v1564_v47, %v7660_v27 }
 0x2c2   : > { %v1587_v3 = vsel %vm1577_vm11, %v1572_v48, -inf }
 0x2c3   : > { %1588 = vmax.xlane.f32.xlu1 %v1587_v3 }
 0x2c5   : > { %v1480_v52 = vpop.f32.mrf.mxu3 }
 0x2c6   : > { %v1565_v26 = vmul.f32 0.17677669, %v1480_v52 }
 0x2c8   : > { %v1573_v55 = vadd.f32 %v1565_v26, %v7660_v27 }
 0x2ca   : > { %v1590_v60 = vsel %vm1577_vm11, %v1573_v55, -inf }
 0x2cb   : > { %1591 = vmax.xlane.f32.xlu2 %v1590_v60 }
 0x2cd   : > { %v7684_v63 = vpop.f32.mrf.mxu3 }
 0x2d5   : > { %v1532_v2 = vpop.f32.mrf.mxu3 }
 0x2d6   : > { %v1567_v4 = vmul.f32 0.17677669, %v1532_v2 }
 0x2d8   : > { %v1575_v7 = vadd.f32 %v1567_v4, %v7660_v27 }
 0x2da   : > { %v1596_v54 = vsel %vm1577_vm11, %v1575_v7, -inf }
 0x2db   : > { %1597 = vmax.xlane.f32.xlu0 %v1596_v54 }
 0x2e3   : > { %2010 = vrot.lane.b32.xlu2 %v7583_v59, %s6939_s11 }
 0x31e   : > { %v1580_v10 = vpop.xlane.xlu1 %1579 }
 0x31f   : > { %v1602_v40 = vsub.f32 %v1569_v31, %v1580_v10 }
 0x321   : > { %v1610_v14 = vmul.f32 1.442695, %v1602_v40 }
 0x323   : > { %6331 = vpow2.f32 %v1610_v14 }
 0x326   : > { %v1583_v15 = vpop.xlane.xlu2 %1582  ;;  %v1558_v9 = vpop.f32.mrf.mxu3 }
 0x327   : > { %v1603_v57 = vsub.f32 %v1570_v35, %v1583_v15  ;;  %v1568_v18 = vmul.f32 0.17677669, %v1558_v9 }
 0x329   : > { %v7690_v21 = vpop.eup %6331  ;;  %v1612_v24 = vmul.f32 1.442695, %v1603_v57  ;;  %v1576_v28 = vadd.f32 %v1568_v18, %v7660_v27 }
 0x32a   : > { %v1626_v25 = vsel %vm1577_vm11, %v7690_v21, 0.0 }
 0x32b   : > { %6333 = vpow2.f32 %v1612_v24  ;;  %1627 = vadd.xlane.f32.xlu2 %v1626_v25  ;;  %v1599_v49 = vsel %vm1577_vm11, %v1576_v28, -inf }
 0x32c   : > { %1600 = vmax.xlane.f32.xlu1 %v1599_v49 }
 0x32e   : > { %v1586_v39 = vpop.xlane.xlu0 %1585 }
 0x32f   : > { %v1604_v44 = vsub.f32 %v1571_v43, %v1586_v39  ;;  %v1312_v39 = vpop.f32.mrf.mxu0 }
 0x331   : > { %v7696_v31 = vpop.eup %6333  ;;  %v1614_v47 = vmul.f32 1.442695, %v1604_v44 }
 0x332   : > { %v1629_v32 = vsel %vm1577_vm11, %v7696_v31, 0.0 }
 0x333   : > { %1630 = vadd.xlane.f32.xlu0 %v1629_v32 }
 0x336   : > { %v1589_v62 = vpop.xlane.xlu1 %1588 }
 0x337   : > { %v1605_v33 = vsub.f32 %v1572_v48, %v1589_v62 }
 0x339   : > { %v1616_v41 = vmul.f32 1.442695, %v1605_v33 }
 0x33b   : > { %6335 = vpow2.f32 %v1616_v41 }
 0x33c   : > { %6337 = vpow2.f32 %v1614_v47 }
 0x33e   : > { %v1592_v42 = vpop.xlane.xlu2 %1591 }
 0x33f   : > { %v1606_v45 = vsub.f32 %v1573_v55, %v1592_v42 }
 0x341   : > { %v7700_v35 = vpop.eup %6335  ;;  %v1618_v48 = vmul.f32 1.442695, %v1606_v45 }
 0x342   : > { %v1635_v38 = vsel %vm1577_vm11, %v7700_v35, 0.0  ;;  %v7710_v60 = vpop.eup %6337 }
 0x343   : > { %1636 = vadd.xlane.f32.xlu2 %v1635_v38  ;;  %6339 = vpow2.f32 %v1618_v48  ;;  %v1632_v4 = vsel %vm1577_vm11, %v7710_v60, 0.0 }
 0x345   : > { %2040 = vrot.lane.b32.xlu1 %v7591_v0, %s6939_s11 }
 0x346   : > { %v7726_v54 = vpop.permute.xlu2 %2010 }
 0x347   : > { %2038 = vrot.lane.b32.xlu0 %v7596_v1, %s6939_s11 }
 0x349   : > { %v7712_v2 = vpop.eup %6339 }
 0x34a   : > { %v1638_v43 = vsel %vm1577_vm11, %v7712_v2, 0.0 }
 0x34e   : > { %v1598_v3 = vpop.xlane.xlu0 %1597 }
 0x34f   : > { %v1608_v52 = vsub.f32 %v1575_v7, %v1598_v3  ;;  %v1313_v3 = vadd.f32 %v1312_v39, %v7611_v6 }
 0x351   : > { %v1622_v26 = vmul.f32 1.442695, %v1608_v52 }
 0x353   : > { %6341 = vpow2.f32 %v1622_v26  ;;  %v1566_v26 = vmul.f32 0.17677669, %v7684_v63  ;;  %v1316_v63 = vadd.f32 %v7588_v37, %v7611_v6 }
 0x359   : > { %v7718_v55 = vpop.eup %6341 }
 0x35a   : > { %v1644_v7 = vsel %vm1577_vm11, %v7718_v55, 0.0 }
 0x35b   : > { %2124 = vrot.lane.b32.xlu2 %v7633_v16, %s6939_s11 }
 0x36f   : > { %1633 = vadd.xlane.f32.xlu1 %v1632_v4 }
 0x371   : > { %1639 = vadd.xlane.f32.xlu0 %v1638_v43 }
 0x377   : > { %1645 = vadd.xlane.f32.xlu1 %v1644_v7 }
 0x385   : > { %2122 = vrot.lane.b32.xlu0 %v7639_v17, %s6939_s11 }
 0x390   : > { %2152 = vrot.lane.b32.xlu1 %v7648_v20, %s6939_s11 }
 0x39e   : > { %v1628_v10 = vpop.xlane.xlu2 %1627 }
 0x39f   : > { %6343 = vrcp.f32 %v1628_v10  ;;  %v1601_v40 = vpop.xlane.xlu1 %1600  ;;  %v1661_v25 = vand.u32 2147483648, %v1628_v10  ;;  %v1659_v32 = vand.u32 2147483647, %v1628_v10  ;;  %vm1655_vm13 = vweird.f32 %v1628_v10 }
 0x3a0   : > { %v1609_v14 = vsub.f32 %v1576_v28, %v1601_v40 }
 0x3a1   : > { %v1662_v28 = vor.u32 1.1754944e-38, %v1661_v25  ;;  %vm1660_vm15 = vcmp.eq.f32.partialorder %v1659_v32, 8.507059e+37 }
 0x3a2   : > { %v1624_v15 = vmul.f32 1.442695, %v1609_v14  ;;  %v7737_v14 = vadd.f32 %v1566_v26, %v7660_v27 }
 0x3a4   : > { %6345 = vpow2.f32 %v1624_v15 }
 0x3a5   : > { %v6344_v57 = vpop.eup %6343 }
 0x3a6   : > { %v1651_v9 = vmul.f32 %v6344_v57, %v1628_v10  ;;  %v1631_v18 = vpop.xlane.xlu0 %1630  ;;  %vm1656_vm12 = vweird.f32 %v6344_v57 }
 0x3a7   : > { %6347 = vrcp.f32 %v1631_v18  ;;  %vm1657_vm14 = vmor %vm1655_vm13, %vm1656_vm12  ;;  %v1676_v52 = vand.u32 2147483648, %v1631_v18  ;;  %v1674_v43 = vand.u32 2147483647, %v1631_v18  ;;  %vm1670_vm1 = vweird.f32 %v1631_v18 }
 0x3a8   : > { %v1652_v24 = vsub.f32 1.0, %v1651_v9  ;;  %v7749_v9 = vpack.i.bf16 %v1316_v63, %v1313_v3 }
 0x3a9   : > { %v1677_v10 = vor.u32 1.1754944e-38, %v1676_v52  ;;  %vm1675_vm3 = vcmp.eq.f32.partialorder %v1674_v43, 8.507059e+37 }
 0x3aa   : > { %v1653_v49 = vmul.f32 %v6344_v57, %v1652_v24  ;;  %v7728_v62 = vpop.eup %6345 }
 0x3ab   : > { %v1647_v41 = vsel %vm1577_vm11, %v7728_v62, 0.0 }
 0x3ac   : > { %v1654_v33 = vadd.f32 %v6344_v57, %v1653_v49  ;;  %1648 = vadd.xlane.f32.xlu2 %v1647_v41 }
 0x3ad   : > { %v6348_v38 = vpop.eup %6347 }
 0x3ae   : > { %v1658_v42 = vsel %vm1657_vm14, %v6344_v57, %v1654_v33  ;;  %v1666_v44 = vmul.f32 %v6348_v38, %v1631_v18  ;;  %vm1671_vm0 = vweird.f32 %v6348_v38  ;;  %v1593_v57 = vsel %vm1577_vm11, %v7737_v14, -inf }
 0x3af   : > { %v1663_v45 = vsel %vm1660_vm15, %v1662_v28, %v1658_v42  ;;  %vm1672_vm2 = vmor %vm1670_vm1, %vm1671_vm0 }
 0x3b0   : > { %v1667_v47 = vsub.f32 1.0, %v1666_v44  ;;  %v1664_v48 = vmul.f32 %v7690_v21, %v1663_v45 }
 0x3b2   : > { %v1668_v4 = vmul.f32 %v6348_v38, %v1667_v47  ;;  %5964 = vmatmul.msk.f32.vlgmr.msra.gmra.mxu3 %vm1577_vm11, %v1664_v48 }
 0x3b3   : > { %1834 = vmatpush.msra.mxu3 %v1313_v3 }
 0x3b4   : > { %v1669_v7 = vadd.f32 %v6348_v38, %v1668_v4 }
 0x3b6   : > { %v1673_v40 = vsel %vm1672_vm2, %v6348_v38, %v1669_v7  ;;  %v1637_v37 = vpop.xlane.xlu2 %1636 }
 0x3b7   : > { %v1678_v21 = vsel %vm1675_vm3, %v1677_v10, %v1673_v40  ;;  %6349 = vrcp.f32 %v1637_v37  ;;  %vm1700_vm10 = vweird.f32 %v1637_v37 }
 0x3b8   : > { %v1679_v15 = vmul.f32 %v7696_v31, %v1678_v21  ;;  %v7755_v31 = vpop.permute.xlu1 %2040  ;;  %v1706_v21 = vand.u32 2147483648, %v1637_v37 }
 0x3b9   : > { %v7757_v18 = vpop.permute.xlu0 %2038 }
 0x3ba   : > { %5965 = vmatmul.msk.f32.vlgmr.msrb.gmra.mxu3 %vm1577_vm11, %v1679_v15  ;;  %1594 = vmax.xlane.f32.xlu1 %v1593_v57  ;;  %v1704_v57 = vand.u32 2147483647, %v1637_v37 }
 0x3bb   : > { %1857 = vmatpush.msrb.mxu3 %v1316_v63 }
 0x3bc   : > { %vm1705_vm14 = vcmp.eq.f32.partialorder %v1704_v57, 8.507059e+37 }
 0x3bd   : > { %v6350_v24 = vpop.eup %6349 }
 0x3be   : > { %v1696_v32 = vmul.f32 %v6350_v24, %v1637_v37  ;;  %vm1701_vm6 = vweird.f32 %v6350_v24 }
 0x3bf   : > { %vm7768_vm12 = vmor %vm1700_vm10, %vm1701_vm6 }
 0x3c0   : > { %v1697_v41 = vsub.f32 1.0, %v1696_v32 }
 0x3c2   : > { %v1698_v44 = vmul.f32 %v6350_v24, %v1697_v41  ;;  %v7775_v41 = vadd.f32 %v7601_v51, %v7611_v6 }
 0x3c4   : > { %2150 = vrot.lane.b32.xlu2 %v7653_v23, %s6939_s11  ;;  %v1699_v4 = vadd.f32 %v6350_v24, %v1698_v44 }
 0x3cc   : > { %2096 = vrot.lane.b32.xlu2 %v7619_v11, %s6939_s11 }
 0x3d3   : > { %1984 = vrot.lane.b32.xlu1 %v7565_v53, %s6939_s11 }
 0x3d4   : > { %6253 = vrot.lane.b32.xlu2 %v7749_v9, %s6939_s11 }
 0x3db   : > { %2734 = vrot.lane.b32.xlu1 %v7553_v46, %s6941_s17 }
 0x3e2   : > { %v1634_v25 = vpop.xlane.xlu1 %1633 }
 0x3e3   : > { %6351 = vrcp.f32 %v1634_v25  ;;  %v1691_v45 = vand.u32 2147483648, %v1634_v25  ;;  %v1689_v48 = vand.u32 2147483647, %v1634_v25  ;;  %vm1685_vm5 = vweird.f32 %v1634_v25 }
 0x3e4   : > { %v7761_v49 = vpop.xlane.xlu0 %1639 }
 0x3e5   : > { %6353 = vrcp.f32 %v7761_v49  ;;  %v1692_v43 = vor.u32 1.1754944e-38, %v1691_v45  ;;  %vm1690_vm8 = vcmp.eq.f32.partialorder %v1689_v48, 8.507059e+37  ;;  %v1327_v48 = vpop.f32.mrf.mxu2  ;;  %vm1715_vm3 = vweird.f32 %v7761_v49 }
 0x3e9   : > { %v6352_v33 = vpop.eup %6351 }
 0x3ea   : > { %v1681_v38 = vmul.f32 %v6352_v33, %v1634_v25  ;;  %v1646_v28 = vpop.xlane.xlu1 %1645  ;;  %vm1686_vm4 = vweird.f32 %v6352_v33 }
 0x3eb   : > { %v7764_v39 = vpop.eup %6353  ;;  %6355 = vrcp.f32 %v1646_v28  ;;  %vm1687_vm7 = vmor %vm1685_vm5, %vm1686_vm4  ;;  %v1749_v45 = vand.u32 2147483647, %v1646_v28  ;;  %vm1745_vm15 = vweird.f32 %v1646_v28 }
 0x3ec   : > { %v1682_v42 = vsub.f32 1.0, %v1681_v38  ;;  %v1711_v3 = vmul.f32 %v7764_v39, %v7761_v49  ;;  %v1751_v38 = vand.u32 2147483648, %v1646_v28  ;;  %vm1716_vm1 = vweird.f32 %v7764_v39 }
 0x3ed   : > { %vm1750_vm2 = vcmp.eq.f32.partialorder %v1749_v45, 8.507059e+37  ;;  %vm1717_vm4 = vmor %vm1715_vm3, %vm1716_vm1 }
 0x3ee   : > { %v1683_v47 = vmul.f32 %v6352_v33, %v1682_v42  ;;  %v1712_v10 = vsub.f32 1.0, %v1711_v3  ;;  %v1752_v51 = vor.u32 1.1754944e-38, %v1751_v38 }
 0x3f0   : > { %v1684_v52 = vadd.f32 %v6352_v33, %v1683_v47  ;;  %v1713_v42 = vmul.f32 %v7764_v39, %v1712_v10  ;;  %v1707_v47 = vor.u32 1.1754944e-38, %v1706_v21  ;;  %v7790_v10 = vadd.f32 %v1327_v48, %v7611_v6 }
 0x3f1   : > { %v6356_v26 = vpop.eup %6355 }
 0x3f2   : > { %v1688_v7 = vsel %vm1687_vm7, %v6352_v33, %v1684_v52  ;;  %v1741_v40 = vmul.f32 %v6356_v26, %v1646_v28  ;;  %v1703_v33 = vsel %vm7768_vm12, %v6350_v24, %v1699_v4  ;;  %vm1746_vm13 = vweird.f32 %v6356_v26 }
 0x3f3   : > { %v1693_v15 = vsel %vm1690_vm8, %v1692_v43, %v1688_v7  ;;  %v1708_v37 = vsel %vm1705_vm14, %v1707_v47, %v1703_v33  ;;  %vm1747_vm0 = vmor %vm1745_vm15, %vm1746_vm13  ;;  %v1714_v24 = vadd.f32 %v7764_v39, %v1713_v42  ;;  %v1721_v52 = vand.u32 2147483648, %v7761_v49 }
 0x3f4   : > { %v1742_v32 = vsub.f32 1.0, %v1741_v40  ;;  %v1694_v25 = vmul.f32 %v7710_v60, %v1693_v15  ;;  %v1719_v43 = vand.u32 2147483647, %v7761_v49  ;;  %v1709_v7 = vmul.f32 %v7700_v35, %v1708_v37  ;;  %v2125_v40 = vpop.permute.xlu2 %2124 }
 0x3f5   : > { %v1718_v21 = vsel %vm1717_vm4, %v7764_v39, %v1714_v24 }
 0x3f6   : > { %v1743_v44 = vmul.f32 %v6356_v26, %v1742_v32  ;;  %5966 = vmatmul.msk.f32.vlgmr.msra.gmra.mxu3 %vm1577_vm11, %v1694_v25  ;;  %vm1720_vm5 = vcmp.eq.f32.partialorder %v1719_v43, 8.507059e+37 }
 0x3f7   : > { %1880 = vmatpush.msra.mxu3 %v7775_v41  ;;  %v2123_v6 = vpop.permute.xlu0 %2122 }
 0x3f8   : > { %v1744_v60 = vadd.f32 %v6356_v26, %v1743_v44 }
 0x3fa   : > { %v1748_v3 = vsel %vm1747_vm0, %v6356_v26, %v1744_v60  ;;  %v1722_v26 = vor.u32 1.1754944e-38, %v1721_v52 }
 0x3fb   : > { %v1753_v4 = vsel %vm1750_vm2, %v1752_v51, %v1748_v3 }
 0x3fc   : > { %v1754_v28 = vmul.f32 %v7718_v55, %v1753_v4  ;;  %v1723_v35 = vsel %vm1720_vm5, %v1722_v26, %v1718_v21 }
 0x3fd   : > { %v1724_v55 = vmul.f32 %v7712_v2, %v1723_v35 }
 0x3fe   : > { %5967 = vmatmul.msk.f32.vlgmr.msrb.gmra.mxu3 %vm1577_vm11, %v1709_v7  ;;  %5970 = vmatmul.msk.f32.vlgmr.msrb.gmra.mxu2 %vm1577_vm11, %v1754_v28 }
 0x3ff   : > { %1949 = vmatpush.msrb.mxu3 %v7790_v10  ;;  %5984 = vmatpush.xpose.msk.msrb.mxu2 %vm1352_vm9, %v2125_v40 }
 0x402   : > { %v2153_v39 = vpop.permute.xlu1 %2152 }
 0x406   : > { %5968 = vmatmul.msk.f32.vlgmr.msra.gmra.mxu3 %vm1577_vm11, %v1724_v55  ;;  %5977 = vmatmul.msk.f32.vlgmr.msra.gmra.mxu2 %vm1352_vm9, %v7726_v54 }
 0x407   : > { %5978 = vmatpush.xpose.msk.msra.mxu3 %vm1352_vm9, %v7755_v31 }
 0x40e   : > { %5985 = vmatmul.msk.f32.vlgmr.msrb.gmra.mxu2 %vm1352_vm9, %v2123_v6 }
 0x41f   : > { %v1649_v49 = vpop.xlane.xlu2 %1648 }
 0x420   : > { %6357 = vrcp.f32 %v1649_v49  ;;  %v1766_v25 = vand.u32 2147483648, %v1649_v49  ;;  %v1764_v33 = vand.u32 2147483647, %v1649_v49  ;;  %vm1760_vm7 = vweird.f32 %v1649_v49 }
 0x422   : > { %v1767_v42 = vor.u32 1.1754944e-38, %v1766_v25  ;;  %vm1765_vm10 = vcmp.eq.f32.partialorder %v1764_v33, 8.507059e+37 }
 0x426   : > { %v6358_v15 = vpop.eup %6357 }
 0x427   : > { %v1756_v63 = vmul.f32 %v6358_v15, %v1649_v49  ;;  %v2151_v57 = vpop.permute.xlu2 %2150  ;;  %vm1761_vm6 = vweird.f32 %v6358_v15 }
 0x428   : > { %vm1762_vm8 = vmor %vm1760_vm7, %vm1761_vm6 }
 0x429   : > { %v1757_v32 = vsub.f32 1.0, %v1756_v63 }
 0x42b   : > { %v1758_v2 = vmul.f32 %v6358_v15, %v1757_v32 }
 0x42d   : > { %v1759_v38 = vadd.f32 %v6358_v15, %v1758_v2  ;;  %v1595_v54 = vpop.xlane.xlu1 %1594 }
 0x42e   : > { %v1607_v31 = vsub.f32 %v7737_v14, %v1595_v54  ;;  %v7821_v14 = vpack.i.bf16 %v7790_v10, %v7630_v13 }
 0x42f   : > { %v1763_v44 = vsel %vm1762_vm8, %v6358_v15, %v1759_v38  ;;  %v7805_v45 = vpop.permute.xlu2 %2096 }
 0x430   : > { %v1768_v47 = vsel %vm1765_vm10, %v1767_v42, %v1763_v44  ;;  %v1620_v60 = vmul.f32 1.442695, %v1607_v31 }
 0x431   : > { %v1769_v37 = vmul.f32 %v7728_v62, %v1768_v47 }
 0x432   : > { %6359 = vpow2.f32 %v1620_v60 }
 0x433   : > { %5971 = vmatmul.msk.f32.vlgmr.msrb.gmra.mxu3 %vm1577_vm11, %v1769_v37 }
 0x434   : > { %5986 = vmatpush.xpose.msk.msrb.mxu3 %vm1352_vm9, %v2153_v39 }
 0x435   : > { %v7829_v4 = vpop.f32.mrf.mxu3 }
 0x437   : > { %v6254_v51 = vpop.permute.xlu2 %6253 }
 0x438   : > { %v6360_v48 = vpop.eup %6359  ;;  %v6256_v24 = vunpack.i.h.bf16 %v6254_v51  ;;  %v6255_v3 = vunpack.i.l.bf16 %v6254_v51 }
 0x439   : > { %v1641_v52 = vsel %vm1577_vm11, %v6360_v48, 0.0 }
 0x43a   : > { %2462 = vmatpush.msra.mxu2 %v6255_v3  ;;  %1642 = vadd.xlane.f32.xlu0 %v1641_v52 }
 0x43b   : > { %5979 = vmatmul.msk.f32.vlgmr.msra.gmra.mxu3 %vm1352_vm9, %v7757_v18 }
 0x43c   : > { %2489 = vmatpush.msra.mxu3 %v6256_v24 }
 0x43d   : > { %v7833_v26 = vpop.f32.mrf.mxu3 }
 0x443   : > { %5987 = vmatmul.msk.f32.vlgmr.msrb.gmra.mxu3 %vm1352_vm9, %v2151_v57 }
 0x445   : > { %v1985_v62 = vpop.permute.xlu1 %1984 }
 0x446   : > { %5974 = vmatpush.xpose.msk.msra.mxu1 %vm1352_vm9, %v1985_v62 }
 0x44e   : > { %1982 = vrot.lane.b32.xlu0 %v7570_v22, %s6939_s11 }
 0x456   : > { %2094 = vrot.lane.b32.xlu0 %v7625_v12, %s6939_s11 }
 0x45e   : > { %6258 = vrot.lane.b32.xlu0 %v7821_v14, %s6939_s11 }
 0x466   : > { %2762 = vrot.lane.b32.xlu0 %v7565_v53, %s6941_s17 }
 0x479   : > { %v7837_v49 = vpop.f32.mrf.mxu3 }
 0x481   : > { %v7827_v18 = vpop.f32.mrf.mxu2  ;;  %v7839_v39 = vpop.f32.mrf.mxu3 }
 0x489   : > { %v2035_v43 = vpop.f32.mrf.mxu2  ;;  %v7843_v63 = vpop.f32.mrf.mxu3 }
 0x48a   : > { %v2180_v7 = vmul.f32 0.17677669, %v2035_v43 }
 0x48c   : > { %v2188_v28 = vadd.f32 %v2180_v7, %v7660_v27 }
 0x48e   : > { %v2200_v40 = vsel %vm1577_vm11, %v2188_v28, -inf }
 0x490   : > { %2201 = vmax.xlane.f32.xlu0 %v2200_v40 }
 0x491   : > { %v2147_v21 = vpop.f32.mrf.mxu2 }
 0x492   : > { %v2184_v35 = vmul.f32 0.17677669, %v2147_v21 }
 0x494   : > { %v2192_v55 = vadd.f32 %v2184_v35, %v7660_v27 }
 0x496   : > { %v2212_v6 = vsel %vm1577_vm11, %v2192_v55, -inf }
 0x497   : > { %2213 = vmax.xlane.f32.xlu1 %v2212_v6 }
 0x4a4   : > { %2790 = vrot.lane.b32.xlu0 %v7576_v58, %s6941_s17 }
 0x4ad   : > { %v1643_v15 = vpop.xlane.xlu0 %1642 }
 0x4ae   : > { %6361 = vrcp.f32 %v1643_v15  ;;  %v1736_v33 = vand.u32 2147483648, %v1643_v15  ;;  %v1734_v54 = vand.u32 2147483647, %v1643_v15  ;;  %vm1730_vm13 = vweird.f32 %v1643_v15 }
 0x4b0   : > { %2760 = vrot.lane.b32.xlu1 %v7570_v22, %s6941_s17  ;;  %v1737_v31 = vor.u32 1.1754944e-38, %v1736_v33  ;;  %vm1735_vm15 = vcmp.eq.f32.partialorder %v1734_v54, 8.507059e+37 }
 0x4b4   : > { %v6362_v57 = vpop.eup %6361 }
 0x4b5   : > { %v1726_v32 = vmul.f32 %v6362_v57, %v1643_v15  ;;  %vm1731_vm12 = vweird.f32 %v6362_v57  ;;  %v7862_v15 = vpop.permute.xlu1 %2734 }
 0x4b6   : > { %v7847_v25 = vpop.f32.mrf.mxu3  ;;  %vm1732_vm14 = vmor %vm1730_vm13, %vm1731_vm12 }
 0x4b7   : > { %v1727_v2 = vsub.f32 1.0, %v1726_v32 }
 0x4b9   : > { %v1728_v38 = vmul.f32 %v6362_v57, %v1727_v2 }
 0x4bb   : > { %v1729_v42 = vadd.f32 %v6362_v57, %v1728_v38 }
 0x4bd   : > { %v1733_v44 = vsel %vm1732_vm14, %v6362_v57, %v1729_v42 }
 0x4be   : > { %v2063_v47 = vpop.f32.mrf.mxu3  ;;  %v1738_v60 = vsel %vm1735_vm15, %v1737_v31, %v1733_v44 }
 0x4bf   : > { %v2181_v37 = vmul.f32 0.17677669, %v2063_v47  ;;  %v1739_v51 = vmul.f32 %v6360_v48, %v1738_v60 }
 0x4c0   : > { %v1983_v24 = vpop.permute.xlu0 %1982 }
 0x4c1   : > { %5969 = vmatmul.msk.f32.vlgmr.msrb.gmra.mxu1 %vm1577_vm11, %v1739_v51  ;;  %v2189_v3 = vadd.f32 %v2181_v37, %v7660_v27 }
 0x4c2   : > { %5982 = vmatpush.xpose.msk.msrb.mxu1 %vm1352_vm9, %v7805_v45 }
 0x4c3   : > { %v2203_v52 = vsel %vm1577_vm11, %v2189_v3, -inf }
 0x4c4   : > { %2204 = vmax.xlane.f32.xlu2 %v2203_v52 }
 0x4c6   : > { %v2175_v62 = vpop.f32.mrf.mxu3 }
 0x4c7   : > { %v2185_v43 = vmul.f32 0.17677669, %v2175_v62 }
 0x4c8   : > { %v2095_v7 = vpop.permute.xlu0 %2094 }
 0x4c9   : > { %5975 = vmatmul.msk.f32.vlgmr.msra.gmra.mxu1 %vm1352_vm9, %v1983_v24  ;;  %v2193_v40 = vadd.f32 %v2185_v43, %v7660_v27 }
 0x4cb   : > { %v2215_v48 = vsel %vm1577_vm11, %v2193_v40, -inf }
 0x4cc   : > { %2216 = vmax.xlane.f32.xlu2 %v2215_v48 }
 0x4d0   : > { %v6259_v21 = vpop.permute.xlu0 %6258 }
 0x4d1   : > { %v6261_v35 = vunpack.i.h.bf16 %v6259_v21  ;;  %v6260_v6 = vunpack.i.l.bf16 %v6259_v21  ;;  %5983 = vmatmul.msk.f32.vlgmr.msrb.gmra.mxu1 %vm1352_vm9, %v2095_v7 }
 0x4d3   : > { %2570 = vmatpush.msrb.mxu2 %v6260_v6  ;;  %2597 = vmatpush.msrb.mxu3 %v6261_v35 }
 0x4d8   : > { %v7860_v45 = vpop.permute.xlu0 %2762 }
 0x4e4   : > { %2732 = vrot.lane.b32.xlu2 %v7560_v50, %s6941_s17 }
 0x503   : > { %v2202_v57 = vpop.xlane.xlu0 %2201 }
 0x504   : > { %v2220_v32 = vsub.f32 %v2188_v28, %v2202_v57 }
 0x506   : > { %v2230_v2 = vmul.f32 1.442695, %v2220_v32 }
 0x508   : > { %6363 = vpow2.f32 %v2230_v2 }
 0x50a   : > { %v2214_v33 = vpop.xlane.xlu1 %2213 }
 0x50b   : > { %v2224_v38 = vsub.f32 %v2192_v55, %v2214_v33 }
 0x50d   : > { %v2238_v54 = vmul.f32 1.442695, %v2224_v38 }
 0x50e   : > { %v7864_v42 = vpop.eup %6363 }
 0x50f   : > { %6365 = vpow2.f32 %v2238_v54  ;;  %v2248_v31 = vsel %vm1577_vm11, %v7864_v42, 0.0 }
 0x510   : > { %2249 = vadd.xlane.f32.xlu1 %v2248_v31 }
 0x515   : > { %v7868_v44 = vpop.eup %6365 }
 0x516   : > { %v2260_v47 = vsel %vm1577_vm11, %v7868_v44, 0.0  ;;  %v2791_v57 = vpop.permute.xlu0 %2790 }
 0x517   : > { %2261 = vadd.xlane.f32.xlu0 %v2260_v47 }
 0x522   : > { %v7909_v6 = vpop.permute.xlu1 %2760 }
 0x529   : > { %2788 = vrot.lane.b32.xlu1 %v7583_v59, %s6941_s17 }
 0x52b   : > { %2816 = vrot.lane.b32.xlu0 %v7596_v1, %s6941_s17 }
 0x533   : > { %2844 = vrot.lane.b32.xlu0 %v7609_v61, %s6941_s17 }
 0x537   : > { %v2205_v28 = vpop.xlane.xlu2 %2204 }
 0x538   : > { %v2221_v55 = vsub.f32 %v2189_v3, %v2205_v28 }
 0x53a   : > { %v2232_v60 = vmul.f32 1.442695, %v2221_v55 }
 0x53b   : > { %2930 = vrot.lane.b32.xlu0 %v7648_v20, %s6941_s17 }
 0x53c   : > { %6367 = vpow2.f32 %v2232_v60 }
 0x53e   : > { %v7886_v7 = vpop.f32.mrf.mxu1 }
 0x53f   : > { %v2217_v37 = vpop.xlane.xlu2 %2216 }
 0x540   : > { %v2225_v51 = vsub.f32 %v2193_v40, %v2217_v37 }
 0x542   : > { %v7880_v24 = vpop.eup %6367  ;;  %v2240_v62 = vmul.f32 1.442695, %v2225_v51 }
 0x543   : > { %v2251_v52 = vsel %vm1577_vm11, %v7880_v24, 0.0 }
 0x544   : > { %2252 = vadd.xlane.f32.xlu2 %v2251_v52  ;;  %6369 = vpow2.f32 %v2240_v62 }
 0x546   : > { %v2007_v48 = vpop.f32.mrf.mxu1 }
 0x547   : > { %v2179_v21 = vmul.f32 0.17677669, %v2007_v48 }
 0x549   : > { %v7893_v40 = vadd.f32 %v2179_v21, %v7660_v27 }
 0x54a   : > { %v7884_v43 = vpop.eup %6369 }
 0x54b   : > { %v2263_v3 = vsel %vm1577_vm11, %v7884_v43, 0.0  ;;  %v2197_v35 = vsel %vm1577_vm11, %v7893_v40, -inf }
 0x54e   : > { %v2119_v60 = vpop.f32.mrf.mxu1 }
 0x553   : > { %2264 = vadd.xlane.f32.xlu1 %v2263_v3  ;;  %v2183_v3 = vmul.f32 0.17677669, %v2119_v60 }
 0x55c   : > { %2818 = vrot.lane.b32.xlu2 %v7591_v0, %s6941_s17 }
 0x564   : > { %2846 = vrot.lane.b32.xlu2 %v7604_v5, %s6941_s17 }
 0x565   : > { %2198 = vmax.xlane.f32.xlu0 %v2197_v35 }
 0x56c   : > { %2872 = vrot.lane.b32.xlu2 %v7625_v12, %s6941_s17  ;;  %2874 = vrot.lane.b32.xlu1 %v7619_v11, %s6941_s17 }
 0x574   : > { %2900 = vrot.lane.b32.xlu2 %v7639_v17, %s6941_s17  ;;  %2902 = vrot.lane.b32.xlu1 %v7633_v16, %s6941_s17 }
 0x579   : > { %1956 = vrot.lane.b32.xlu0 %v7553_v46, %s6939_s11 }
 0x57c   : > { %2928 = vrot.lane.b32.xlu1 %v7653_v23, %s6941_s17 }
 0x583   : > { %v2250_v32 = vpop.xlane.xlu1 %2249 }
 0x584   : > { %6371 = vrcp.f32 %v2250_v32  ;;  %v2307_v31 = vand.u32 2147483648, %v2250_v32  ;;  %v2305_v28 = vand.u32 2147483647, %v2250_v32  ;;  %vm2301_vm1 = vweird.f32 %v2250_v32 }
 0x586   : > { %v2308_v51 = vor.u32 1.1754944e-38, %v2307_v31  ;;  %vm2306_vm3 = vcmp.eq.f32.partialorder %v2305_v28, 8.507059e+37 }
 0x58a   : > { %v6372_v2 = vpop.eup %6371  ;;  %v2262_v33 = vpop.xlane.xlu0 %2261 }
 0x58b   : > { %v2297_v38 = vmul.f32 %v6372_v2, %v2250_v32  ;;  %6373 = vrcp.f32 %v2262_v33  ;;  %vm2302_vm0 = vweird.f32 %v6372_v2  ;;  %v2367_v35 = vand.u32 2147483648, %v2262_v33 }
 0x58c   : > { %vm2303_vm2 = vmor %vm2301_vm1, %vm2302_vm0  ;;  %vm2361_vm5 = vweird.f32 %v2262_v33  ;;  %v7918_v32 = vadd.f32 %v2183_v3, %v7660_v27 }
 0x58d   : > { %v2298_v54 = vsub.f32 1.0, %v2297_v38 }
 0x58f   : > { %v2299_v47 = vmul.f32 %v6372_v2, %v2298_v54  ;;  %v2365_v54 = vand.u32 2147483647, %v2262_v33 }
 0x591   : > { %v6374_v55 = vpop.eup %6373  ;;  %v2300_v37 = vadd.f32 %v6372_v2, %v2299_v47  ;;  %vm2366_vm7 = vcmp.eq.f32.partialorder %v2365_v54, 8.507059e+37 }
 0x592   : > { %v2357_v52 = vmul.f32 %v6374_v55, %v2262_v33  ;;  %vm2362_vm4 = vweird.f32 %v6374_v55 }
 0x593   : > { %v2304_v62 = vsel %vm2303_vm2, %v6372_v2, %v2300_v37  ;;  %vm2363_vm6 = vmor %vm2361_vm5, %vm2362_vm4  ;;  %v2368_v2 = vor.u32 1.1754944e-38, %v2367_v35 }
 0x594   : > { %v2309_v48 = vsel %vm2306_vm3, %v2308_v51, %v2304_v62  ;;  %v2358_v21 = vsub.f32 1.0, %v2357_v52 }
 0x595   : > { %v2310_v19 = vmul.f32 %v7864_v42, %v2309_v48  ;;  %v2209_v42 = vsel %vm1577_vm11, %v7918_v32, -inf }
 0x596   : > { %v2359_v38 = vmul.f32 %v6374_v55, %v2358_v21 }
 0x597   : > { %5990 = vmatmul.msk.f32.vlgmr.msra.gmra.mxu2 %vm1577_vm11, %v2310_v19  ;;  %v2733_v19 = vpop.permute.xlu2 %2732 }
 0x598   : > { %v2360_v56 = vadd.f32 %v6374_v55, %v2359_v38  ;;  %6012 = vmatpush.xpose.msk.msra.mxu2 %vm1352_vm9, %v7862_v15 }
 0x59a   : > { %v2364_v31 = vsel %vm2363_vm6, %v6374_v55, %v2360_v56 }
 0x59b   : > { %v2369_v47 = vsel %vm2366_vm7, %v2368_v2, %v2364_v31  ;;  %v2789_v15 = vpop.permute.xlu1 %2788 }
 0x59c   : > { %v2370_v28 = vmul.f32 %v7868_v44, %v2369_v47 }
 0x59d   : > { %2210 = vmax.xlane.f32.xlu2 %v2209_v42  ;;  %v2817_v33 = vpop.permute.xlu0 %2816 }
 0x59f   : > { %5994 = vmatmul.msk.f32.vlgmr.msrb.gmra.mxu2 %vm1577_vm11, %v2370_v28 }
 0x5a0   : > { %6016 = vmatpush.xpose.msk.msrb.mxu2 %vm1352_vm9, %v2791_v57 }
 0x5a5   : > { %v2845_v3 = vpop.permute.xlu0 %2844 }
 0x5a7   : > { %6013 = vmatmul.msk.f32.vlgmr.msra.gmra.mxu2 %vm1352_vm9, %v2733_v19 }
 0x5ad   : > { %v2931_v42 = vpop.permute.xlu0 %2930 }
 0x5af   : > { %6017 = vmatmul.msk.f32.vlgmr.msrb.gmra.mxu2 %vm1352_vm9, %v2789_v15 }
 0x5b5   : > { %1954 = vrot.lane.b32.xlu2 %v7560_v50, %s6939_s11 }
 0x5b7   : > { %v2253_v56 = vpop.xlane.xlu2 %2252 }
 0x5b8   : > { %6375 = vrcp.f32 %v2253_v56  ;;  %v2322_v51 = vand.u32 2147483648, %v2253_v56  ;;  %v2320_v57 = vand.u32 2147483647, %v2253_v56  ;;  %vm2316_vm10 = vweird.f32 %v2253_v56 }
 0x5ba   : > { %v2323_v48 = vor.u32 1.1754944e-38, %v2322_v51  ;;  %vm2321_vm13 = vcmp.eq.f32.partialorder %v2320_v57, 8.507059e+37 }
 0x5be   : > { %v6376_v55 = vpop.eup %6375 }
 0x5bf   : > { %v2312_v60 = vmul.f32 %v6376_v55, %v2253_v56  ;;  %v2819_v44 = vpop.permute.xlu2 %2818  ;;  %vm2317_vm8 = vweird.f32 %v6376_v55 }
 0x5c0   : > { %vm2318_vm12 = vmor %vm2316_vm10, %vm2317_vm8 }
 0x5c1   : > { %v2313_v37 = vsub.f32 1.0, %v2312_v60 }
 0x5c3   : > { %v2314_v52 = vmul.f32 %v6376_v55, %v2313_v37 }
 0x5c5   : > { %v2315_v62 = vadd.f32 %v6376_v55, %v2314_v52 }
 0x5c6   : > { %v2265_v21 = vpop.xlane.xlu1 %2264 }
 0x5c7   : > { %v2319_v35 = vsel %vm2318_vm12, %v6376_v55, %v2315_v62  ;;  %6377 = vrcp.f32 %v2265_v21  ;;  %v2847_v38 = vpop.permute.xlu2 %2846  ;;  %v2382_v19 = vand.u32 2147483648, %v2265_v21  ;;  %v2380_v56 = vand.u32 2147483647, %v2265_v21 }
 0x5c8   : > { %v2324_v54 = vsel %vm2321_vm13, %v2323_v48, %v2319_v35  ;;  %6020 = vmatpush.xpose.msk.msra.mxu2 %vm1352_vm9, %v2847_v38  ;;  %vm2376_vm15 = vweird.f32 %v2265_v21 }
 0x5c9   : > { %v2325_v2 = vmul.f32 %v7880_v24, %v2324_v54  ;;  %v2383_v60 = vor.u32 1.1754944e-38, %v2382_v19  ;;  %vm2381_vm1 = vcmp.eq.f32.partialorder %v2380_v56, 8.507059e+37 }
 0x5cb   : > { %5991 = vmatmul.msk.f32.vlgmr.msra.gmra.mxu3 %vm1577_vm11, %v2325_v2  ;;  %6021 = vmatmul.msk.f32.vlgmr.msra.gmra.mxu2 %vm1352_vm9, %v2845_v3 }
 0x5cc   : > { %6014 = vmatpush.xpose.msk.msra.mxu3 %vm1352_vm9, %v7860_v45 }
 0x5cd   : > { %v6378_v31 = vpop.eup %6377 }
 0x5ce   : > { %v2372_v47 = vmul.f32 %v6378_v31, %v2265_v21  ;;  %vm2377_vm14 = vweird.f32 %v6378_v31 }
 0x5cf   : > { %vm2378_vm0 = vmor %vm2376_vm15, %vm2377_vm14  ;;  %v2873_v3 = vpop.permute.xlu2 %2872 }
 0x5d0   : > { %v2373_v28 = vsub.f32 1.0, %v2372_v47 }
 0x5d2   : > { %v2374_v15 = vmul.f32 %v6378_v31, %v2373_v28 }
 0x5d4   : > { %v2375_v55 = vadd.f32 %v6378_v31, %v2374_v15 }
 0x5d6   : > { %v2379_v24 = vsel %vm2378_vm0, %v6378_v31, %v2375_v55 }
 0x5d7   : > { %v2384_v37 = vsel %vm2381_vm1, %v2383_v60, %v2379_v24  ;;  %v2901_v21 = vpop.permute.xlu2 %2900  ;;  %v6262_v60 = vpack.i.bf16 %v7616_v8, %v7669_v34 }
 0x5d8   : > { %v2199_v51 = vpop.xlane.xlu0 %2198  ;;  %v2385_v52 = vmul.f32 %v7884_v43, %v2384_v37 }
 0x5d9   : > { %v2219_v45 = vsub.f32 %v7893_v40, %v2199_v51  ;;  %v7982_v51 = vpack.i.bf16 %v7616_v8, %v7775_v41 }
 0x5da   : > { %5995 = vmatmul.msk.f32.vlgmr.msrb.gmra.mxu3 %vm1577_vm11, %v2385_v52 }
 0x5db   : > { %v2228_v57 = vmul.f32 1.442695, %v2219_v45  ;;  %6018 = vmatpush.xpose.msk.msrb.mxu3 %vm1352_vm9, %v2819_v44 }
 0x5dd   : > { %6379 = vpow2.f32 %v2228_v57 }
 0x5de   : > { %v2875_v62 = vpop.permute.xlu1 %2874 }
 0x5e2   : > { %6015 = vmatmul.msk.f32.vlgmr.msra.gmra.mxu3 %vm1352_vm9, %v7909_v6 }
 0x5e3   : > { %v7941_v48 = vpop.eup %6379  ;;  %6022 = vmatpush.xpose.msk.msra.mxu3 %vm1352_vm9, %v2875_v62 }
 0x5e4   : > { %v2245_v43 = vsel %vm1577_vm11, %v7941_v48, 0.0 }
 0x5e5   : > { %2246 = vadd.xlane.f32.xlu1 %v2245_v43 }
 0x5e6   : > { %v2903_v40 = vpop.permute.xlu1 %2902 }
 0x5e7   : > { %6024 = vmatpush.xpose.msk.msrb.mxu2 %vm1352_vm9, %v2903_v40 }
 0x5ea   : > { %6019 = vmatmul.msk.f32.vlgmr.msrb.gmra.mxu3 %vm1352_vm9, %v2817_v33  ;;  %6025 = vmatmul.msk.f32.vlgmr.msrb.gmra.mxu2 %vm1352_vm9, %v2901_v21 }
 0x5eb   : > { %6026 = vmatpush.xpose.msk.msrb.mxu3 %vm1352_vm9, %v2931_v42  ;;  %v1957_v44 = vpop.permute.xlu0 %1956 }
 0x5ec   : > { %5972 = vmatpush.xpose.msk.msra.mxu0 %vm1352_vm9, %v1957_v44 }
 0x5ee   : > { %v2929_v6 = vpop.permute.xlu1 %2928 }
 0x5f2   : > { %6023 = vmatmul.msk.f32.vlgmr.msra.gmra.mxu3 %vm1352_vm9, %v2873_v3 }
 0x5fa   : > { %6027 = vmatmul.msk.f32.vlgmr.msrb.gmra.mxu3 %vm1352_vm9, %v2929_v6 }
 0x610   : > { %v2211_v35 = vpop.xlane.xlu2 %2210 }
 0x611   : > { %v2223_v38 = vsub.f32 %v7918_v32, %v2211_v35 }
 0x613   : > { %v2236_v54 = vmul.f32 1.442695, %v2223_v38 }
 0x615   : > { %6381 = vpow2.f32 %v2236_v54 }
 0x618   : > { %v1955_v2 = vpop.permute.xlu2 %1954 }
 0x619   : > { %5973 = vmatmul.msk.f32.vlgmr.msra.gmra.mxu0 %vm1352_vm9, %v1955_v2 }
 0x61a   : > { %v7955_v33 = vpop.f32.mrf.mxu2 }
 0x61b   : > { %v7957_v31 = vpop.eup %6381 }
 0x61c   : > { %v2257_v47 = vsel %vm1577_vm11, %v7957_v31, 0.0 }
 0x61d   : > { %2258 = vadd.xlane.f32.xlu1 %v2257_v47 }
 0x622   : > { %v7961_v42 = vpop.f32.mrf.mxu2 }
 0x62a   : > { %v2757_v28 = vpop.f32.mrf.mxu2 }
 0x62b   : > { %v2956_v19 = vmul.f32 0.17677669, %v2757_v28 }
 0x62d   : > { %v7964_v15 = vadd.f32 %v2956_v19, %v7660_v27 }
 0x62f   : > { %v2972_v32 = vsel %vm1577_vm11, %v7964_v15, -inf }
 0x630   : > { %2973 = vmax.xlane.f32.xlu0 %v2972_v32 }
 0x632   : > { %v2813_v56 = vpop.f32.mrf.mxu2 }
 0x633   : > { %v2958_v55 = vmul.f32 0.17677669, %v2813_v56 }
 0x635   : > { %v7971_v24 = vadd.f32 %v2958_v55, %v7660_v27 }
 0x636   : > { %6263 = vrot.lane.b32.xlu1 %v6262_v60, %s6939_s11 }
 0x637   : > { %v2978_v37 = vsel %vm1577_vm11, %v7971_v24, -inf }
 0x638   : > { %2979 = vmax.xlane.f32.xlu0 %v2978_v37 }
 0x63e   : > { %2068 = vrot.lane.b32.xlu1 %v7604_v5, %s6939_s11 }
 0x646   : > { %6273 = vrot.lane.b32.xlu1 %v7749_v9, %s6941_s17 }
 0x64e   : > { %6278 = vrot.lane.b32.xlu1 %v7982_v51, %s6941_s17  ;;  %v2869_v34 = vpop.f32.mrf.mxu2  ;;  %v7991_v62 = vpop.f32.mrf.mxu3 }
 0x64f   : > { %v2960_v52 = vmul.f32 0.17677669, %v2869_v34 }
 0x651   : > { %v7987_v45 = vadd.f32 %v2960_v52, %v7660_v27 }
 0x653   : > { %v2984_v57 = vsel %vm1577_vm11, %v7987_v45, -inf }
 0x654   : > { %2985 = vmax.xlane.f32.xlu0 %v2984_v57 }
 0x656   : > { %3447 = vrot.lane.b32.xlu1 %v7553_v46, %s6942_s8 }
 0x658   : > { %v2247_v60 = vpop.xlane.xlu1 %2246 }
 0x659   : > { %6383 = vrcp.f32 %v2247_v60  ;;  %vm2286_vm3 = vweird.f32 %v2247_v60 }
 0x65d   : > { %v7995_v8 = vpop.f32.mrf.mxu3 }
 0x65e   : > { %6283 = vrot.lane.b32.xlu1 %v7821_v14, %s6941_s17 }
 0x65f   : > { %v6384_v34 = vpop.eup %6383 }
 0x660   : > { %v2282_v52 = vmul.f32 %v6384_v34, %v2247_v60  ;;  %vm2287_vm2 = vweird.f32 %v6384_v34 }
 0x661   : > { %vm2288_vm4 = vmor %vm2286_vm3, %vm2287_vm2 }
 0x662   : > { %v2283_v57 = vsub.f32 1.0, %v2282_v52 }
 0x665   : > { %v2785_v3 = vpop.f32.mrf.mxu3 }
 0x666   : > { %v2957_v43 = vmul.f32 0.17677669, %v2785_v3  ;;  %3445 = vrot.lane.b32.xlu1 %v7560_v50, %s6942_s8 }
 0x668   : > { %v8002_v40 = vadd.f32 %v2957_v43, %v7660_v27  ;;  %v2284_v43 = vmul.f32 %v6384_v34, %v2283_v57 }
 0x66a   : > { %v2975_v21 = vsel %vm1577_vm11, %v8002_v40, -inf }
 0x66b   : > { %2976 = vmax.xlane.f32.xlu2 %v2975_v21 }
 0x66d   : > { %v2841_v44 = vpop.f32.mrf.mxu3  ;;  %v2925_v6 = vpop.f32.mrf.mxu2 }
 0x66e   : > { %v2959_v46 = vmul.f32 0.17677669, %v2841_v44  ;;  %v2962_v35 = vmul.f32 0.17677669, %v2925_v6  ;;  %3475 = vrot.lane.b32.xlu1 %v7565_v53, %s6942_s8  ;;  %v2285_v44 = vadd.f32 %v6384_v34, %v2284_v43 }
 0x670   : > { %v8009_v14 = vadd.f32 %v2959_v46, %v7660_v27  ;;  %v8012_v38 = vadd.f32 %v2962_v35, %v7660_v27  ;;  %v2292_v46 = vand.u32 2147483648, %v2247_v60  ;;  %v2290_v35 = vand.u32 2147483647, %v2247_v60 }
 0x672   : > { %v2981_v50 = vsel %vm1577_vm11, %v8009_v14, -inf  ;;  %v2990_v54 = vsel %vm1577_vm11, %v8012_v38, -inf  ;;  %vm2291_vm5 = vcmp.eq.f32.partialorder %v2290_v35, 8.507059e+37 }
 0x673   : > { %2982 = vmax.xlane.f32.xlu2 %v2981_v50  ;;  %2991 = vmax.xlane.f32.xlu0 %v2990_v54  ;;  %v2289_v54 = vsel %vm2288_vm4, %v6384_v34, %v2285_v44 }
 0x675   : > { %v2897_v2 = vpop.f32.mrf.mxu3 }
 0x676   : > { %v2961_v47 = vmul.f32 0.17677669, %v2897_v2 }
 0x678   : > { %v8019_v28 = vadd.f32 %v2961_v47, %v7660_v27 }
 0x67a   : > { %v2987_v53 = vsel %vm1577_vm11, %v8019_v28, -inf }
 0x67b   : > { %2988 = vmax.xlane.f32.xlu2 %v2987_v53  ;;  %v2293_v53 = vor.u32 1.1754944e-38, %v2292_v46  ;;  %v1338_v46 = vld [vmem:[%s7275_s29 + $0x10] sm:$0xff] }
 0x67d   : > { %v2953_v19 = vpop.f32.mrf.mxu3 }
 0x67e   : > { %v2963_v32 = vmul.f32 0.17677669, %v2953_v19 }
 0x680   : > { %v8024_v56 = vadd.f32 %v2963_v32, %v7660_v27  ;;  %v2294_v32 = vsel %vm2291_vm5, %v2293_v53, %v2289_v54  ;;  %v1336_v53 = vld [vmem:[%s7275_s29] sm:$0xff] }
 0x681   : > { %v2295_v34 = vmul.f32 %v7941_v48, %v2294_v32  ;;  %v1337_v48 = vld [vmem:[%s7275_s29 + $0x8] sm:$0xff] }
 0x682   : > { %v2993_v55 = vsel %vm1577_vm11, %v8024_v56, -inf }
 0x683   : > { %2994 = vmax.xlane.f32.xlu2 %v2993_v55 }
 0x687   : > { %2066 = vrot.lane.b32.xlu0 %v7609_v61, %s6939_s11 }
 0x690   : > { %v2259_v37 = vpop.xlane.xlu1 %2258 }
 0x691   : > { %6385 = vrcp.f32 %v2259_v37  ;;  %v2352_v57 = vand.u32 2147483648, %v2259_v37  ;;  %vm2346_vm7 = vweird.f32 %v2259_v37  ;;  %v2350_v60 = vand.u32 2147483647, %v2259_v37 }
 0x693   : > { %vm2351_vm10 = vcmp.eq.f32.partialorder %v2350_v60, 8.507059e+37 }
 0x697   : > { %v6386_v3 = vpop.eup %6385 }
 0x698   : > { %v2342_v21 = vmul.f32 %v6386_v3, %v2259_v37  ;;  %vm2347_vm6 = vweird.f32 %v6386_v3 }
 0x699   : > { %vm2348_vm8 = vmor %vm2346_vm7, %vm2347_vm6 }
 0x69a   : > { %v2343_v6 = vsub.f32 1.0, %v2342_v21 }
 0x69b   : > { %6268 = vrot.lane.b32.xlu2 %v7675_v36, %s6941_s17 }
 0x69c   : > { %v2344_v2 = vmul.f32 %v6386_v3, %v2343_v6  ;;  %v2353_v6 = vor.u32 1.1754944e-38, %v2352_v57 }
 0x69e   : > { %v2345_v55 = vadd.f32 %v6386_v3, %v2344_v2 }
 0x6a0   : > { %v2349_v44 = vsel %vm2348_vm8, %v6386_v3, %v2345_v55 }
 0x6a3   : > { %v2974_v50 = vpop.xlane.xlu0 %2973 }
 0x6a4   : > { %v2996_v47 = vsub.f32 %v7964_v15, %v2974_v50  ;;  %v1339_v15 = vld [vmem:[%s7275_s29 + $0x18] sm:$0xff]  ;;  %v2354_v50 = vsel %vm2351_vm10, %v2353_v6, %v2349_v44 }
 0x6a6   : > { %v3004_v19 = vmul.f32 1.442695, %v2996_v47  ;;  %v2355_v47 = vmul.f32 %v7957_v31, %v2354_v50 }
 0x6a8   : > { %6387 = vpow2.f32 %v3004_v19  ;;  %v6264_v52 = vpop.permute.xlu1 %6263 }
 0x6a9   : > { %v6266_v43 = vunpack.i.h.bf16 %v6264_v52  ;;  %v6265_v21 = vunpack.i.l.bf16 %v6264_v52 }
 0x6ab   : > { %2435 = vmatpush.msra.mxu1 %v6265_v21  ;;  %v2980_v54 = vpop.xlane.xlu0 %2979 }
 0x6ac   : > { %5989 = vmatmul.msk.f32.vlgmr.msra.gmra.mxu1 %vm1577_vm11, %v2295_v34  ;;  %v2998_v3 = vsub.f32 %v7971_v24, %v2980_v54 }
 0x6ad   : > { %2543 = vmatpush.msrb.mxu1 %v6266_v43 }
 0x6ae   : > { %v8037_v35 = vpop.eup %6387  ;;  %v3008_v19 = vmul.f32 1.442695, %v2998_v3 }
 0x6af   : > { %2703 = vmatpush.msra.mxu1 %v1339_v15  ;;  %v3020_v37 = vsel %vm1577_vm11, %v8037_v35, 0.0 }
 0x6b0   : > { %v2069_v2 = vpop.permute.xlu1 %2068  ;;  %3021 = vadd.xlane.f32.xlu1 %v3020_v37  ;;  %6389 = vpow2.f32 %v3008_v19 }
 0x6b1   : > { %2704 = vmatpush.msra.mxu1 %v1338_v46  ;;  %5980 = vmatpush.xpose.msk.msrb.mxu0 %vm1352_vm9, %v2069_v2 }
 0x6b3   : > { %2705 = vmatpush.msra.mxu1 %v1337_v48 }
 0x6b4   : > { %5993 = vmatmul.msk.f32.vlgmr.msrb.gmra.mxu1 %vm1577_vm11, %v2355_v47 }
 0x6b5   : > { %2706 = vmatpush.msra.mxu1 %v1336_v53 }
 0x6b6   : > { %v8051_v55 = vpop.eup %6389 }
 0x6b7   : > { %v3026_v24 = vsel %vm1577_vm11, %v8051_v55, 0.0 }
 0x6b8   : > { %v8047_v32 = vpop.permute.xlu1 %6273 }
 0x6bc   : > { %6004 = vmatmul.msk.f32.vlgmr.msra.gmra.mxu1 %vm1352_vm9, %v7829_v4 }
 0x6c0   : > { %v8053_v52 = vpop.permute.xlu1 %6278 }
 0x6c4   : > { %6005 = vmatmul.msk.f32.gmra.mxu1 %vm1352_vm9, %v7833_v26  ;;  %3027 = vadd.xlane.f32.xlu2 %v3026_v24 }
 0x6c7   : > { %v2986_v26 = vpop.xlane.xlu0 %2985 }
 0x6c8   : > { %v3448_v31 = vpop.permute.xlu1 %3447 }
 0x6c9   : > { %6044 = vmatpush.xpose.msk.msrb.mxu1 %vm1352_vm9, %v3448_v31  ;;  %v6276_v31 = vunpack.i.h.bf16 %v8047_v32 }
 0x6cc   : > { %6006 = vmatmul.msk.f32.gmra.mxu1 %vm1352_vm9, %v7837_v49  ;;  %v3000_v49 = vsub.f32 %v7987_v45, %v2986_v26 }
 0x6d4   : > { %6007 = vmatmul.msk.f32.gmra.mxu1 %vm1352_vm9, %v7839_v39 }
 0x6dc   : > { %6008 = vmatmul.msk.f32.gmra.mxu1 %vm1352_vm9, %v7843_v63 }
 0x6de   : > { %v2977_v4 = vpop.xlane.xlu2 %2976 }
 0x6df   : > { %v2997_v57 = vsub.f32 %v8002_v40, %v2977_v4  ;;  %v3012_v40 = vmul.f32 1.442695, %v3000_v49  ;;  %v6275_v4 = vunpack.i.l.bf16 %v8047_v32 }
 0x6e1   : > { %v3006_v43 = vmul.f32 1.442695, %v2997_v57 }
 0x6e3   : > { %6391 = vpow2.f32 %v3006_v43 }
 0x6e4   : > { %6009 = vmatmul.msk.f32.gmra.mxu1 %vm1352_vm9, %v7886_v7 }
 0x6e6   : > { %v2983_v21 = vpop.xlane.xlu2 %2982  ;;  %v2992_v15 = vpop.xlane.xlu0 %2991 }
 0x6e7   : > { %v2999_v60 = vsub.f32 %v8009_v14, %v2983_v21  ;;  %v8080_v14 = vpop.permute.xlu1 %6283  ;;  %v3002_v45 = vsub.f32 %v8012_v38, %v2992_v15 }
 0x6e9   : > { %v8070_v34 = vpop.eup %6391  ;;  %v3010_v39 = vmul.f32 1.442695, %v2999_v60 }
 0x6ea   : > { %v3023_v63 = vsel %vm1577_vm11, %v8070_v34, 0.0 }
 0x6eb   : > { %6393 = vpow2.f32 %v3010_v39  ;;  %3024 = vadd.xlane.f32.xlu0 %v3023_v63  ;;  %v6280_v63 = vunpack.i.l.bf16 %v8053_v52 }
 0x6ec   : > { %6010 = vmatmul.msk.f32.gmra.mxu1 %vm1352_vm9, %v7827_v18  ;;  %6395 = vpow2.f32 %v3012_v40  ;;  %v3016_v18 = vmul.f32 1.442695, %v3002_v45 }
 0x6ee   : > { %v2989_v7 = vpop.xlane.xlu2 %2988 }
 0x6ef   : > { %v3001_v44 = vsub.f32 %v8019_v28, %v2989_v7 }
 0x6f1   : > { %v8078_v6 = vpop.eup %6393  ;;  %v3014_v46 = vmul.f32 1.442695, %v3001_v44 }
 0x6f2   : > { %v3029_v50 = vsel %vm1577_vm11, %v8078_v6, 0.0  ;;  %v8087_v37 = vpop.eup %6395 }
 0x6f3   : > { %6397 = vpow2.f32 %v3014_v46  ;;  %3030 = vadd.xlane.f32.xlu1 %v3029_v50  ;;  %v3032_v3 = vsel %vm1577_vm11, %v8087_v37, 0.0 }
 0x6f4   : > { %6011 = vmatmul.msk.f32.gmra.mxu1 %vm1352_vm9, %v7847_v25  ;;  %6399 = vpow2.f32 %v3016_v18  ;;  %v3446_v25 = vpop.permute.xlu1 %3445 }
 0x6f6   : > { %v2995_v54 = vpop.xlane.xlu2 %2994 }
 0x6f7   : > { %v3003_v28 = vsub.f32 %v8024_v56, %v2995_v54 }
 0x6f9   : > { %v8090_v48 = vpop.eup %6397  ;;  %v3018_v2 = vmul.f32 1.442695, %v3003_v28  ;;  %v2067_v38 = vpop.permute.xlu0 %2066 }
 0x6fa   : > { %5981 = vmatmul.msk.f32.vlgmr.msrb.gmra.mxu0 %vm1352_vm9, %v2067_v38  ;;  %v3035_v47 = vsel %vm1577_vm11, %v8090_v48, 0.0  ;;  %v8098_v53 = vpop.eup %6399  ;;  %v6285_v38 = vunpack.i.l.bf16 %v8080_v14 }
 0x6fb   : > { %6401 = vpow2.f32 %v3018_v2  ;;  %3033 = vadd.xlane.f32.xlu1 %v3032_v3  ;;  %3036 = vadd.xlane.f32.xlu0 %v3035_v47  ;;  %v3038_v26 = vsel %vm1577_vm11, %v8098_v53, 0.0  ;;  %v1979_v3 = vpop.f32.mrf.mxu0 }
 0x6fc   : > { %6045 = vmatmul.msk.f32.vlgmr.msrb.gmra.mxu1 %vm1352_vm9, %v3446_v25  ;;  %v8112_v32 = vpop.permute.xlu1 %3475  ;;  %v2178_v47 = vmul.f32 0.17677669, %v1979_v3  ;;  %v6286_v3 = vunpack.i.h.bf16 %v8080_v14 }
 0x6fe   : > { %v6269_v56 = vpop.permute.xlu2 %6268 }
 0x6ff   : > { %v6271_v19 = vunpack.i.h.bf16 %v6269_v56  ;;  %v6270_v24 = vunpack.i.l.bf16 %v6269_v56  ;;  %v8155_v56 = vadd.f32 %v2178_v47, %v7660_v27 }
 0x701   : > { %v8102_v57 = vpop.eup %6401  ;;  %3185 = vmatpush.msra.mxu2 %v6270_v24  ;;  %3211 = vmatpush.msra.mxu3 %v6271_v19  ;;  %v2194_v19 = vsel %vm1577_vm11, %v8155_v56, -inf }
 0x702   : > { %v3041_v43 = vsel %vm1577_vm11, %v8102_v57, 0.0 }
 0x703   : > { %3237 = vmatpush.msrb.mxu2 %v6275_v4  ;;  %3263 = vmatpush.msrb.mxu3 %v6276_v31 }
 0x704   : > { %3042 = vadd.xlane.f32.xlu2 %v3041_v43  ;;  %3039 = vadd.xlane.f32.xlu0 %v3038_v26 }
 0x714   : > { %3501 = vrot.lane.b32.xlu1 %v7583_v59, %s6942_s8 }
 0x718   : > { %3473 = vrot.lane.b32.xlu0 %v7570_v22, %s6942_s8 }
 0x71c   : > { %3503 = vrot.lane.b32.xlu2 %v7576_v58, %s6942_s8  ;;  %3531 = vrot.lane.b32.xlu1 %v7591_v0, %s6942_s8 }
 0x720   : > { %3529 = vrot.lane.b32.xlu0 %v7596_v1, %s6942_s8 }
 0x723   : > { %v3022_v21 = vpop.xlane.xlu1 %3021 }
 0x724   : > { %3587 = vrot.lane.b32.xlu2 %v7619_v11, %s6942_s8  ;;  %6403 = vrcp.f32 %v3022_v21  ;;  %3559 = vrot.lane.b32.xlu1 %v7604_v5, %s6942_s8  ;;  %v3055_v1 = vand.u32 2147483648, %v3022_v21  ;;  %v3053_v60 = vand.u32 2147483647, %v3022_v21  ;;  %vm3049_vm13 = vweird.f32 %v3022_v21 }
 0x726   : > { %v3056_v49 = vor.u32 1.1754944e-38, %v3055_v1  ;;  %vm3054_vm15 = vcmp.eq.f32.partialorder %v3053_v60, 8.507059e+37 }
 0x728   : > { %3557 = vrot.lane.b32.xlu0 %v7609_v61, %s6942_s8 }
 0x729   : > { %v8126_v22 = vpop.f32.mrf.mxu1 }
 0x72a   : > { %v6404_v58 = vpop.eup %6403 }
 0x72b   : > { %v3045_v59 = vmul.f32 %v6404_v58, %v3022_v21  ;;  %vm3050_vm12 = vweird.f32 %v6404_v58 }
 0x72c   : > { %3615 = vrot.lane.b32.xlu2 %v7633_v16, %s6942_s8  ;;  %3585 = vrot.lane.b32.xlu1 %v7625_v12, %s6942_s8  ;;  %vm3051_vm14 = vmor %vm3049_vm13, %vm3050_vm12 }
 0x72d   : > { %v3046_v0 = vsub.f32 1.0, %v3045_v59 }
 0x72f   : > { %v3047_v11 = vmul.f32 %v6404_v58, %v3046_v0 }
 0x730   : > { %3613 = vrot.lane.b32.xlu0 %v7639_v17, %s6942_s8 }
 0x731   : > { %v3048_v5 = vadd.f32 %v6404_v58, %v3047_v11  ;;  %v8134_v61 = vpop.f32.mrf.mxu1 }
 0x733   : > { %v3052_v39 = vsel %vm3051_vm14, %v6404_v58, %v3048_v5 }
 0x734   : > { %3641 = vrot.lane.b32.xlu2 %v7653_v23, %s6942_s8  ;;  %v3057_v12 = vsel %vm3054_vm15, %v3056_v49, %v3052_v39  ;;  %3643 = vrot.lane.b32.xlu1 %v7648_v20, %s6942_s8 }
 0x735   : > { %v3058_v16 = vmul.f32 %v8037_v35, %v3057_v12 }
 0x737   : > { %6028 = vmatmul.msk.f32.vlgmr.msra.gmra.mxu2 %vm1577_vm11, %v3058_v16  ;;  %v3028_v17 = vpop.xlane.xlu2 %3027 }
 0x738   : > { %3289 = vmatpush.msra.mxu2 %v6280_v63  ;;  %6405 = vrcp.f32 %v3028_v17  ;;  %v3085_v23 = vand.u32 2147483648, %v3028_v17  ;;  %v3083_v20 = vand.u32 2147483647, %v3028_v17  ;;  %vm3079_vm1 = vweird.f32 %v3028_v17 }
 0x739   : > { %v8143_v40 = vpop.f32.mrf.mxu1 }
 0x73a   : > { %v3086_v35 = vor.u32 1.1754944e-38, %v3085_v23  ;;  %vm3084_vm3 = vcmp.eq.f32.partialorder %v3083_v20, 8.507059e+37 }
 0x73e   : > { %v6406_v15 = vpop.eup %6405 }
 0x73f   : > { %v3075_v7 = vmul.f32 %v6406_v15, %v3028_v17  ;;  %vm3080_vm0 = vweird.f32 %v6406_v15 }
 0x740   : > { %vm3081_vm2 = vmor %vm3079_vm1, %vm3080_vm0 }
 0x741   : > { %v3076_v44 = vsub.f32 1.0, %v3075_v7  ;;  %v8145_v45 = vpop.f32.mrf.mxu1 }
 0x743   : > { %v3077_v46 = vmul.f32 %v6406_v15, %v3076_v44  ;;  %v6281_v44 = vunpack.i.h.bf16 %v8053_v52 }
 0x745   : > { %v3078_v50 = vadd.f32 %v6406_v15, %v3077_v46 }
 0x747   : > { %v3082_v18 = vsel %vm3081_vm2, %v6406_v15, %v3078_v50 }
 0x748   : > { %v3087_v54 = vsel %vm3084_vm3, %v3086_v35, %v3082_v18 }
 0x749   : > { %v8147_v28 = vpop.f32.mrf.mxu1  ;;  %v3088_v2 = vmul.f32 %v8051_v55, %v3087_v54 }
 0x74b   : > { %6030 = vmatmul.msk.f32.vlgmr.msrb.gmra.mxu2 %vm1577_vm11, %v3088_v2 }
 0x74c   : > { %3341 = vmatpush.msrb.mxu2 %v6285_v38 }
 0x751   : > { %v8152_v25 = vpop.f32.mrf.mxu1 }
 0x759   : > { %v8159_v24 = vpop.f32.mrf.mxu1 }
 0x75a   : > { %2195 = vmax.xlane.f32.xlu0 %v2194_v19 }
 0x75e   : > { %v3025_v31 = vpop.xlane.xlu0 %3024 }
 0x75f   : > { %6407 = vrcp.f32 %v3025_v31  ;;  %v3070_v58 = vand.u32 2147483648, %v3025_v31  ;;  %v3068_v1 = vand.u32 2147483647, %v3025_v31  ;;  %vm3064_vm5 = vweird.f32 %v3025_v31 }
 0x761   : > { %v8161_v55 = vpop.f32.mrf.mxu1  ;;  %v3071_v5 = vor.u32 1.1754944e-38, %v3070_v58  ;;  %vm3069_vm7 = vcmp.eq.f32.partialorder %v3068_v1, 8.507059e+37 }
 0x765   : > { %v6408_v4 = vpop.eup %6407 }
 0x766   : > { %v3060_v43 = vmul.f32 %v6408_v4, %v3025_v31  ;;  %v3031_v26 = vpop.xlane.xlu1 %3030  ;;  %vm3065_vm4 = vweird.f32 %v6408_v4 }
 0x767   : > { %6409 = vrcp.f32 %v3031_v26  ;;  %vm3066_vm6 = vmor %vm3064_vm5, %vm3065_vm4  ;;  %v3100_v46 = vand.u32 2147483648, %v3031_v26  ;;  %vm3094_vm10 = vweird.f32 %v3031_v26  ;;  %v3098_v50 = vand.u32 2147483647, %v3031_v26 }
 0x768   : > { %v3061_v21 = vsub.f32 1.0, %v3060_v43 }
 0x769   : > { %v8163_v59 = vpop.f32.mrf.mxu1  ;;  %v3101_v47 = vor.u32 1.1754944e-38, %v3100_v46  ;;  %vm3099_vm13 = vcmp.eq.f32.partialorder %v3098_v50, 8.507059e+37 }
 0x76a   : > { %v3062_v0 = vmul.f32 %v6408_v4, %v3061_v21 }
 0x76c   : > { %v3063_v11 = vadd.f32 %v6408_v4, %v3062_v0 }
 0x76d   : > { %v6410_v60 = vpop.eup %6409 }
 0x76e   : > { %v3067_v49 = vsel %vm3066_vm6, %v6408_v4, %v3063_v11  ;;  %v3090_v39 = vmul.f32 %v6410_v60, %v3031_v26  ;;  %v3034_v12 = vpop.xlane.xlu1 %3033  ;;  %v3037_v16 = vpop.xlane.xlu0 %3036  ;;  %vm3095_vm8 = vweird.f32 %v6410_v60 }
 0x76f   : > { %v3072_v63 = vsel %vm3069_vm7, %v3071_v5, %v3067_v49  ;;  %6411 = vrcp.f32 %v3034_v12  ;;  %vm8170_vm12 = vmor %vm3094_vm10, %vm3095_vm8  ;;  %vm3109_vm14 = vweird.f32 %v3034_v12  ;;  %v3113_v4 = vand.u32 2147483647, %v3034_v12 }
 0x770   : > { %v3091_v17 = vsub.f32 1.0, %v3090_v39  ;;  %6413 = vrcp.f32 %v3037_v16  ;;  %v3073_v7 = vmul.f32 %v8070_v34, %v3072_v63  ;;  %v3115_v21 = vand.u32 2147483648, %v3034_v12 }
 0x771   : > { %v8165_v15 = vpop.f32.mrf.mxu1  ;;  %v3128_v11 = vand.u32 2147483647, %v3037_v16  ;;  %vm8183_vm1 = vcmp.eq.f32.partialorder %v3113_v4, 8.507059e+37  ;;  %vm3124_vm2 = vweird.f32 %v3037_v16 }
 0x772   : > { %v3092_v23 = vmul.f32 %v6410_v60, %v3091_v17  ;;  %6029 = vmatmul.msk.f32.vlgmr.msra.gmra.mxu3 %vm1577_vm11, %v3073_v7 }
 0x773   : > { %3315 = vmatpush.msra.mxu3 %v6281_v44  ;;  %v3116_v44 = vor.u32 1.1754944e-38, %v3115_v21  ;;  %vm3129_vm5 = vcmp.eq.f32.partialorder %v3128_v11, 8.507059e+37 }
 0x774   : > { %v3093_v20 = vadd.f32 %v6410_v60, %v3092_v23 }
 0x775   : > { %v6412_v35 = vpop.eup %6411 }
 0x776   : > { %v6414_v54 = vpop.eup %6413  ;;  %v3097_v34 = vsel %vm8170_vm12, %v6410_v60, %v3093_v20  ;;  %v3105_v2 = vmul.f32 %v6412_v35, %v3034_v12  ;;  %vm3110_vm15 = vweird.f32 %v6412_v35  ;;  %v3130_v60 = vand.u32 2147483648, %v3037_v16 }
 0x777   : > { %v8176_v52 = vpop.xlane.xlu2 %3042  ;;  %v8178_v38 = vpop.xlane.xlu0 %3039  ;;  %v3120_v19 = vmul.f32 %v6414_v54, %v3037_v16  ;;  %v3102_v26 = vsel %vm3099_vm13, %v3101_v47, %v3097_v34  ;;  %vm3125_vm0 = vweird.f32 %v6414_v54  ;;  %vm3111_vm3 = vmor %vm3109_vm14, %vm3110_vm15 }
 0x778   : > { %6415 = vrcp.f32 %v8176_v52  ;;  %v3106_v31 = vsub.f32 1.0, %v3105_v2  ;;  %v2091_v43 = vpop.f32.mrf.mxu0  ;;  %v3103_v17 = vmul.f32 %v8078_v6, %v3102_v26  ;;  %vm3126_vm4 = vmor %vm3124_vm2, %vm3125_vm0  ;;  %v3131_v18 = vor.u32 1.1754944e-38, %v3130_v60 }
 0x779   : > { %v3121_v58 = vsub.f32 1.0, %v3120_v19  ;;  %6417 = vrcp.f32 %v8178_v38  ;;  %v3470_v0 = vpop.f32.mrf.mxu1  ;;  %v2182_v5 = vmul.f32 0.17677669, %v2091_v43  ;;  %v3158_v43 = vand.u32 2147483647, %v8176_v52 }
 0x77a   : > { %v3107_v1 = vmul.f32 %v6412_v35, %v3106_v31  ;;  %v3669_v49 = vmul.f32 0.17677669, %v3470_v0  ;;  %6031 = vmatmul.msk.f32.vlgmr.msrb.gmra.mxu3 %vm1577_vm11, %v3103_v17  ;;  %v3160_v26 = vand.u32 2147483648, %v8176_v52  ;;  %vm3154_vm7 = vweird.f32 %v8176_v52 }
 0x77b   : > { %v3122_v14 = vmul.f32 %v6414_v54, %v3121_v58  ;;  %v8190_v46 = vadd.f32 %v2182_v5, %v7660_v27  ;;  %3367 = vmatpush.msrb.mxu3 %v6286_v3  ;;  %v3145_v0 = vand.u32 2147483648, %v8178_v38  ;;  %v3143_v60 = vand.u32 2147483647, %v8178_v38 }
 0x77c   : > { %v3108_v39 = vadd.f32 %v6412_v35, %v3107_v1  ;;  %v8193_v20 = vadd.f32 %v3669_v49, %v7660_v27  ;;  %vm3159_vm12 = vcmp.eq.f32.partialorder %v3158_v43, 8.507059e+37  ;;  %vm3139_vm13 = vweird.f32 %v8178_v38 }
 0x77d   : > { %v3123_v23 = vadd.f32 %v6414_v54, %v3122_v14  ;;  %v2206_v47 = vsel %vm1577_vm11, %v8190_v46, -inf  ;;  %vm3144_vm15 = vcmp.eq.f32.partialorder %v3143_v60, 8.507059e+37 }
 0x77e   : > { %v6416_v7 = vpop.eup %6415  ;;  %v3112_v50 = vsel %vm3111_vm3, %v6412_v35, %v3108_v39  ;;  %v3685_v35 = vsel %vm1577_vm11, %v8193_v20, -inf  ;;  %2207 = vmax.xlane.f32.xlu1 %v2206_v47  ;;  %v3146_v39 = vor.u32 1.1754944e-38, %v3145_v0 }
 0x77f   : > { %v3150_v34 = vmul.f32 %v6416_v7, %v8176_v52  ;;  %v3504_v6 = vpop.permute.xlu2 %3503  ;;  %v6418_v16 = vpop.eup %6417  ;;  %v3117_v12 = vsel %vm8183_vm1, %v3116_v44, %v3112_v50  ;;  %v3127_v2 = vsel %vm3126_vm4, %v6414_v54, %v3123_v23  ;;  %3686 = vmax.xlane.f32.xlu0 %v3685_v35  ;;  %vm3155_vm6 = vweird.f32 %v6416_v7 }
 0x780   : > { %v3132_v19 = vsel %vm3129_vm5, %v3131_v18, %v3127_v2  ;;  %v3135_v4 = vmul.f32 %v6418_v16, %v8178_v38  ;;  %v3118_v21 = vmul.f32 %v8087_v37, %v3117_v12  ;;  %vm3140_vm8 = vweird.f32 %v6418_v16  ;;  %vm3156_vm10 = vmor %vm3154_vm7, %vm3155_vm6 }
 0x781   : > { %v3151_v31 = vsub.f32 1.0, %v3150_v34  ;;  %v3133_v54 = vmul.f32 %v8090_v48, %v3132_v19  ;;  %v3161_v37 = vor.u32 1.1754944e-38, %v3160_v26  ;;  %vm3141_vm14 = vmor %vm3139_vm13, %vm3140_vm8 }
 0x782   : > { %v3136_v58 = vsub.f32 1.0, %v3135_v4  ;;  %6032 = vmatmul.msk.f32.vlgmr.msra.gmra.mxu2 %vm1577_vm11, %v3118_v21 }
 0x783   : > { %v3152_v3 = vmul.f32 %v6416_v7, %v3151_v31  ;;  %6046 = vmatpush.xpose.msk.msra.mxu2 %vm1352_vm9, %v8112_v32  ;;  %6033 = vmatmul.msk.f32.vlgmr.msra.gmra.mxu3 %vm1577_vm11, %v3133_v54 }
 0x784   : > { %v3137_v11 = vmul.f32 %v6418_v16, %v3136_v58  ;;  %6048 = vmatpush.xpose.msk.msra.mxu3 %vm1352_vm9, %v3504_v6 }
 0x785   : > { %v3153_v1 = vadd.f32 %v6416_v7, %v3152_v3 }
 0x786   : > { %v3138_v14 = vadd.f32 %v6418_v16, %v3137_v11  ;;  %v3502_v5 = vpop.permute.xlu1 %3501 }
 0x787   : > { %v3157_v48 = vsel %vm3156_vm10, %v6416_v7, %v3153_v1  ;;  %v3588_v52 = vpop.permute.xlu2 %3587 }
 0x788   : > { %v3162_v49 = vsel %vm3159_vm12, %v3161_v37, %v3157_v48  ;;  %v3142_v63 = vsel %vm3141_vm14, %v6418_v16, %v3138_v14 }
 0x789   : > { %v3147_v17 = vsel %vm3144_vm15, %v3146_v39, %v3142_v63  ;;  %v3163_v44 = vmul.f32 %v8102_v57, %v3162_v49  ;;  %v6287_v57 = vpack.i.bf16 %v7775_v41, %v7663_v29 }
 0x78a   : > { %v3474_v32 = vpop.permute.xlu0 %3473  ;;  %v3148_v7 = vmul.f32 %v8098_v53, %v3147_v17 }
 0x78b   : > { %6035 = vmatmul.msk.f32.vlgmr.msrb.gmra.mxu3 %vm1577_vm11, %v3163_v44 }
 0x78c   : > { %6034 = vmatmul.msk.f32.vlgmr.msrb.gmra.mxu2 %vm1577_vm11, %v3148_v7  ;;  %6054 = vmatpush.xpose.msk.msrb.mxu3 %vm1352_vm9, %v3588_v52 }
 0x78e   : > { %v3532_v23 = vpop.permute.xlu1 %3531 }
 0x78f   : > { %v3616_v38 = vpop.permute.xlu2 %3615  ;;  %6050 = vmatpush.xpose.msk.msra.mxu1 %vm1352_vm9, %v3532_v23 }
 0x792   : > { %v3530_v50 = vpop.permute.xlu0 %3529 }
 0x793   : > { %6056 = vmatpush.xpose.msk.msrb.mxu1 %vm1352_vm9, %v3616_v38  ;;  %6288 = vrot.lane.b32.xlu0 %v6287_v57, %s6939_s11 }
 0x794   : > { %6051 = vmatmul.msk.f32.vlgmr.msra.gmra.mxu1 %vm1352_vm9, %v3530_v50  ;;  %6047 = vmatmul.msk.f32.vlgmr.msra.gmra.mxu2 %vm1352_vm9, %v3474_v32 }
 0x795   : > { %6049 = vmatmul.msk.f32.vlgmr.msra.gmra.mxu3 %vm1352_vm9, %v3502_v5 }
 0x796   : > { %v3560_v53 = vpop.permute.xlu1 %3559 }
 0x797   : > { %6052 = vmatpush.xpose.msk.msrb.mxu2 %vm1352_vm9, %v3560_v53  ;;  %v3642_v29 = vpop.permute.xlu2 %3641 }
 0x79a   : > { %v3558_v18 = vpop.permute.xlu0 %3557 }
 0x79c   : > { %6053 = vmatmul.msk.f32.vlgmr.msrb.gmra.mxu2 %vm1352_vm9, %v3558_v18 }
 0x79e   : > { %v3586_v34 = vpop.permute.xlu1 %3585 }
 0x79f   : > { %6055 = vmatmul.msk.f32.vlgmr.msrb.gmra.mxu3 %vm1352_vm9, %v3586_v34 }
 0x7a2   : > { %v3614_v6 = vpop.permute.xlu0 %3613 }
 0x7a3   : > { %6057 = vmatmul.msk.f32.vlgmr.msrb.gmra.mxu1 %vm1352_vm9, %v3614_v6 }
 0x7a6   : > { %v3644_v16 = vpop.permute.xlu1 %3643 }
 0x7a7   : > { %6058 = vmatpush.xpose.msk.msra.mxu2 %vm1352_vm9, %v3644_v16 }
 0x7aa   : > { %6059 = vmatmul.msk.f32.vlgmr.msra.gmra.mxu2 %vm1352_vm9, %v3642_v29 }
 0x7ba   : > { %v8243_v21 = vpop.f32.mrf.mxu2 }
 0x7cd   : > { %v2196_v41 = vpop.xlane.xlu0 %2195 }
 0x7ce   : > { %v2218_v12 = vsub.f32 %v8155_v56, %v2196_v41  ;;  %v8249_v58 = vpop.f32.mrf.mxu2 }
 0x7d0   : > { %v2226_v2 = vmul.f32 1.442695, %v2218_v12 }
 0x7d2   : > { %6419 = vpow2.f32 %v2226_v2 }
 0x7d8   : > { %v8237_v47 = vpop.eup %6419 }
 0x7d9   : > { %v2242_v35 = vsel %vm1577_vm11, %v8237_v47, 0.0 }
 0x7da   : > { %2243 = vadd.xlane.f32.xlu2 %v2242_v35 }
 0x7f1   : > { %v2208_v19 = vpop.xlane.xlu1 %2207 }
 0x7f2   : > { %v3687_v31 = vpop.xlane.xlu0 %3686  ;;  %v2222_v4 = vsub.f32 %v8190_v46, %v2208_v19 }
 0x7f3   : > { %v3709_v26 = vsub.f32 %v8193_v20, %v3687_v31 }
 0x7f4   : > { %v2234_v43 = vmul.f32 1.442695, %v2222_v4 }
 0x7f5   : > { %v8245_v54 = vpop.f32.mrf.mxu3  ;;  %v3717_v56 = vmul.f32 1.442695, %v3709_v26 }
 0x7f6   : > { %6421 = vpow2.f32 %v2234_v43 }
 0x7f7   : > { %6423 = vpow2.f32 %v3717_v56 }
 0x7fc   : > { %v8247_v3 = vpop.eup %6421 }
 0x7fd   : > { %v2254_v0 = vsel %vm1577_vm11, %v8247_v3, 0.0  ;;  %v8253_v1 = vpop.f32.mrf.mxu3  ;;  %v8255_v46 = vpop.eup %6423 }
 0x7fe   : > { %2255 = vadd.xlane.f32.xlu1 %v2254_v0  ;;  %v3733_v60 = vsel %vm1577_vm11, %v8255_v46, 0.0 }
 0x805   : > { %v6289_v20 = vpop.permute.xlu0 %6288  ;;  %v8257_v11 = vpop.f32.mrf.mxu2 }
 0x806   : > { %v6291_v37 = vunpack.i.h.bf16 %v6289_v20  ;;  %v6290_v48 = vunpack.i.l.bf16 %v6289_v20  ;;  %3734 = vadd.xlane.f32.xlu1 %v3733_v60  ;;  %v8261_v14 = vpop.f32.mrf.mxu3 }
 0x808   : > { %2408 = vmatpush.msra.mxu0 %v6290_v48 }
 0x80a   : > { %2516 = vmatpush.msrb.mxu0 %v6291_v37 }
 0x80e   : > { %v8265_v39 = vpop.f32.mrf.mxu3 }
 0x80f   : > { %v8263_v49 = vpop.f32.mrf.mxu2 }
 0x811   : > { %v3554_v52 = vpop.f32.mrf.mxu1 }
 0x812   : > { %v3672_v5 = vmul.f32 0.17677669, %v3554_v52 }
 0x814   : > { %v8268_v63 = vadd.f32 %v3672_v5, %v7660_v27 }
 0x816   : > { %v3694_v17 = vsel %vm1577_vm11, %v8268_v63, -inf }
 0x817   : > { %3695 = vmax.xlane.f32.xlu2 %v3694_v17  ;;  %v3498_v7 = vpop.f32.mrf.mxu2 }
 0x818   : > { %v3526_v32 = vpop.f32.mrf.mxu3  ;;  %v3670_v6 = vmul.f32 0.17677669, %v3498_v7 }
 0x819   : > { %v3671_v44 = vmul.f32 0.17677669, %v3526_v32 }
 0x81a   : > { %v8288_v2 = vadd.f32 %v3670_v6, %v7660_v27 }
 0x81b   : > { %v8273_v38 = vadd.f32 %v3671_v44, %v7660_v27 }
 0x81c   : > { %v3688_v19 = vsel %vm1577_vm11, %v8288_v2, -inf }
 0x81d   : > { %v3691_v23 = vsel %vm1577_vm11, %v8273_v38, -inf }
 0x81e   : > { %3692 = vmax.xlane.f32.xlu1 %v3691_v23 }
 0x81f   : > { %v3582_v29 = vpop.f32.mrf.mxu2 }
 0x820   : > { %v3638_v50 = vpop.f32.mrf.mxu1  ;;  %v3673_v35 = vmul.f32 0.17677669, %v3582_v29 }
 0x821   : > { %v3675_v57 = vmul.f32 0.17677669, %v3638_v50 }
 0x822   : > { %v3610_v53 = vpop.f32.mrf.mxu3  ;;  %v8296_v26 = vadd.f32 %v3673_v35, %v7660_v27 }
 0x823   : > { %v8278_v18 = vadd.f32 %v3675_v57, %v7660_v27  ;;  %v3674_v34 = vmul.f32 0.17677669, %v3610_v53 }
 0x824   : > { %v3697_v0 = vsel %vm1577_vm11, %v8296_v26, -inf }
 0x825   : > { %v3703_v16 = vsel %vm1577_vm11, %v8278_v18, -inf  ;;  %v8283_v41 = vadd.f32 %v3674_v34, %v7660_v27 }
 0x826   : > { %3704 = vmax.xlane.f32.xlu2 %v3703_v16 }
 0x827   : > { %v3700_v12 = vsel %vm1577_vm11, %v8283_v41, -inf }
 0x828   : > { %3701 = vmax.xlane.f32.xlu1 %v3700_v12 }
 0x82d   : > { %v3666_v31 = vpop.f32.mrf.mxu2 }
 0x82e   : > { %3689 = vmax.xlane.f32.xlu2 %v3688_v19  ;;  %v3676_v4 = vmul.f32 0.17677669, %v3666_v31 }
 0x830   : > { %v8293_v43 = vadd.f32 %v3676_v4, %v7660_v27 }
 0x832   : > { %v3706_v56 = vsel %vm1577_vm11, %v8293_v43, -inf }
 0x833   : > { %3707 = vmax.xlane.f32.xlu0 %v3706_v56 }
 0x836   : > { %3698 = vmax.xlane.f32.xlu2 %v3697_v0 }
 0x84d   : > { %v2244_v20 = vpop.xlane.xlu2 %2243 }
 0x84e   : > { %6425 = vrcp.f32 %v2244_v20  ;;  %v2277_v52 = vand.u32 2147483648, %v2244_v20  ;;  %v2275_v17 = vand.u32 2147483647, %v2244_v20  ;;  %vm2271_vm1 = vweird.f32 %v2244_v20 }
 0x850   : > { %v2278_v27 = vor.u32 1.1754944e-38, %v2277_v52  ;;  %vm2276_vm3 = vcmp.eq.f32.partialorder %v2275_v17, 8.507059e+37 }
 0x854   : > { %v6426_v60 = vpop.eup %6425 }
 0x855   : > { %v2267_v37 = vmul.f32 %v6426_v60, %v2244_v20  ;;  %vm2272_vm0 = vweird.f32 %v6426_v60 }
 0x856   : > { %vm2273_vm2 = vmor %vm2271_vm1, %vm2272_vm0 }
 0x857   : > { %v2268_v48 = vsub.f32 1.0, %v2267_v37 }
 0x859   : > { %v2269_v5 = vmul.f32 %v6426_v60, %v2268_v48 }
 0x85b   : > { %v2270_v32 = vadd.f32 %v6426_v60, %v2269_v5 }
 0x85d   : > { %v2274_v44 = vsel %vm2273_vm2, %v6426_v60, %v2270_v32 }
 0x85e   : > { %v2279_v7 = vsel %vm2276_vm3, %v2278_v27, %v2274_v44 }
 0x85f   : > { %v2280_v23 = vmul.f32 %v8237_v47, %v2279_v7 }
 0x861   : > { %5988 = vmatmul.msk.f32.vlgmr.msra.gmra.mxu0 %vm1577_vm11, %v2280_v23 }
 0x871   : > { %v2256_v50 = vpop.xlane.xlu1 %2255 }
 0x872   : > { %6427 = vrcp.f32 %v2256_v50  ;;  %v2337_v6 = vand.u32 2147483648, %v2256_v50  ;;  %v2335_v29 = vand.u32 2147483647, %v2256_v50  ;;  %vm2331_vm5 = vweird.f32 %v2256_v50 }
 0x874   : > { %v2338_v35 = vor.u32 1.1754944e-38, %v2337_v6  ;;  %vm2336_vm7 = vcmp.eq.f32.partialorder %v2335_v29, 8.507059e+37 }
 0x878   : > { %v6428_v57 = vpop.eup %6427 }
 0x879   : > { %v2327_v53 = vmul.f32 %v6428_v57, %v2256_v50  ;;  %vm2332_vm4 = vweird.f32 %v6428_v57  ;;  %v8307_v0 = vpop.xlane.xlu1 %3734  ;;  %v1343_v50 = vld [vmem:[%s7275_s29 + $0x38] sm:$0xff] }
 0x87a   : > { %vm2333_vm6 = vmor %vm2331_vm5, %vm2332_vm4  ;;  %2638 = vmatpush.msra.mxu0 %v1343_v50  ;;  %vm3762_vm10 = vweird.f32 %v8307_v0 }
 0x87b   : > { %v2328_v34 = vsub.f32 1.0, %v2327_v53 }
 0x87d   : > { %v2329_v16 = vmul.f32 %v6428_v57, %v2328_v34  ;;  %v1341_v34 = vld [vmem:[%s7275_s29 + $0x28] sm:$0xff] }
 0x87f   : > { %v2330_v12 = vadd.f32 %v6428_v57, %v2329_v16  ;;  %v1340_v16 = vld [vmem:[%s7275_s29 + $0x20] sm:$0xff] }
 0x881   : > { %v2334_v19 = vsel %vm2333_vm6, %v6428_v57, %v2330_v12  ;;  %v1342_v57 = vld [vmem:[%s7275_s29 + $0x30] sm:$0xff] }
 0x882   : > { %v2339_v31 = vsel %vm2336_vm7, %v2338_v35, %v2334_v19  ;;  %2639 = vmatpush.msra.mxu0 %v1342_v57  ;;  %v3768_v57 = vand.u32 2147483648, %v8307_v0 }
 0x883   : > { %v2340_v47 = vmul.f32 %v8247_v3, %v2339_v31 }
 0x884   : > { %2640 = vmatpush.msra.mxu0 %v1341_v34 }
 0x885   : > { %5992 = vmatmul.msk.f32.vlgmr.msrb.gmra.mxu0 %vm1577_vm11, %v2340_v47 }
 0x886   : > { %2641 = vmatpush.msra.mxu0 %v1340_v16 }
 0x88a   : > { %v3696_v4 = vpop.xlane.xlu2 %3695 }
 0x88b   : > { %v3712_v56 = vsub.f32 %v8268_v63, %v3696_v4 }
 0x88d   : > { %v3723_v20 = vmul.f32 1.442695, %v3712_v56 }
 0x88f   : > { %6429 = vpow2.f32 %v3723_v20 }
 0x891   : > { %v3693_v60 = vpop.xlane.xlu1 %3692 }
 0x892   : > { %v3711_v48 = vsub.f32 %v8273_v38, %v3693_v60  ;;  %v1347_v60 = vld [vmem:[%s7275_s29 + $0x58] sm:$0xff] }
 0x893   : > { %3408 = vmatpush.msrb.mxu0 %v1347_v60 }
 0x894   : > { %v3721_v5 = vmul.f32 1.442695, %v3711_v48  ;;  %v1346_v48 = vld [vmem:[%s7275_s29 + $0x50] sm:$0xff] }
 0x895   : > { %v8309_v37 = vpop.eup %6429  ;;  %3409 = vmatpush.msrb.mxu0 %v1346_v48 }
 0x896   : > { %v3742_v52 = vsel %vm1577_vm11, %v8309_v37, 0.0  ;;  %6431 = vpow2.f32 %v3721_v5  ;;  %v1344_v5 = vld [vmem:[%s7275_s29 + $0x40] sm:$0xff] }
 0x897   : > { %3743 = vadd.xlane.f32.xlu1 %v3742_v52 }
 0x899   : > { %v3705_v3 = vpop.xlane.xlu2 %3704 }
 0x89a   : > { %v3715_v29 = vsub.f32 %v8278_v18, %v3705_v3 }
 0x89b   : > { %v3702_v17 = vpop.xlane.xlu1 %3701 }
 0x89c   : > { %v3714_v63 = vsub.f32 %v8283_v41, %v3702_v17  ;;  %v8315_v32 = vpop.eup %6431  ;;  %v3729_v35 = vmul.f32 1.442695, %v3715_v29  ;;  %v3769_v29 = vor.u32 1.1754944e-38, %v3768_v57 }
 0x89d   : > { %v3739_v44 = vsel %vm1577_vm11, %v8315_v32, 0.0 }
 0x89e   : > { %v3727_v27 = vmul.f32 1.442695, %v3714_v63 }
 0x89f   : > { %3740 = vadd.xlane.f32.xlu1 %v3739_v44 }
 0x8a0   : > { %6433 = vpow2.f32 %v3727_v27 }
 0x8a1   : > { %v3690_v38 = vpop.xlane.xlu2 %3689 }
 0x8a2   : > { %v3710_v7 = vsub.f32 %v8288_v2, %v3690_v38 }
 0x8a4   : > { %v3719_v23 = vmul.f32 1.442695, %v3710_v7 }
 0x8a6   : > { %6435 = vpow2.f32 %v3719_v23  ;;  %v8322_v53 = vpop.eup %6433  ;;  %v3708_v12 = vpop.xlane.xlu0 %3707 }
 0x8a7   : > { %v3748_v41 = vsel %vm1577_vm11, %v8322_v53, 0.0  ;;  %v3716_v19 = vsub.f32 %v8293_v43, %v3708_v12  ;;  %6437 = vpow2.f32 %v3729_v35 }
 0x8a8   : > { %3749 = vadd.xlane.f32.xlu0 %v3748_v41 }
 0x8a9   : > { %v3731_v31 = vmul.f32 1.442695, %v3716_v19  ;;  %v3699_v47 = vpop.xlane.xlu2 %3698 }
 0x8ab   : > { %6439 = vpow2.f32 %v3731_v31 }
 0x8ac   : > { %v8327_v6 = vpop.eup %6435 }
 0x8ad   : > { %v3736_v2 = vsel %vm1577_vm11, %v8327_v6, 0.0  ;;  %v8341_v56 = vpop.eup %6437 }
 0x8ae   : > { %3737 = vadd.xlane.f32.xlu2 %v3736_v2 }
 0x8b1   : > { %v8346_v18 = vpop.eup %6439 }
 0x8b2   : > { %v3754_v43 = vsel %vm1577_vm11, %v8346_v18, 0.0 }
 0x8b8   : > { %6298 = vrot.lane.b32.xlu1 %v7749_v9, %s6942_s8  ;;  %v3713_v9 = vsub.f32 %v8296_v26, %v3699_v47 }
 0x8bc   : > { %6303 = vrot.lane.b32.xlu0 %v7982_v51, %s6942_s8  ;;  %v3725_v51 = vmul.f32 1.442695, %v3713_v9 }
 0x8be   : > { %6441 = vpow2.f32 %v3725_v51 }
 0x8bf   : > { %6443 = vrcp.f32 %v8307_v0 }
 0x8c4   : > { %v8352_v26 = vpop.eup %6441 }
 0x8c5   : > { %v3745_v20 = vsel %vm1577_vm11, %v8352_v26, 0.0 }
 0x8c6   : > { %6293 = vrot.lane.b32.xlu2 %v7675_v36, %s6942_s8  ;;  %v3751_v36 = vsel %vm1577_vm11, %v8341_v56, 0.0 }
 0x8de   : > { %v2410_v4 = vpop.f32.mrf.mxu0 }
 0x8df   : > { %5996 = vmatmul.msk.f32.vlgmr.msra.gmra.mxu0 %vm1352_vm9, %v2410_v4 }
 0x8e2   : > { %3752 = vadd.xlane.f32.xlu1 %v3751_v36 }
 0x8e6   : > { %3755 = vadd.xlane.f32.xlu0 %v3754_v43 }
 0x8e7   : > { %5997 = vmatmul.msk.f32.gmra.mxu0 %vm1352_vm9, %v8126_v22  ;;  %v1345_v22 = vld [vmem:[%s7275_s29 + $0x48] sm:$0xff] }
 0x8e8   : > { %3410 = vmatpush.msrb.mxu0 %v1345_v22 }
 0x8ea   : > { %3411 = vmatpush.msrb.mxu0 %v1344_v5 }
 0x8ef   : > { %3746 = vadd.xlane.f32.xlu2 %v3745_v20  ;;  %5998 = vmatmul.msk.f32.gmra.mxu0 %vm1352_vm9, %v7955_v33 }
 0x8f7   : > { %5999 = vmatmul.msk.f32.gmra.mxu0 %vm1352_vm9, %v7991_v62  ;;  %v6444_v62 = vpop.eup %6443 }
 0x8f8   : > { %vm3763_vm8 = vweird.f32 %v6444_v62 }
 0x8f9   : > { %vm3764_vm12 = vmor %vm3762_vm10, %vm3763_vm8 }
 0x8fb   : > { %4059 = vrot.lane.b32.xlu1 %v7790_v10, %s6942_s8  ;;  %v3758_v10 = vmul.f32 %v6444_v62, %v8307_v0 }
 0x8fd   : > { %v3759_v17 = vsub.f32 1.0, %v3758_v10 }
 0x902   : > { %v2518_v52 = vpop.f32.mrf.mxu0 }
 0x903   : > { %6000 = vmatmul.msk.f32.gmra.mxu0 %vm1352_vm9, %v2518_v52 }
 0x907   : > { %4033 = vrot.lane.b32.xlu2 %v7630_v13, %s6942_s8  ;;  %v3760_v13 = vmul.f32 %v6444_v62, %v3759_v17 }
 0x909   : > { %v3761_v7 = vadd.f32 %v6444_v62, %v3760_v13 }
 0x90a   : > { %v8370_v33 = vpop.xlane.xlu1 %3743 }
 0x90b   : > { %6001 = vmatmul.msk.f32.gmra.mxu0 %vm1352_vm9, %v8134_v61  ;;  %6445 = vrcp.f32 %v8370_v33  ;;  %v3765_v34 = vsel %vm3764_vm12, %v6444_v62, %v3761_v7  ;;  %v3813_v19 = vand.u32 2147483648, %v8370_v33  ;;  %vm3807_vm2 = vweird.f32 %v8370_v33 }
 0x90c   : > { %v3811_v48 = vand.u32 2147483647, %v8370_v33 }
 0x90d   : > { %v3814_v5 = vor.u32 1.1754944e-38, %v3813_v19 }
 0x90e   : > { %vm3812_vm8 = vcmp.eq.f32.partialorder %v3811_v48, 8.507059e+37 }
 0x911   : > { %v8376_v63 = vpop.eup %6445 }
 0x912   : > { %v3741_v3 = vpop.xlane.xlu1 %3740  ;;  %v3803_v27 = vmul.f32 %v8376_v63, %v8370_v33  ;;  %vm3808_vm15 = vweird.f32 %v8376_v63 }
 0x913   : > { %6447 = vrcp.f32 %v3741_v3  ;;  %6002 = vmatmul.msk.f32.gmra.mxu0 %vm1352_vm9, %v7961_v42  ;;  %v3766_v42 = vand.u32 2147483647, %v8307_v0  ;;  %v3798_v31 = vand.u32 2147483648, %v3741_v3  ;;  %vm3792_vm0 = vweird.f32 %v3741_v3  ;;  %vm8411_vm3 = vmor %vm3807_vm2, %vm3808_vm15 }
 0x914   : > { %v3804_v23 = vsub.f32 1.0, %v3803_v27  ;;  %v3796_v9 = vand.u32 2147483647, %v3741_v3 }
 0x915   : > { %vm3767_vm13 = vcmp.eq.f32.partialorder %v3766_v42, 8.507059e+37  ;;  %v3799_v22 = vor.u32 1.1754944e-38, %v3798_v31 }
 0x916   : > { %v3805_v2 = vmul.f32 %v8376_v63, %v3804_v23  ;;  %vm3797_vm4 = vcmp.eq.f32.partialorder %v3796_v9, 8.507059e+37 }
 0x918   : > { %v3806_v47 = vadd.f32 %v8376_v63, %v3805_v2 }
 0x919   : > { %v6448_v44 = vpop.eup %6447 }
 0x91a   : > { %v3788_v38 = vmul.f32 %v6448_v44, %v3741_v3  ;;  %vm3793_vm14 = vweird.f32 %v6448_v44 }
 0x91b   : > { %v8382_v61 = vpop.xlane.xlu0 %3749  ;;  %6003 = vmatmul.msk.f32.gmra.mxu0 %vm1352_vm9, %v7995_v8  ;;  %v3770_v8 = vsel %vm3767_vm13, %v3769_v29, %v3765_v34  ;;  %vm8401_vm1 = vmor %vm3792_vm0, %vm3793_vm14 }
 0x91c   : > { %v3789_v50 = vsub.f32 1.0, %v3788_v38  ;;  %6449 = vrcp.f32 %v8382_v61  ;;  %v3771_v20 = vmul.f32 %v8255_v46, %v3770_v8  ;;  %vm3837_vm5 = vweird.f32 %v8382_v61 }
 0x91d   : > { %v3841_v33 = vand.u32 2147483647, %v8382_v61 }
 0x91e   : > { %v3790_v41 = vmul.f32 %v6448_v44, %v3789_v50 }
 0x91f   : > { %vm3842_vm14 = vcmp.eq.f32.partialorder %v3841_v33, 8.507059e+37 }
 0x920   : > { %v3791_v35 = vadd.f32 %v6448_v44, %v3790_v41  ;;  %v1351_v41 = vld [vmem:[%s7275_s29 + $0x78] sm:$0xff] }
 0x921   : > { %v8391_v16 = vpop.xlane.xlu2 %3737 }
 0x922   : > { %6451 = vrcp.f32 %v8391_v16  ;;  %v8394_v12 = vpop.eup %6449  ;;  %v3795_v36 = vsel %vm8401_vm1, %v6448_v44, %v3791_v35  ;;  %v3783_v38 = vand.u32 2147483648, %v8391_v16  ;;  %v3781_v57 = vand.u32 2147483647, %v8391_v16 }
 0x923   : > { %v3833_v0 = vmul.f32 %v8394_v12, %v8382_v61  ;;  %6036 = vmatmul.msk.f32.vlgmr.msrb.gmra.mxu0 %vm1352_vm9, %v8243_v21  ;;  %v3810_v21 = vsel %vm8411_vm3, %v8376_v63, %v3806_v47  ;;  %v3800_v3 = vsel %vm3797_vm4, %v3799_v22, %v3795_v36  ;;  %vm3838_vm6 = vweird.f32 %v8394_v12 }
 0x924   : > { %v3843_v63 = vand.u32 2147483648, %v8382_v61  ;;  %v3801_v42 = vmul.f32 %v8315_v32, %v3800_v3  ;;  %vm8434_vm10 = vmor %vm3837_vm5, %vm3838_vm6  ;;  %v3815_v34 = vsel %vm3812_vm8, %v3814_v5, %v3810_v21  ;;  %vm3777_vm12 = vweird.f32 %v8391_v16 }
 0x925   : > { %v3834_v51 = vsub.f32 1.0, %v3833_v0  ;;  %v3784_v35 = vor.u32 1.1754944e-38, %v3783_v38  ;;  %vm3782_vm15 = vcmp.eq.f32.partialorder %v3781_v57, 8.507059e+37 }
 0x926   : > { %v3844_v61 = vor.u32 1.1754944e-38, %v3843_v63 }
 0x927   : > { %v3835_v52 = vmul.f32 %v8394_v12, %v3834_v51 }
 0x928   : > { %v6452_v43 = vpop.eup %6451 }
 0x929   : > { %v3773_v62 = vmul.f32 %v6452_v43, %v8391_v16  ;;  %v6294_v10 = vpop.permute.xlu2 %6293  ;;  %v3836_v13 = vadd.f32 %v8394_v12, %v3835_v52  ;;  %vm3778_vm7 = vweird.f32 %v6452_v43 }
 0x92a   : > { %v6296_v46 = vunpack.i.h.bf16 %v6294_v10  ;;  %v6295_v17 = vunpack.i.l.bf16 %v6294_v10  ;;  %v6299_v44 = vpop.permute.xlu1 %6298  ;;  %vm3779_vm13 = vmor %vm3777_vm12, %vm3778_vm7 }
 0x92b   : > { %v3774_v27 = vsub.f32 1.0, %v3773_v62  ;;  %v6301_v7 = vunpack.i.h.bf16 %v6299_v44  ;;  %v6300_v23 = vunpack.i.l.bf16 %v6299_v44  ;;  %6037 = vmatmul.msk.f32.gmra.mxu0 %vm1352_vm9, %v8245_v54  ;;  %v3840_v2 = vsel %vm8434_vm10, %v8394_v12, %v3836_v13 }
 0x92c   : > { %3898 = vmatpush.msra.mxu3 %v6295_v17  ;;  %3924 = vmatpush.msra.mxu1 %v6296_v46  ;;  %v3845_v31 = vsel %vm3842_vm14, %v3844_v61, %v3840_v2  ;;  %v3816_v12 = vmul.f32 %v8309_v37, %v3815_v34  ;;  %v1350_v34 = vld [vmem:[%s7275_s29 + $0x70] sm:$0xff]  ;;  %v1349_v2 = vld [vmem:[%s7275_s29 + $0x68] sm:$0xff] }
 0x92d   : > { %v3775_v50 = vmul.f32 %v6452_v43, %v3774_v27  ;;  %6060 = vmatmul.msk.f32.vlgmr.msra.gmra.mxu3 %vm1577_vm11, %v3771_v20  ;;  %3950 = vmatpush.msrb.mxu2 %v6300_v23  ;;  %v3846_v47 = vmul.f32 %v8322_v53, %v3845_v31 }
 0x92e   : > { %6062 = vmatmul.msk.f32.vlgmr.msrb.gmra.mxu2 %vm1577_vm11, %v3801_v42  ;;  %3976 = vmatpush.msrb.mxu3 %v6301_v7  ;;  %v6304_v32 = vpop.permute.xlu0 %6303 }
 0x92f   : > { %v3776_v29 = vadd.f32 %v6452_v43, %v3775_v50  ;;  %v6306_v8 = vunpack.i.h.bf16 %v6304_v32  ;;  %v6305_v19 = vunpack.i.l.bf16 %v6304_v32 }
 0x931   : > { %v3780_v54 = vsel %vm3779_vm13, %v6452_v43, %v3776_v29  ;;  %4002 = vmatpush.msrb.mxu1 %v6305_v19  ;;  %4028 = vmatpush.msra.mxu2 %v6306_v8  ;;  %v1348_v29 = vld [vmem:[%s7275_s29 + $0x60] sm:$0xff] }
 0x932   : > { %v3785_v0 = vsel %vm3782_vm15, %v3784_v35, %v3780_v54 }
 0x933   : > { %v3786_v16 = vmul.f32 %v8327_v6, %v3785_v0  ;;  %6038 = vmatmul.msk.f32.gmra.mxu0 %vm1352_vm9, %v8249_v58  ;;  %4121 = vmatpush.msrb.mxu2 %v1351_v41  ;;  %v6607_v41 = vld [vmem:[#allocation2 + $0x8] sm:$0xff] }
 0x935   : > { %6061 = vmatmul.msk.f32.vlgmr.msra.gmra.mxu1 %vm1577_vm11, %v3786_v16  ;;  %6063 = vmatmul.msk.f32.vlgmr.msrb.gmra.mxu3 %vm1577_vm11, %v3816_v12 }
 0x936   : > { %6065 = vmatmul.msk.f32.vlgmr.msra.gmra.mxu2 %vm1577_vm11, %v3846_v47 }
 0x937   : > { %4122 = vmatpush.msrb.mxu2 %v1350_v34 }
 0x939   : > { %4123 = vmatpush.msrb.mxu2 %v1349_v2 }
 0x93b   : > { %6039 = vmatmul.msk.f32.gmra.mxu0 %vm1352_vm9, %v8253_v1  ;;  %4124 = vmatpush.msrb.mxu2 %v1348_v29 }
 0x943   : > { %6040 = vmatmul.msk.f32.gmra.mxu0 %vm1352_vm9, %v8257_v11 }
 0x94b   : > { %6041 = vmatmul.msk.f32.gmra.mxu0 %vm1352_vm9, %v8261_v14 }
 0x953   : > { %6042 = vmatmul.msk.f32.gmra.mxu0 %vm1352_vm9, %v8263_v49 }
 0x955   : > { %v3753_v37 = vpop.xlane.xlu1 %3752 }
 0x956   : > { %6453 = vrcp.f32 %v3753_v37  ;;  %v3858_v1 = vand.u32 2147483648, %v3753_v37  ;;  %v3856_v11 = vand.u32 2147483647, %v3753_v37  ;;  %vm3852_vm1 = vweird.f32 %v3753_v37 }
 0x958   : > { %v3859_v49 = vor.u32 1.1754944e-38, %v3858_v1  ;;  %vm3857_vm3 = vcmp.eq.f32.partialorder %v3856_v11, 8.507059e+37 }
 0x959   : > { %v3756_v53 = vpop.xlane.xlu0 %3755 }
 0x95a   : > { %6455 = vrcp.f32 %v3756_v53  ;;  %v3873_v44 = vand.u32 2147483648, %v3756_v53  ;;  %vm3867_vm10 = vweird.f32 %v3756_v53  ;;  %v3871_v38 = vand.u32 2147483647, %v3756_v53 }
 0x95b   : > { %6043 = vmatmul.msk.f32.gmra.mxu0 %vm1352_vm9, %v8265_v39 }
 0x95c   : > { %v6454_v6 = vpop.eup %6453  ;;  %v3874_v50 = vor.u32 1.1754944e-38, %v3873_v44  ;;  %vm3872_vm13 = vcmp.eq.f32.partialorder %v3871_v38, 8.507059e+37  ;;  %v2643_v35 = vpop.f32.mrf.mxu0  ;;  %v6606_v44 = vld [vmem:[#allocation2 + $0x10] sm:$0xff] }
 0x95d   : > { %v3848_v58 = vmul.f32 %v6454_v6, %v3753_v37  ;;  %vm3853_vm0 = vweird.f32 %v6454_v6 }
 0x95e   : > { %vm3854_vm2 = vmor %vm3852_vm1, %vm3853_vm0 }
 0x95f   : > { %v3849_v9 = vsub.f32 1.0, %v3848_v58 }
 0x960   : > { %v6456_v36 = vpop.eup %6455 }
 0x961   : > { %v3850_v4 = vmul.f32 %v6454_v6, %v3849_v9  ;;  %v3863_v20 = vmul.f32 %v6456_v36, %v3756_v53  ;;  %vm3868_vm7 = vweird.f32 %v6456_v36  ;;  %v2709_v9 = vadd.f32 %v8143_v40, %v2643_v35  ;;  %v6608_v35 = vld [vmem:[#allocation2 + $0x20] sm:$0xff] }
 0x962   : > { %v3747_v51 = vpop.xlane.xlu2 %3746  ;;  %vm3869_vm12 = vmor %vm3867_vm10, %vm3868_vm7 }
 0x963   : > { %6457 = vrcp.f32 %v3747_v51  ;;  %v3851_v14 = vadd.f32 %v6454_v6, %v3850_v4  ;;  %v3864_v39 = vsub.f32 1.0, %v3863_v20  ;;  %v3828_v62 = vand.u32 2147483648, %v3747_v51 }
 0x964   : > { %v3826_v46 = vand.u32 2147483647, %v3747_v51  ;;  %vm3822_vm5 = vweird.f32 %v3747_v51  ;;  %v2646_v8 = vpop.f32.mrf.mxu0 }
 0x965   : > { %v3855_v43 = vsel %vm3854_vm2, %v6454_v6, %v3851_v14  ;;  %v3865_v10 = vmul.f32 %v6456_v36, %v3864_v39  ;;  %v3829_v33 = vor.u32 1.1754944e-38, %v3828_v62  ;;  %v6603_v14 = vld [vmem:[#allocation2 + $0x30] sm:$0xff]  ;;  %v6604_v39 = vld [vmem:[#allocation2] sm:$0xff] }
 0x966   : > { %v3860_v60 = vsel %vm3857_vm3, %v3859_v49, %v3855_v43  ;;  %vm3827_vm8 = vcmp.eq.f32.partialorder %v3826_v46, 8.507059e+37  ;;  %v2712_v43 = vadd.f32 %v8145_v45, %v2646_v8 }
 0x967   : > { %v3861_v22 = vmul.f32 %v8341_v56, %v3860_v60  ;;  %v3866_v27 = vadd.f32 %v6456_v36, %v3865_v10 }
 0x969   : > { %v6458_v48 = vpop.eup %6457  ;;  %v3870_v23 = vsel %vm3869_vm12, %v6456_v36, %v3866_v27  ;;  %v8490_v36 = vld [vmem:[%s9665_s14] ss:$0 sm:$0xff] }
 0x96a   : > { %v3818_v52 = vmul.f32 %v6458_v48, %v3747_v51  ;;  %v4034_v21 = vpop.permute.xlu2 %4033  ;;  %vm3823_vm4 = vweird.f32 %v6458_v48  ;;  %v3875_v57 = vsel %vm3872_vm13, %v3874_v50, %v3870_v23 }
 0x96b   : > { %4054 = vmatpush.msra.mxu3 %v4034_v21  ;;  %vm3824_vm6 = vmor %vm3822_vm5, %vm3823_vm4  ;;  %v3876_v42 = vmul.f32 %v8346_v18, %v3875_v57 }
 0x96c   : > { %v3819_v5 = vsub.f32 1.0, %v3818_v52  ;;  %6066 = vmatmul.msk.f32.vlgmr.msra.gmra.mxu3 %vm1577_vm11, %v3861_v22  ;;  %v2649_v19 = vpop.f32.mrf.mxu0 }
 0x96d   : > { %v4060_v17 = vpop.permute.xlu1 %4059  ;;  %v2715_v21 = vadd.f32 %v8147_v28, %v2649_v19 }
 0x96e   : > { %v3820_v3 = vmul.f32 %v6458_v48, %v3819_v5  ;;  %4080 = vmatpush.msra.mxu1 %v4060_v17 }
 0x970   : > { %v3821_v13 = vadd.f32 %v6458_v48, %v3820_v3  ;;  %v6605_v3 = vld [vmem:[#allocation2 + $0x18] sm:$0xff] }
 0x972   : > { %v3825_v56 = vsel %vm3824_vm6, %v6458_v48, %v3821_v13 }
 0x973   : > { %v3830_v63 = vsel %vm3827_vm8, %v3829_v33, %v3825_v56 }
 0x974   : > { %v3831_v7 = vmul.f32 %v8352_v26, %v3830_v63  ;;  %v2652_v31 = vpop.f32.mrf.mxu0 }
 0x975   : > { %v2718_v13 = vadd.f32 %v8152_v25, %v2652_v31 }
 0x976   : > { %6064 = vmatmul.msk.f32.vlgmr.msrb.gmra.mxu1 %vm1577_vm11, %v3831_v7 }
 0x97e   : > { %6067 = vmatmul.msk.f32.vlgmr.msra.gmra.mxu1 %vm1577_vm11, %v3876_v42 }
 0x980   : > { %v2655_v12 = vpop.f32.mrf.mxu0 }
 0x981   : > { %v2721_v23 = vadd.f32 %v8159_v24, %v2655_v12 }
 0x988   : > { %v2658_v37 = vpop.f32.mrf.mxu0 }
 0x989   : > { %v2724_v2 = vadd.f32 %v8161_v55, %v2658_v37 }
 0x990   : > { %v2661_v53 = vpop.f32.mrf.mxu0 }
 0x991   : > { %v2727_v24 = vadd.f32 %v8163_v59, %v2661_v53 }
 0x998   : > { %v8482_v6 = vpop.f32.mrf.mxu0 }
 0x9a0   : > { %v3413_v58 = vpop.f32.mrf.mxu0 }
 0x9a1   : > { %v3437_v1 = vadd.f32 %v3413_v58, %v2709_v9  ;;  %v6610_v9 = vld [vmem:[#allocation2 + $0x38] sm:$0xff] }
 0x9a8   : > { %v3416_v4 = vpop.f32.mrf.mxu0 }
 0x9a9   : > { %v3438_v60 = vadd.f32 %v3416_v4, %v2712_v43 }
 0x9b0   : > { %v3900_v26 = vpop.f32.mrf.mxu3  ;;  %v3419_v22 = vpop.f32.mrf.mxu0 }
 0x9b1   : > { %6068 = vmatmul.msk.f32.vlgmr.msrb.gmra.mxu2 %vm1352_vm9, %v3900_v26  ;;  %v3952_v61 = vpop.f32.mrf.mxu2  ;;  %v3439_v62 = vadd.f32 %v3419_v22, %v2715_v21 }
 0x9b2   : > { %v3926_v32 = vpop.f32.mrf.mxu1 }
 0x9b8   : > { %v3978_v18 = vpop.f32.mrf.mxu3  ;;  %v3422_v17 = vpop.f32.mrf.mxu0 }
 0x9b9   : > { %6069 = vmatmul.msk.f32.gmra.mxu2 %vm1352_vm9, %v3926_v32  ;;  %v4030_v0 = vpop.f32.mrf.mxu2  ;;  %v3440_v27 = vadd.f32 %v3422_v17, %v2718_v13  ;;  %v4425_v17 = vld [vmem:[%s7277_s9 + $0x1f8] sm:$0xff]  ;;  %v4418_v13 = vld [vmem:[%s7277_s9 + $0x1c0] sm:$0xff] }
 0x9ba   : > { %4559 = vmatpush.msra.mxu2 %v4425_v17  ;;  %v4389_v17 = vld [vmem:[%s7277_s9 + $0xd8] sm:$0xff] }
 0x9c0   : > { %v3425_v7 = vpop.f32.mrf.mxu0 }
 0x9c1   : > { %6070 = vmatmul.msk.f32.gmra.mxu2 %vm1352_vm9, %v3952_v61  ;;  %v3441_v50 = vadd.f32 %v3425_v7, %v2721_v23 }
 0x9c8   : > { %v3428_v25 = vpop.f32.mrf.mxu0 }
 0x9c9   : > { %6071 = vmatmul.msk.f32.gmra.mxu2 %vm1352_vm9, %v3978_v18  ;;  %v3442_v26 = vadd.f32 %v3428_v25, %v2724_v2 }
 0x9d0   : > { %v3431_v18 = vpop.f32.mrf.mxu0 }
 0x9ef   : > { %v4056_v16 = vpop.f32.mrf.mxu3 }
 0x9f3   : > { %v4004_v54 = vpop.f32.mrf.mxu1 }
 0x9f4   : > { %6072 = vmatmul.msk.f32.gmra.mxu2 %vm1352_vm9, %v4004_v54  ;;  %v3443_v54 = vadd.f32 %v3431_v18, %v2727_v24  ;;  %v4416_v24 = vld [vmem:[%s7277_s9 + $0x1b0] sm:$0xff] }
 0x9fb   : > { %v4082_v47 = vpop.f32.mrf.mxu1 }
 0x9fc   : > { %6073 = vmatmul.msk.f32.gmra.mxu2 %vm1352_vm9, %v4030_v0  ;;  %v6609_v0 = vld [vmem:[#allocation2 + $0x28] sm:$0xff] }
 0xa04   : > { %6074 = vmatmul.msk.f32.gmra.mxu2 %vm1352_vm9, %v4056_v16  ;;  %v3434_v16 = vpop.f32.mrf.mxu0 }
 0xa0c   : > { %6075 = vmatmul.msk.f32.gmra.mxu2 %vm1352_vm9, %v4082_v47  ;;  %v2730_v47 = vadd.f32 %v8165_v15, %v8482_v6 }
 0xa0e   : > { %v3444_v58 = vadd.f32 %v3434_v16, %v2730_v47  ;;  %v4406_v16 = vld [vmem:[%s7277_s9 + $0x160] sm:$0xff]  ;;  %v4407_v47 = vld [vmem:[%s7277_s9 + $0x168] sm:$0xff] }
 0xa34   : > { %v4126_v11 = vpop.f32.mrf.mxu2 }
 0xa35   : > { %v4150_v51 = vadd.f32 %v4126_v11, %v3437_v1 }
 0xa37   : > { %v4158_v49 = vadd.f32 %v6603_v14, %v4150_v51 }
 0xa39   : > { %v8494_v20 = vadd.f32 %v8490_v36, %v4158_v49 }
 0xa3b   : > { %4180 = vadd.xlane.f32.xlu2 %v8494_v20 }
 0xa3c   : > { %v4129_v40 = vpop.f32.mrf.mxu2 }
 0xa3d   : > { %v4151_v48 = vadd.f32 %v4129_v40, %v3438_v60 }
 0xa3f   : > { %v4159_v52 = vadd.f32 %v6604_v39, %v4151_v48 }
 0xa41   : > { %v8499_v5 = vadd.f32 %v8490_v36, %v4159_v52 }
 0xa43   : > { %4182 = vadd.xlane.f32.xlu0 %v8499_v5 }
 0xa44   : > { %v4132_v45 = vpop.f32.mrf.mxu2 }
 0xa45   : > { %v4152_v10 = vadd.f32 %v4132_v45, %v3439_v62  ;;  %v4422_v45 = vld [vmem:[%s7277_s9 + $0x1e0] sm:$0xff] }
 0xa46   : > { %4436 = vmatpush.msra.mxu0 %v4422_v45  ;;  %v4393_v45 = vld [vmem:[%s7277_s9 + $0xf8] sm:$0xff] }
 0xa47   : > { %v4160_v46 = vadd.f32 %v6605_v3, %v4152_v10  ;;  %v4423_v10 = vld [vmem:[%s7277_s9 + $0x1e8] sm:$0xff]  ;;  %v4424_v3 = vld [vmem:[%s7277_s9 + $0x1f0] sm:$0xff] }
 0xa48   : > { %4477 = vmatpush.msrb.mxu3 %v4423_v10  ;;  %4518 = vmatpush.msrb.mxu1 %v4424_v3  ;;  %v4386_v10 = vld [vmem:[%s7277_s9 + $0xc0] sm:$0xff]  ;;  %v4387_v3 = vld [vmem:[%s7277_s9 + $0xc8] sm:$0xff] }
 0xa49   : > { %v8504_v33 = vadd.f32 %v8490_v36, %v4160_v46  ;;  %4437 = vmatpush.msra.mxu0 %v4418_v13  ;;  %v4382_v13 = vld [vmem:[%s7277_s9 + $0xa0] sm:$0xff] }
 0xa4b   : > { %4184 = vadd.xlane.f32.xlu1 %v8504_v33 }
 0xa4c   : > { %v4135_v28 = vpop.f32.mrf.mxu2 }
 0xa4d   : > { %v4153_v56 = vadd.f32 %v4135_v28, %v3440_v27  ;;  %v4419_v27 = vld [vmem:[%s7277_s9 + $0x1c8] sm:$0xff] }
 0xa4e   : > { %4478 = vmatpush.msrb.mxu3 %v4419_v27  ;;  %v4383_v27 = vld [vmem:[%s7277_s9 + $0xa8] sm:$0xff] }
 0xa4f   : > { %v4161_v63 = vadd.f32 %v6606_v44, %v4153_v56  ;;  %v4420_v56 = vld [vmem:[%s7277_s9 + $0x1d0] sm:$0xff]  ;;  %v4421_v44 = vld [vmem:[%s7277_s9 + $0x1d8] sm:$0xff] }
 0xa50   : > { %4519 = vmatpush.msrb.mxu1 %v4420_v56  ;;  %4560 = vmatpush.msra.mxu2 %v4421_v44  ;;  %v4385_v56 = vld [vmem:[%s7277_s9 + $0xb8] sm:$0xff]  ;;  %v4378_v44 = vld [vmem:[%s7277_s9 + $0x80] sm:$0xff] }
 0xa51   : > { %v8508_v38 = vadd.f32 %v8490_v36, %v4161_v63 }
 0xa52   : > { %4520 = vmatpush.msrb.mxu1 %v4416_v24  ;;  %v4367_v24 = vld [vmem:[%s7277_s9 + $0x28] sm:$0xff] }
 0xa53   : > { %4186 = vadd.xlane.f32.xlu0 %v8508_v38 }
 0xa77   : > { %v4138_v57 = vpop.f32.mrf.mxu2 }
 0xa78   : > { %v4154_v42 = vadd.f32 %v4138_v57, %v3441_v50 }
 0xa7a   : > { %v4162_v34 = vadd.f32 %v6607_v41, %v4154_v42 }
 0xa7c   : > { %v8514_v29 = vadd.f32 %v8490_v36, %v4162_v34 }
 0xa7e   : > { %4188 = vadd.xlane.f32.xlu0 %v8514_v29 }
 0xa7f   : > { %v4141_v32 = vpop.f32.mrf.mxu2 }
 0xa80   : > { %v4155_v61 = vadd.f32 %v4141_v32, %v3442_v26 }
 0xa82   : > { %v4163_v8 = vadd.f32 %v6608_v35, %v4155_v61  ;;  %v4414_v35 = vld [vmem:[%s7277_s9 + $0x1a0] sm:$0xff] }
 0xa83   : > { %4438 = vmatpush.msra.mxu0 %v4414_v35  ;;  %v4373_v35 = vld [vmem:[%s7277_s9 + $0x58] sm:$0xff] }
 0xa84   : > { %v8519_v19 = vadd.f32 %v8490_v36, %v4163_v8  ;;  %v4415_v8 = vld [vmem:[%s7277_s9 + $0x1a8] sm:$0xff] }
 0xa85   : > { %4479 = vmatpush.msrb.mxu3 %v4415_v8  ;;  %v4366_v8 = vld [vmem:[%s7277_s9 + $0x20] sm:$0xff] }
 0xa86   : > { %4190 = vadd.xlane.f32.xlu0 %v8519_v19 }
 0xa87   : > { %v4144_v55 = vpop.f32.mrf.mxu2 }
 0xa88   : > { %v4156_v31 = vadd.f32 %v4144_v55, %v3443_v54  ;;  %v4417_v54 = vld [vmem:[%s7277_s9 + $0x1b8] sm:$0xff]  ;;  %v4410_v55 = vld [vmem:[%s7277_s9 + $0x180] sm:$0xff] }
 0xa89   : > { %4561 = vmatpush.msra.mxu2 %v4417_v54  ;;  %4439 = vmatpush.msra.mxu0 %v4410_v55  ;;  %v4368_v54 = vld [vmem:[%s7277_s9 + $0x30] sm:$0xff]  ;;  %v4369_v55 = vld [vmem:[%s7277_s9 + $0x38] sm:$0xff] }
 0xa8a   : > { %v4164_v12 = vadd.f32 %v6609_v0, %v4156_v31  ;;  %v4411_v31 = vld [vmem:[%s7277_s9 + $0x188] sm:$0xff]  ;;  %v4412_v0 = vld [vmem:[%s7277_s9 + $0x190] sm:$0xff] }
 0xa8b   : > { %4480 = vmatpush.msrb.mxu3 %v4411_v31  ;;  %4521 = vmatpush.msrb.mxu1 %v4412_v0  ;;  %v4362_v0 = vld [vmem:[%s7277_s9] sm:$0xff] }
 0xa8c   : > { %v8525_v37 = vadd.f32 %v8490_v36, %v4164_v12  ;;  %v4413_v12 = vld [vmem:[%s7277_s9 + $0x198] sm:$0xff]  ;;  %4440 = vmatpush.msra.mxu0 %v4406_v16  ;;  %v4364_v16 = vld [vmem:[%s7277_s9 + $0x10] sm:$0xff] }
 0xa8d   : > { %4562 = vmatpush.msra.mxu2 %v4413_v12  ;;  %4481 = vmatpush.msrb.mxu3 %v4407_v47  ;;  %v4363_v12 = vld [vmem:[%s7277_s9 + $0x8] sm:$0xff] }
 0xa8e   : > { %4192 = vadd.xlane.f32.xlu2 %v8525_v37 }
 0xa8f   : > { %v4147_v59 = vpop.f32.mrf.mxu2 }
 0xa90   : > { %v4157_v53 = vadd.f32 %v4147_v59, %v3444_v58  ;;  %v4408_v58 = vld [vmem:[%s7277_s9 + $0x170] sm:$0xff]  ;;  %v4409_v59 = vld [vmem:[%s7277_s9 + $0x178] sm:$0xff] }
 0xa91   : > { %4522 = vmatpush.msrb.mxu1 %v4408_v58  ;;  %4563 = vmatpush.msra.mxu2 %v4409_v59  ;;  %v4365_v58 = vld [vmem:[%s7277_s9 + $0x18] sm:$0xff] }
 0xa92   : > { %v4165_v1 = vadd.f32 %v6610_v9, %v4157_v53  ;;  %v4402_v53 = vld [vmem:[%s7277_s9 + $0x140] sm:$0xff]  ;;  %v4403_v9 = vld [vmem:[%s7277_s9 + $0x148] sm:$0xff] }
 0xa93   : > { %4441 = vmatpush.msra.mxu0 %v4402_v53  ;;  %4482 = vmatpush.msrb.mxu3 %v4403_v9 }
 0xa94   : > { %v8529_v4 = vadd.f32 %v8490_v36, %v4165_v1  ;;  %v4404_v1 = vld [vmem:[%s7277_s9 + $0x150] sm:$0xff] }
 0xa95   : > { %4523 = vmatpush.msrb.mxu1 %v4404_v1 }
 0xa96   : > { %4194 = vadd.xlane.f32.xlu2 %v8529_v4 }
 0xaae   : > { %v4181_v11 = vpop.xlane.xlu2 %4180 }
 0xaaf   : > { %v4196_v51 = vmul.f32 %v4181_v11, %v7351_v30  ;;  %v4405_v11 = vld [vmem:[%s7277_s9 + $0x158] sm:$0xff] }
 0xab0   : > { %4564 = vmatpush.msra.mxu2 %v4405_v11 }
 0xab1   : > { %v8534_v15 = vsub.f32 %v8494_v20, %v4196_v51  ;;  %v4398_v51 = vld [vmem:[%s7277_s9 + $0x120] sm:$0xff] }
 0xab2   : > { %4442 = vmatpush.msra.mxu0 %v4398_v51 }
 0xab3   : > { %v4212_v6 = vmul.f32 %v8534_v15, %v8534_v15 }
 0xab5   : > { %4220 = vadd.xlane.f32.xlu0 %v4212_v6  ;;  %v4399_v6 = vld [vmem:[%s7277_s9 + $0x128] sm:$0xff] }
 0xab6   : > { %v4183_v14 = vpop.xlane.xlu0 %4182  ;;  %4483 = vmatpush.msrb.mxu3 %v4399_v6 }
 0xab7   : > { %v4197_v49 = vmul.f32 %v4183_v14, %v7351_v30  ;;  %v4400_v14 = vld [vmem:[%s7277_s9 + $0x130] sm:$0xff] }
 0xab8   : > { %4524 = vmatpush.msrb.mxu1 %v4400_v14 }
 0xab9   : > { %v8540_v36 = vsub.f32 %v8499_v5, %v4197_v49  ;;  %v4401_v49 = vld [vmem:[%s7277_s9 + $0x138] sm:$0xff] }
 0xaba   : > { %4565 = vmatpush.msra.mxu2 %v4401_v49 }
 0xabb   : > { %v4213_v43 = vmul.f32 %v8540_v36, %v8540_v36 }
 0xabd   : > { %4222 = vadd.xlane.f32.xlu0 %v4213_v43  ;;  %v4394_v43 = vld [vmem:[%s7277_s9 + $0x100] sm:$0xff] }
 0xabe   : > { %v4185_v60 = vpop.xlane.xlu1 %4184  ;;  %4443 = vmatpush.msra.mxu0 %v4394_v43 }
 0xabf   : > { %v4198_v40 = vmul.f32 %v4185_v60, %v7351_v30  ;;  %v4395_v60 = vld [vmem:[%s7277_s9 + $0x108] sm:$0xff] }
 0xac0   : > { %4484 = vmatpush.msrb.mxu3 %v4395_v60 }
 0xac1   : > { %v8546_v48 = vsub.f32 %v8504_v33, %v4198_v40  ;;  %v4396_v40 = vld [vmem:[%s7277_s9 + $0x110] sm:$0xff] }
 0xac2   : > { %4525 = vmatpush.msrb.mxu1 %v4396_v40 }
 0xac3   : > { %v4214_v22 = vmul.f32 %v8546_v48, %v8546_v48 }
 0xac5   : > { %4224 = vadd.xlane.f32.xlu1 %v4214_v22  ;;  %v4397_v22 = vld [vmem:[%s7277_s9 + $0x118] sm:$0xff] }
 0xac6   : > { %v4187_v39 = vpop.xlane.xlu0 %4186  ;;  %4566 = vmatpush.msra.mxu2 %v4397_v22 }
 0xac7   : > { %v4199_v52 = vmul.f32 %v4187_v39, %v7351_v30  ;;  %v4390_v39 = vld [vmem:[%s7277_s9 + $0xe0] sm:$0xff] }
 0xac8   : > { %4444 = vmatpush.msra.mxu0 %v4390_v39  ;;  %4567 = vmatpush.msra.mxu2 %v4393_v45 }
 0xac9   : > { %v8552_v21 = vsub.f32 %v8508_v38, %v4199_v52  ;;  %v4391_v52 = vld [vmem:[%s7277_s9 + $0xe8] sm:$0xff] }
 0xaca   : > { %4485 = vmatpush.msrb.mxu3 %v4391_v52  ;;  %4445 = vmatpush.msra.mxu0 %v4386_v10 }
 0xacb   : > { %v4215_v62 = vmul.f32 %v8552_v21, %v8552_v21  ;;  %4568 = vmatpush.msra.mxu2 %v4389_v17 }
 0xacc   : > { %4486 = vmatpush.msrb.mxu3 %v4387_v3  ;;  %4446 = vmatpush.msra.mxu0 %v4382_v13 }
 0xacd   : > { %4226 = vadd.xlane.f32.xlu0 %v4215_v62  ;;  %v4392_v62 = vld [vmem:[%s7277_s9 + $0xf0] sm:$0xff]  ;;  %4569 = vmatpush.msra.mxu2 %v4385_v56 }
 0xace   : > { %4526 = vmatpush.msrb.mxu1 %v4392_v62  ;;  %4487 = vmatpush.msrb.mxu3 %v4383_v27  ;;  %v8652_v62 = vld [vmem:[%s912_s2] ss:$0 sm:$0xff] }
 0xacf   : > { %4447 = vmatpush.msra.mxu0 %v4378_v44 }
 0xaf1   : > { %v4189_v46 = vpop.xlane.xlu0 %4188 }
 0xaf2   : > { %v4200_v28 = vmul.f32 %v4189_v46, %v7351_v30  ;;  %v4388_v46 = vld [vmem:[%s7277_s9 + $0xd0] sm:$0xff] }
 0xaf3   : > { %4527 = vmatpush.msrb.mxu1 %v4388_v46  ;;  %v8660_v46 = vld [vmem:[%s915_s30] ss:$0 sm:$0xff] }
 0xaf4   : > { %v8566_v63 = vsub.f32 %v8514_v29, %v4200_v28  ;;  %v4384_v28 = vld [vmem:[%s7277_s9 + $0xb0] sm:$0xff] }
 0xaf5   : > { %4528 = vmatpush.msrb.mxu1 %v4384_v28 }
 0xaf6   : > { %v4216_v7 = vmul.f32 %v8566_v63, %v8566_v63 }
 0xaf8   : > { %4228 = vadd.xlane.f32.xlu2 %v4216_v7  ;;  %v4379_v7 = vld [vmem:[%s7277_s9 + $0x88] sm:$0xff] }
 0xaf9   : > { %v4191_v23 = vpop.xlane.xlu0 %4190  ;;  %4488 = vmatpush.msrb.mxu3 %v4379_v7 }
 0xafa   : > { %v4201_v50 = vmul.f32 %v4191_v23, %v7351_v30  ;;  %v4380_v23 = vld [vmem:[%s7277_s9 + $0x90] sm:$0xff] }
 0xafb   : > { %4529 = vmatpush.msrb.mxu1 %v4380_v23 }
 0xafc   : > { %v8572_v25 = vsub.f32 %v8519_v19, %v4201_v50  ;;  %v4381_v50 = vld [vmem:[%s7277_s9 + $0x98] sm:$0xff] }
 0xafd   : > { %4570 = vmatpush.msra.mxu2 %v4381_v50 }
 0xafe   : > { %v4217_v57 = vmul.f32 %v8572_v25, %v8572_v25 }
 0xb00   : > { %4230 = vadd.xlane.f32.xlu1 %v4217_v57  ;;  %v4374_v57 = vld [vmem:[%s7277_s9 + $0x60] sm:$0xff] }
 0xb01   : > { %v4193_v42 = vpop.xlane.xlu2 %4192  ;;  %4448 = vmatpush.msra.mxu0 %v4374_v57 }
 0xb02   : > { %v4202_v41 = vmul.f32 %v4193_v42, %v7351_v30  ;;  %v4375_v42 = vld [vmem:[%s7277_s9 + $0x68] sm:$0xff] }
 0xb03   : > { %4489 = vmatpush.msrb.mxu3 %v4375_v42 }
 0xb04   : > { %v8578_v34 = vsub.f32 %v8525_v37, %v4202_v41  ;;  %v4376_v41 = vld [vmem:[%s7277_s9 + $0x70] sm:$0xff] }
 0xb05   : > { %4530 = vmatpush.msrb.mxu1 %v4376_v41 }
 0xb06   : > { %v4218_v2 = vmul.f32 %v8578_v34, %v8578_v34 }
 0xb08   : > { %4232 = vadd.xlane.f32.xlu0 %v4218_v2  ;;  %v4377_v2 = vld [vmem:[%s7277_s9 + $0x78] sm:$0xff] }
 0xb09   : > { %v4195_v26 = vpop.xlane.xlu2 %4194  ;;  %4571 = vmatpush.msra.mxu2 %v4377_v2 }
 0xb0a   : > { %v4203_v32 = vmul.f32 %v4195_v26, %v7351_v30  ;;  %v4370_v26 = vld [vmem:[%s7277_s9 + $0x40] sm:$0xff] }
 0xb0b   : > { %4449 = vmatpush.msra.mxu0 %v4370_v26  ;;  %4572 = vmatpush.msra.mxu2 %v4373_v35 }
 0xb0c   : > { %v8584_v61 = vsub.f32 %v8529_v4, %v4203_v32  ;;  %v4371_v32 = vld [vmem:[%s7277_s9 + $0x48] sm:$0xff] }
 0xb0d   : > { %4490 = vmatpush.msrb.mxu3 %v4371_v32  ;;  %4450 = vmatpush.msra.mxu0 %v4366_v8 }
 0xb0e   : > { %v4219_v18 = vmul.f32 %v8584_v61, %v8584_v61  ;;  %4573 = vmatpush.msra.mxu2 %v4369_v55 }
 0xb0f   : > { %4491 = vmatpush.msrb.mxu3 %v4367_v24  ;;  %4451 = vmatpush.msra.mxu0 %v4362_v0 }
 0xb10   : > { %4234 = vadd.xlane.f32.xlu2 %v4219_v18  ;;  %v4372_v18 = vld [vmem:[%s7277_s9 + $0x50] sm:$0xff]  ;;  %4574 = vmatpush.msra.mxu2 %v4365_v58 }
 0xb11   : > { %4531 = vmatpush.msrb.mxu1 %v4372_v18  ;;  %4492 = vmatpush.msrb.mxu3 %v4363_v12 }
 0xb13   : > { %4532 = vmatpush.msrb.mxu1 %v4368_v54 }
 0xb15   : > { %4533 = vmatpush.msrb.mxu1 %v4364_v16 }
 0xb28   : > { %v4221_v31 = vpop.xlane.xlu0 %4220 }
 0xb29   : > { %v4236_v47 = vmul.f32 %v4221_v31, %v7351_v30 }
 0xb2b   : > { %v4244_v59 = vadd.f32 1e-05, %v4236_v47 }
 0xb2d   : > { %6459 = vrsqrt.f32 %v4244_v59  ;;  %vm4258_vm14 = vweird.f32 %v4244_v59 }
 0xb30   : > { %v4223_v53 = vpop.xlane.xlu0 %4222 }
 0xb31   : > { %v4237_v9 = vmul.f32 %v4223_v53, %v7351_v30 }
 0xb33   : > { %v6460_v1 = vpop.eup %6459  ;;  %v4245_v11 = vadd.f32 1e-05, %v4237_v9 }
 0xb34   : > { %v4253_v51 = vmul.f32 %v6460_v1, %v4244_v59  ;;  %vm4259_vm9 = vweird.f32 %v6460_v1 }
 0xb35   : > { %6461 = vrsqrt.f32 %v4245_v11  ;;  %vm4260_vm15 = vmor %vm4258_vm14, %vm4259_vm9  ;;  %vm4268_vm1 = vweird.f32 %v4245_v11 }
 0xb36   : > { %v4254_v6 = vmul.f32 %v6460_v1, %v4253_v51 }
 0xb38   : > { %v4255_v14 = vmul.f32 0.5, %v4254_v6  ;;  %v4225_v49 = vpop.xlane.xlu1 %4224 }
 0xb39   : > { %v4238_v43 = vmul.f32 %v4225_v49, %v7351_v30 }
 0xb3a   : > { %v4256_v60 = vsub.f32 1.5, %v4255_v14 }
 0xb3b   : > { %v6462_v40 = vpop.eup %6461  ;;  %v4246_v22 = vadd.f32 1e-05, %v4238_v43 }
 0xb3c   : > { %v4257_v39 = vmul.f32 %v6460_v1, %v4256_v60  ;;  %v4263_v52 = vmul.f32 %v6462_v40, %v4245_v11  ;;  %vm4269_vm0 = vweird.f32 %v6462_v40 }
 0xb3d   : > { %6463 = vrsqrt.f32 %v4246_v22  ;;  %vm4270_vm2 = vmor %vm4268_vm1, %vm4269_vm0  ;;  %vm4278_vm4 = vweird.f32 %v4246_v22 }
 0xb3e   : > { %v4261_v45 = vsel %vm4260_vm15, %v6460_v1, %v4257_v39  ;;  %v4264_v10 = vmul.f32 %v6462_v40, %v4263_v52 }
 0xb3f   : > { %v4332_v3 = vmul.f32 %v4261_v45, %v8534_v15 }
 0xb40   : > { %v4265_v17 = vmul.f32 0.5, %v4264_v10  ;;  %v4227_v13 = vpop.xlane.xlu0 %4226 }
 0xb41   : > { %v4343_v27 = vmul.f32 %v8652_v62, %v4332_v3  ;;  %v4239_v28 = vmul.f32 %v4227_v13, %v7351_v30 }
 0xb42   : > { %v4266_v56 = vsub.f32 1.5, %v4265_v17 }
 0xb43   : > { %v6464_v44 = vpop.eup %6463  ;;  %v4247_v7 = vadd.f32 1e-05, %v4239_v28  ;;  %v4354_v23 = vadd.f32 %v8660_v46, %v4343_v27 }
 0xb44   : > { %v4267_v50 = vmul.f32 %v6462_v40, %v4266_v56  ;;  %v4273_v15 = vmul.f32 %v6464_v44, %v4246_v22  ;;  %vm4279_vm3 = vweird.f32 %v6464_v44 }
 0xb45   : > { %6465 = vrsqrt.f32 %v4247_v7  ;;  %4452 = vmatmul.f32.vlgmr.msra.gmra.mxu0 %v4354_v23  ;;  %4493 = vmatmul.f32.vlgmr.msrb.gmra.mxu3 %v4354_v23  ;;  %vm4280_vm5 = vmor %vm4278_vm4, %vm4279_vm3  ;;  %vm4288_vm7 = vweird.f32 %v4247_v7 }
 0xb46   : > { %v4271_v57 = vsel %vm4270_vm2, %v6462_v40, %v4267_v50  ;;  %v4274_v42 = vmul.f32 %v6464_v44, %v4273_v15  ;;  %4534 = vmatmul.f32.vlgmr.msrb.gmra.mxu1 %v4354_v23  ;;  %4575 = vmatmul.f32.vlgmr.msra.gmra.mxu2 %v4354_v23 }
 0xb47   : > { %v4333_v41 = vmul.f32 %v4271_v57, %v8540_v36 }
 0xb48   : > { %v4275_v2 = vmul.f32 0.5, %v4274_v42 }
 0xb49   : > { %v4344_v26 = vmul.f32 %v8652_v62, %v4333_v41 }
 0xb4a   : > { %v4276_v32 = vsub.f32 1.5, %v4275_v2 }
 0xb4b   : > { %v6466_v18 = vpop.eup %6465  ;;  %v4355_v35 = vadd.f32 %v8660_v46, %v4344_v26 }
 0xb4c   : > { %v4277_v8 = vmul.f32 %v6464_v44, %v4276_v32  ;;  %v4283_v24 = vmul.f32 %v6466_v18, %v4247_v7  ;;  %vm4289_vm6 = vweird.f32 %v6466_v18 }
 0xb4d   : > { %4455 = vmatmul.f32.gmra.mxu0 %v4355_v35  ;;  %4496 = vmatmul.f32.gmra.mxu3 %v4355_v35  ;;  %vm4290_vm8 = vmor %vm4288_vm7, %vm4289_vm6 }
 0xb4e   : > { %v4281_v54 = vsel %vm4280_vm5, %v6464_v44, %v4277_v8  ;;  %v4284_v55 = vmul.f32 %v6466_v18, %v4283_v24  ;;  %4537 = vmatmul.f32.gmra.mxu1 %v4355_v35  ;;  %4578 = vmatmul.f32.gmra.mxu2 %v4355_v35 }
 0xb4f   : > { %v4334_v36 = vmul.f32 %v4281_v54, %v8546_v48 }
 0xb50   : > { %v4285_v31 = vmul.f32 0.5, %v4284_v55 }
 0xb51   : > { %v4345_v0 = vmul.f32 %v8652_v62, %v4334_v36 }
 0xb52   : > { %v4286_v12 = vsub.f32 1.5, %v4285_v31 }
 0xb53   : > { %v4356_v16 = vadd.f32 %v8660_v46, %v4345_v0 }
 0xb54   : > { %v4287_v47 = vmul.f32 %v6466_v18, %v4286_v12 }
 0xb55   : > { %4458 = vmatmul.f32.gmra.mxu0 %v4356_v16  ;;  %4499 = vmatmul.f32.gmra.mxu3 %v4356_v16 }
 0xb56   : > { %v4291_v58 = vsel %vm4290_vm8, %v6466_v18, %v4287_v47  ;;  %4540 = vmatmul.f32.gmra.mxu1 %v4356_v16  ;;  %4581 = vmatmul.f32.gmra.mxu2 %v4356_v16 }
 0xb57   : > { %v4335_v59 = vmul.f32 %v4291_v58, %v8552_v21 }
 0xb59   : > { %v4346_v53 = vmul.f32 %v8652_v62, %v4335_v59 }
 0xb5b   : > { %v4357_v48 = vadd.f32 %v8660_v46, %v4346_v53 }
 0xb5d   : > { %4461 = vmatmul.f32.gmra.mxu0 %v4357_v48  ;;  %4502 = vmatmul.f32.gmra.mxu3 %v4357_v48 }
 0xb5e   : > { %4543 = vmatmul.f32.gmra.mxu1 %v4357_v48  ;;  %4584 = vmatmul.f32.gmra.mxu2 %v4357_v48 }
 0xb6b   : > { %v4229_v9 = vpop.xlane.xlu2 %4228 }
 0xb6c   : > { %v4240_v1 = vmul.f32 %v4229_v9, %v7351_v30  ;;  %v5255_v9 = vld [vmem:[%s7283_s24 + $0x78] sm:$0xff] }
 0xb6d   : > { %5304 = vmatpush.msrb.mxu0 %v5255_v9  ;;  %v5279_v9 = vld [vmem:[%s7283_s24 + $0x138] sm:$0xff] }
 0xb6e   : > { %v4248_v11 = vadd.f32 1e-05, %v4240_v1  ;;  %v5287_v1 = vld [vmem:[%s7283_s24 + $0x178] sm:$0xff] }
 0xb6f   : > { %5386 = vmatpush.msra.mxu1 %v5287_v1  ;;  %v5298_v1 = vld [vmem:[%s7283_s24 + $0x1d0] sm:$0xff] }
 0xb70   : > { %6467 = vrsqrt.f32 %v4248_v11  ;;  %vm4298_vm12 = vweird.f32 %v4248_v11 }
 0xb73   : > { %v4231_v51 = vpop.xlane.xlu1 %4230 }
 0xb74   : > { %v4241_v6 = vmul.f32 %v4231_v51, %v7351_v30  ;;  %v5252_v51 = vld [vmem:[%s7283_s24 + $0x60] sm:$0xff] }
 0xb76   : > { %v6468_v14 = vpop.eup %6467  ;;  %v4249_v49 = vadd.f32 1e-05, %v4241_v6  ;;  %v5271_v6 = vld [vmem:[%s7283_s24 + $0xf8] sm:$0xff] }
 0xb77   : > { %v4293_v43 = vmul.f32 %v6468_v14, %v4248_v11  ;;  %vm4299_vm10 = vweird.f32 %v6468_v14  ;;  %v5254_v11 = vld [vmem:[%s7283_s24 + $0x70] sm:$0xff]  ;;  %5345 = vmatpush.msra.mxu3 %v5271_v6 }
 0xb78   : > { %6469 = vrsqrt.f32 %v4249_v49  ;;  %vm4300_vm13 = vmor %vm4298_vm12, %vm4299_vm10  ;;  %vm4308_vm14 = vweird.f32 %v4249_v49  ;;  %5305 = vmatpush.msrb.mxu0 %v5254_v11 }
 0xb79   : > { %v4294_v21 = vmul.f32 %v6468_v14, %v4293_v43  ;;  %v5251_v43 = vld [vmem:[%s7283_s24 + $0x58] sm:$0xff] }
 0xb7b   : > { %v4295_v60 = vmul.f32 0.5, %v4294_v21  ;;  %v4233_v40 = vpop.xlane.xlu0 %4232  ;;  %v5270_v21 = vld [vmem:[%s7283_s24 + $0xf0] sm:$0xff] }
 0xb7c   : > { %v4242_v22 = vmul.f32 %v4233_v40, %v7351_v30  ;;  %5346 = vmatpush.msra.mxu3 %v5270_v21  ;;  %v5302_v40 = vld [vmem:[%s7283_s24 + $0x1f0] sm:$0xff]  ;;  %v5297_v21 = vld [vmem:[%s7283_s24 + $0x1c8] sm:$0xff] }
 0xb7d   : > { %v4296_v39 = vsub.f32 1.5, %v4295_v60  ;;  %v5283_v60 = vld [vmem:[%s7283_s24 + $0x158] sm:$0xff] }
 0xb7e   : > { %v6470_v52 = vpop.eup %6469  ;;  %v4250_v45 = vadd.f32 1e-05, %v4242_v22  ;;  %v4426_v22 = vld [vmem:[%s7335_s21] sm:$0xf] }
 0xb7f   : > { %v4297_v10 = vmul.f32 %v6468_v14, %v4296_v39  ;;  %v4303_v3 = vmul.f32 %v6470_v52, %v4249_v49  ;;  %vm4309_vm9 = vweird.f32 %v6470_v52  ;;  %v5303_v49 = vld [vmem:[%s7283_s24 + $0x1f8] sm:$0xff]  ;;  %v8705_v39 = vperm.slane %v4426_v22, 0 }
 0xb80   : > { %6471 = vrsqrt.f32 %v4250_v45  ;;  %vm4310_vm15 = vmor %vm4308_vm14, %vm4309_vm9  ;;  %vm4318_vm1 = vweird.f32 %v4250_v45  ;;  %5427 = vmatpush.msrb.mxu2 %v5303_v49 }
 0xb81   : > { %v4301_v17 = vsel %vm4300_vm13, %v6468_v14, %v4297_v10  ;;  %v4304_v13 = vmul.f32 %v6470_v52, %v4303_v3  ;;  %v5284_v14 = vld [vmem:[%s7283_s24 + $0x160] sm:$0xff]  ;;  %v5250_v10 = vld [vmem:[%s7283_s24 + $0x50] sm:$0xff]  ;;  %v5269_v3 = vld [vmem:[%s7283_s24 + $0xe8] sm:$0xff] }
 0xb82   : > { %v4336_v27 = vmul.f32 %v4301_v17, %v8566_v63  ;;  %5428 = vmatpush.msrb.mxu2 %v5302_v40  ;;  %v5282_v17 = vld [vmem:[%s7283_s24 + $0x150] sm:$0xff]  ;;  %5347 = vmatpush.msra.mxu3 %v5269_v3 }
 0xb83   : > { %v4305_v28 = vmul.f32 0.5, %v4304_v13  ;;  %v4235_v56 = vpop.xlane.xlu2 %4234 }
 0xb84   : > { %v4243_v44 = vmul.f32 %v4235_v56, %v7351_v30  ;;  %v4347_v7 = vmul.f32 %v8652_v62, %v4336_v27 }
 0xb85   : > { %v4306_v23 = vsub.f32 1.5, %v4305_v28  ;;  %v5301_v28 = vld [vmem:[%s7283_s24 + $0x1e8] sm:$0xff] }
 0xb86   : > { %v6472_v50 = vpop.eup %6471  ;;  %v4251_v15 = vadd.f32 1e-05, %v4243_v44  ;;  %v4358_v57 = vadd.f32 %v8660_v46, %v4347_v7  ;;  %5429 = vmatpush.msrb.mxu2 %v5301_v28  ;;  %v8720_v7 = vperm.slane %v4426_v22, 1 }
 0xb87   : > { %v4307_v42 = vmul.f32 %v6470_v52, %v4306_v23  ;;  %v4313_v41 = vmul.f32 %v6472_v50, %v4250_v45  ;;  %vm4319_vm0 = vweird.f32 %v6472_v50 }
 0xb88   : > { %6473 = vrsqrt.f32 %v4251_v15  ;;  %4464 = vmatmul.f32.gmra.mxu0 %v4358_v57  ;;  %4505 = vmatmul.f32.gmra.mxu3 %v4358_v57  ;;  %vm4320_vm2 = vmor %vm4318_vm1, %vm4319_vm0  ;;  %vm4328_vm4 = vweird.f32 %v4251_v15 }
 0xb89   : > { %v4311_v63 = vsel %vm4310_vm15, %v6470_v52, %v4307_v42  ;;  %v4314_v2 = vmul.f32 %v6472_v50, %v4313_v41  ;;  %4546 = vmatmul.f32.gmra.mxu1 %v4358_v57  ;;  %4587 = vmatmul.f32.gmra.mxu2 %v4358_v57  ;;  %v8707_v52 = vperm.slane %v4426_v22, 2 }
 0xb8a   : > { %v4337_v26 = vmul.f32 %v4311_v63, %v8572_v25 }
 0xb8b   : > { %v4315_v32 = vmul.f32 0.5, %v4314_v2  ;;  %v5249_v2 = vld [vmem:[%s7283_s24 + $0x48] sm:$0xff] }
 0xb8c   : > { %v4348_v18 = vmul.f32 %v8652_v62, %v4337_v26  ;;  %v5268_v26 = vld [vmem:[%s7283_s24 + $0xe0] sm:$0xff] }
 0xb8d   : > { %v4316_v35 = vsub.f32 1.5, %v4315_v32  ;;  %v5281_v32 = vld [vmem:[%s7283_s24 + $0x148] sm:$0xff]  ;;  %5348 = vmatpush.msra.mxu3 %v5268_v26 }
 0xb8e   : > { %v6474_v8 = vpop.eup %6473  ;;  %v4359_v24 = vadd.f32 %v8660_v46, %v4348_v18  ;;  %v5245_v26 = vld [vmem:[%s7283_s24 + $0x28] sm:$0xff] }
 0xb8f   : > { %v4317_v54 = vmul.f32 %v6472_v50, %v4316_v35  ;;  %v4323_v55 = vmul.f32 %v6474_v8, %v4251_v15  ;;  %vm4329_vm3 = vweird.f32 %v6474_v8 }
 0xb90   : > { %4467 = vmatmul.f32.gmra.mxu0 %v4359_v24  ;;  %4508 = vmatmul.f32.gmra.mxu3 %v4359_v24  ;;  %vm4330_vm5 = vmor %vm4328_vm4, %vm4329_vm3 }
 0xb91   : > { %v4321_v36 = vsel %vm4320_vm2, %v6472_v50, %v4317_v54  ;;  %v4324_v31 = vmul.f32 %v6474_v8, %v4323_v55  ;;  %4549 = vmatmul.f32.gmra.mxu1 %v4359_v24  ;;  %4590 = vmatmul.f32.gmra.mxu2 %v4359_v24  ;;  %v8723_v50 = vperm.slane %v4426_v22, 3 }
 0xb92   : > { %v4338_v25 = vmul.f32 %v4321_v36, %v8578_v34  ;;  %v5248_v36 = vld [vmem:[%s7283_s24 + $0x40] sm:$0xff] }
 0xb93   : > { %v4325_v0 = vmul.f32 0.5, %v4324_v31  ;;  %v5267_v31 = vld [vmem:[%s7283_s24 + $0xd8] sm:$0xff] }
 0xb94   : > { %v4349_v12 = vmul.f32 %v8652_v62, %v4338_v25  ;;  %v5280_v25 = vld [vmem:[%s7283_s24 + $0x140] sm:$0xff]  ;;  %5349 = vmatpush.msra.mxu3 %v5267_v31 }
 0xb95   : > { %v4326_v16 = vsub.f32 1.5, %v4325_v0 }
 0xb96   : > { %v4360_v47 = vadd.f32 %v8660_v46, %v4349_v12 }
 0xb97   : > { %v4327_v58 = vmul.f32 %v6474_v8, %v4326_v16  ;;  %v5299_v16 = vld [vmem:[%s7283_s24 + $0x1d8] sm:$0xff] }
 0xb98   : > { %4470 = vmatmul.f32.gmra.mxu0 %v4360_v47  ;;  %4511 = vmatmul.f32.gmra.mxu3 %v4360_v47 }
 0xb99   : > { %v4331_v59 = vsel %vm4330_vm5, %v6474_v8, %v4327_v58  ;;  %4552 = vmatmul.f32.gmra.mxu1 %v4360_v47  ;;  %4593 = vmatmul.f32.gmra.mxu2 %v4360_v47  ;;  %v5300_v8 = vld [vmem:[%s7283_s24 + $0x1e0] sm:$0xff] }
 0xb9a   : > { %v4339_v34 = vmul.f32 %v4331_v59, %v8584_v61  ;;  %v5286_v61 = vld [vmem:[%s7283_s24 + $0x170] sm:$0xff]  ;;  %5430 = vmatpush.msrb.mxu2 %v5300_v8  ;;  %v5247_v59 = vld [vmem:[%s7283_s24 + $0x38] sm:$0xff] }
 0xb9b   : > { %5387 = vmatpush.msra.mxu1 %v5286_v61 }
 0xb9c   : > { %v4350_v53 = vmul.f32 %v8652_v62, %v4339_v34  ;;  %v5253_v62 = vld [vmem:[%s7283_s24 + $0x68] sm:$0xff]  ;;  %5431 = vmatpush.msrb.mxu2 %v5299_v16  ;;  %v5266_v34 = vld [vmem:[%s7283_s24 + $0xd0] sm:$0xff] }
 0xb9d   : > { %5306 = vmatpush.msrb.mxu0 %v5253_v62  ;;  %5350 = vmatpush.msra.mxu3 %v5266_v34  ;;  %v5246_v62 = vld [vmem:[%s7283_s24 + $0x30] sm:$0xff] }
 0xb9e   : > { %v4361_v48 = vadd.f32 %v8660_v46, %v4350_v53  ;;  %v5285_v46 = vld [vmem:[%s7283_s24 + $0x168] sm:$0xff]  ;;  %5432 = vmatpush.msrb.mxu2 %v5298_v1 }
 0xb9f   : > { %5388 = vmatpush.msra.mxu1 %v5285_v46  ;;  %5307 = vmatpush.msrb.mxu0 %v5252_v51  ;;  %v5265_v46 = vld [vmem:[%s7283_s24 + $0xc8] sm:$0xff]  ;;  %v5278_v51 = vld [vmem:[%s7283_s24 + $0x130] sm:$0xff] }
 0xba0   : > { %4473 = vmatmul.f32.gmra.mxu0 %v4361_v48  ;;  %4514 = vmatmul.f32.gmra.mxu3 %v4361_v48 }
 0xba1   : > { %4555 = vmatmul.f32.gmra.mxu1 %v4361_v48  ;;  %4596 = vmatmul.f32.gmra.mxu2 %v4361_v48 }
 0xba2   : > { %5389 = vmatpush.msra.mxu1 %v5284_v14  ;;  %5308 = vmatpush.msrb.mxu0 %v5251_v43 }
 0xba3   : > { %5351 = vmatpush.msra.mxu3 %v5265_v46  ;;  %5433 = vmatpush.msrb.mxu2 %v5297_v21 }
 0xba4   : > { %5390 = vmatpush.msra.mxu1 %v5283_v60  ;;  %5309 = vmatpush.msrb.mxu0 %v5250_v10 }
 0xba6   : > { %5391 = vmatpush.msra.mxu1 %v5282_v17  ;;  %5310 = vmatpush.msrb.mxu0 %v5249_v2 }
 0xba8   : > { %5392 = vmatpush.msra.mxu1 %v5281_v32  ;;  %5311 = vmatpush.msrb.mxu0 %v5248_v36  ;;  %v5264_v32 = vld [vmem:[%s7283_s24 + $0xc0] sm:$0xff] }
 0xba9   : > { %5352 = vmatpush.msra.mxu3 %v5264_v32  ;;  %v5296_v36 = vld [vmem:[%s7283_s24 + $0x1c0] sm:$0xff] }
 0xbaa   : > { %5393 = vmatpush.msra.mxu1 %v5280_v25  ;;  %5312 = vmatpush.msrb.mxu0 %v5247_v59 }
 0xbab   : > { %5434 = vmatpush.msrb.mxu2 %v5296_v36 }
 0xbac   : > { %5394 = vmatpush.msra.mxu1 %v5279_v9  ;;  %5313 = vmatpush.msrb.mxu0 %v5246_v62 }
 0xbae   : > { %5395 = vmatpush.msra.mxu1 %v5278_v51  ;;  %5314 = vmatpush.msrb.mxu0 %v5245_v26  ;;  %v5295_v51 = vld [vmem:[%s7283_s24 + $0x1b8] sm:$0xff] }
 0xbaf   : > { %5435 = vmatpush.msrb.mxu2 %v5295_v51 }
 0xbc2   : > { %v4453_v45 = vpop.f32.mrf.mxu0 }
 0xbc3   : > { %v8713_v13 = vadd.f32 %v4453_v45, %v8705_v39  ;;  %v4535_v27 = vpop.f32.mrf.mxu1 }
 0xbc4   : > { %v8717_v56 = vadd.f32 %v4535_v27, %v8707_v52 }
 0xbc5   : > { %v4600_v44 = vmul.f32 -1.702, %v8713_v13 }
 0xbc6   : > { %v4602_v23 = vmul.f32 -1.702, %v8717_v56 }
 0xbc7   : > { %v4632_v15 = vmul.f32 1.442695, %v4600_v44 }
 0xbc8   : > { %v4636_v57 = vmul.f32 1.442695, %v4602_v23  ;;  %v4494_v42 = vpop.f32.mrf.mxu3 }
 0xbc9   : > { %6475 = vpow2.f32 %v4632_v15  ;;  %v8726_v41 = vadd.f32 %v4494_v42, %v8720_v7  ;;  %v4576_v63 = vpop.f32.mrf.mxu2 }
 0xbca   : > { %6477 = vpow2.f32 %v4636_v57  ;;  %v8732_v18 = vadd.f32 %v4576_v63, %v8723_v50  ;;  %v4456_v35 = vpop.f32.mrf.mxu0 }
 0xbcb   : > { %v4601_v24 = vmul.f32 -1.702, %v8726_v41  ;;  %v8737_v54 = vadd.f32 %v4456_v35, %v8705_v39  ;;  %v4538_v55 = vpop.f32.mrf.mxu1  ;;  %v5277_v35 = vld [vmem:[%s7283_s24 + $0x128] sm:$0xff] }
 0xbcc   : > { %v4603_v0 = vmul.f32 -1.702, %v8732_v18  ;;  %v8744_v12 = vadd.f32 %v4538_v55, %v8707_v52  ;;  %5396 = vmatpush.msra.mxu1 %v5277_v35 }
 0xbcd   : > { %v4634_v47 = vmul.f32 1.442695, %v4601_v24  ;;  %v4604_v58 = vmul.f32 -1.702, %v8737_v54 }
 0xbce   : > { %v4638_v53 = vmul.f32 1.442695, %v4603_v0  ;;  %v4606_v48 = vmul.f32 -1.702, %v8744_v12 }
 0xbcf   : > { %v6476_v11 = vpop.eup %6475  ;;  %6479 = vpow2.f32 %v4634_v47  ;;  %v4640_v61 = vmul.f32 1.442695, %v4604_v58  ;;  %v5244_v47 = vld [vmem:[%s7283_s24 + $0x20] sm:$0xff]  ;;  %v5263_v58 = vld [vmem:[%s7283_s24 + $0xb8] sm:$0xff] }
 0xbd0   : > { %v6478_v6 = vpop.eup %6477  ;;  %v8756_v14 = vadd.f32 1.0, %v6476_v11  ;;  %6481 = vpow2.f32 %v4638_v53  ;;  %v4644_v49 = vmul.f32 1.442695, %v4606_v48  ;;  %v4497_v43 = vpop.f32.mrf.mxu3  ;;  %5315 = vmatpush.msrb.mxu0 %v5244_v47  ;;  %5353 = vmatpush.msra.mxu3 %v5263_v58  ;;  %v5276_v11 = vld [vmem:[%s7283_s24 + $0x120] sm:$0xff] }
 0xbd1   : > { %v8759_v60 = vadd.f32 1.0, %v6478_v6  ;;  %6483 = vpow2.f32 %v4640_v61  ;;  %v8762_v40 = vadd.f32 %v4497_v43, %v8720_v7  ;;  %v4579_v45 = vpop.f32.mrf.mxu2  ;;  %5397 = vmatpush.msra.mxu1 %v5276_v11  ;;  %v5243_v6 = vld [vmem:[%s7283_s24 + $0x18] sm:$0xff] }
 0xbd2   : > { %6485 = vrcp.f32 %v8756_v14  ;;  %v4739_v17 = vand.u32 2147483648, %v8756_v14  ;;  %v4737_v44 = vand.u32 2147483647, %v8756_v14  ;;  %v8775_v57 = vadd.f32 %v4579_v45, %v8723_v50  ;;  %v4459_v42 = vpop.f32.mrf.mxu0  ;;  %5316 = vmatpush.msrb.mxu0 %v5243_v6  ;;  %v5275_v45 = vld [vmem:[%s7283_s24 + $0x118] sm:$0xff] }
 0xbd3   : > { %6487 = vrcp.f32 %v8759_v60  ;;  %v4605_v22 = vmul.f32 -1.702, %v8762_v40  ;;  %v4769_v23 = vand.u32 2147483648, %v8759_v60  ;;  %vm4733_vm6 = vweird.f32 %v8756_v14  ;;  %v4541_v1 = vpop.f32.mrf.mxu1  ;;  %5398 = vmatpush.msra.mxu1 %v5275_v45 }
 0xbd4   : > { %6489 = vpow2.f32 %v4644_v49  ;;  %v4767_v55 = vand.u32 2147483647, %v8759_v60  ;;  %v8791_v25 = vor.u32 1.1754944e-38, %v4739_v17  ;;  %vm4763_vm7 = vweird.f32 %v8759_v60 }
 0xbd5   : > { %v6480_v10 = vpop.eup %6479  ;;  %v4642_v2 = vmul.f32 1.442695, %v4605_v22  ;;  %v8797_v16 = vadd.f32 %v4459_v42, %v8705_v39  ;;  %vm8801_vm8 = vcmp.eq.f32.partialorder %v4737_v44, 8.507059e+37  ;;  %v8805_v53 = vor.u32 1.1754944e-38, %v4769_v23  ;;  %v5262_v22 = vld [vmem:[%s7283_s24 + $0xb0] sm:$0xff] }
 0xbd6   : > { %v6482_v3 = vpop.eup %6481  ;;  %v8768_v27 = vadd.f32 1.0, %v6480_v10  ;;  %v4607_v9 = vmul.f32 -1.702, %v8775_v57  ;;  %vm8818_vm12 = vcmp.eq.f32.partialorder %v4767_v55, 8.507059e+37  ;;  %v5294_v10 = vld [vmem:[%s7283_s24 + $0x1b0] sm:$0xff]  ;;  %v8835_v23 = vadd.f32 %v4541_v1, %v8707_v52  ;;  %5354 = vmatpush.msra.mxu3 %v5262_v22 }
 0xbd7   : > { %v6484_v28 = vpop.eup %6483  ;;  %v8772_v15 = vadd.f32 1.0, %v6482_v3  ;;  %v8832_v44 = vmul.f32 -1.702, %v8797_v16  ;;  %5436 = vmatpush.msrb.mxu2 %v5294_v10 }
 0xbd8   : > { %v8777_v63 = vpop.eup %6485  ;;  %6491 = vrcp.f32 %v8768_v27  ;;  %v8807_v48 = vadd.f32 1.0, %v6484_v28  ;;  %v4754_v62 = vand.u32 2147483648, %v8768_v27  ;;  %v4752_v21 = vand.u32 2147483647, %v8768_v27 }
 0xbd9   : > { %v8783_v8 = vpop.eup %6487  ;;  %v4729_v24 = vmul.f32 %v8777_v63, %v8756_v14  ;;  %6493 = vrcp.f32 %v8772_v15  ;;  %vm4734_vm10 = vweird.f32 %v8777_v63  ;;  %v4784_v28 = vand.u32 2147483648, %v8772_v15 }
 0xbda   : > { %v6490_v31 = vpop.eup %6489  ;;  %v4759_v0 = vmul.f32 %v8783_v8, %v8759_v60  ;;  %6495 = vpow2.f32 %v4642_v2  ;;  %vm4764_vm13 = vweird.f32 %v8783_v8  ;;  %vm8848_vm9 = vmor %vm4733_vm6, %vm4734_vm10  ;;  %vm4748_vm14 = vweird.f32 %v8768_v27 }
 0xbdb   : > { %v4730_v59 = vsub.f32 1.0, %v4729_v24  ;;  %v8812_v46 = vadd.f32 1.0, %v6490_v31  ;;  %6497 = vrcp.f32 %v8807_v48  ;;  %v4755_v24 = vor.u32 1.1754944e-38, %v4754_v62  ;;  %vm8869_vm1 = vmor %vm4763_vm7, %vm4764_vm13 }
 0xbdc   : > { %v4760_v61 = vsub.f32 1.0, %v4759_v0  ;;  %vm8859_vm15 = vcmp.eq.f32.partialorder %v4752_v21, 8.507059e+37  ;;  %vm4778_vm0 = vweird.f32 %v8772_v15  ;;  %v4782_v14 = vand.u32 2147483647, %v8772_v15  ;;  %v5293_v0 = vld [vmem:[%s7283_s24 + $0x1a8] sm:$0xff] }
 0xbdd   : > { %v4731_v49 = vmul.f32 %v8777_v63, %v4730_v59  ;;  %6499 = vrcp.f32 %v8812_v46  ;;  %v4646_v47 = vmul.f32 1.442695, %v4607_v9  ;;  %v8873_v1 = vor.u32 1.1754944e-38, %v4784_v28  ;;  %v5242_v59 = vld [vmem:[%s7283_s24 + $0x10] sm:$0xff]  ;;  %5437 = vmatpush.msrb.mxu2 %v5293_v0 }
 0xbde   : > { %v8827_v3 = vpop.eup %6491  ;;  %v4761_v17 = vmul.f32 %v8783_v8, %v4760_v61  ;;  %vm4793_vm2 = vweird.f32 %v8807_v48  ;;  %v4799_v11 = vand.u32 2147483648, %v8807_v48  ;;  %v4797_v60 = vand.u32 2147483647, %v8807_v48  ;;  %5317 = vmatpush.msrb.mxu0 %v5242_v59 }
 0xbdf   : > { %v8837_v42 = vpop.eup %6493  ;;  %v4732_v2 = vadd.f32 %v8777_v63, %v4731_v49  ;;  %v4744_v26 = vmul.f32 %v8827_v3, %v8768_v27  ;;  %vm4749_vm3 = vweird.f32 %v8827_v3  ;;  %vm8895_vm5 = vcmp.eq.f32.partialorder %v4782_v14, 8.507059e+37  ;;  %v5289_v27 = vld [vmem:[%s7283_s24 + $0x188] sm:$0xff] }
 0xbe0   : > { %v4762_v35 = vadd.f32 %v8783_v8, %v4761_v17  ;;  %v4774_v55 = vmul.f32 %v8837_v42, %v8772_v15  ;;  %v6496_v58 = vpop.eup %6495  ;;  %vm4779_vm4 = vweird.f32 %v8837_v42  ;;  %v4827_v45 = vand.u32 2147483647, %v8812_v46  ;;  %vm8908_vm6 = vmor %vm4748_vm14, %vm4749_vm3 }
 0xbe1   : > { %v4736_v36 = vsel %vm8848_vm9, %v8777_v63, %v4732_v2  ;;  %v4745_v31 = vsub.f32 1.0, %v4744_v26  ;;  %v8877_v61 = vpop.eup %6497  ;;  %v4829_v34 = vand.u32 2147483648, %v8812_v46  ;;  %v8912_v2 = vor.u32 1.1754944e-38, %v4799_v11  ;;  %v5274_v11 = vld [vmem:[%s7283_s24 + $0x110] sm:$0xff]  ;;  %vm8950_vm9 = vmor %vm4778_vm0, %vm4779_vm4 }
 0xbe2   : > { %v4775_v63 = vsub.f32 1.0, %v4774_v55  ;;  %v4766_v9 = vsel %vm8869_vm1, %v8783_v8, %v4762_v35  ;;  %v4741_v51 = vsel %vm8801_vm8, %v8791_v25, %v4736_v36  ;;  %v4789_v49 = vmul.f32 %v8877_v61, %v8807_v48  ;;  %v4500_v55 = vpop.f32.mrf.mxu3  ;;  %5399 = vmatpush.msra.mxu1 %v5274_v11  ;;  %v5258_v11 = vld [vmem:[%s7283_s24 + $0x90] sm:$0xff] }
 0xbe3   : > { %v4746_v62 = vmul.f32 %v8827_v3, %v4745_v31  ;;  %v8892_v21 = vpop.eup %6499  ;;  %v8901_v25 = vadd.f32 1.0, %v6496_v58  ;;  %v4771_v10 = vsel %vm8818_vm12, %v8805_v53, %v4766_v9  ;;  %vm8920_vm7 = vcmp.eq.f32.partialorder %v4797_v60, 8.507059e+37  ;;  %v4462_v58 = vpop.f32.mrf.mxu0  ;;  %v5288_v31 = vld [vmem:[%s7283_s24 + $0x180] sm:$0xff] }
 0xbe4   : > { %v4776_v6 = vmul.f32 %v8837_v42, %v4775_v63  ;;  %v4790_v28 = vsub.f32 1.0, %v4789_v49  ;;  %v4819_v26 = vmul.f32 %v8892_v21, %v8812_v46  ;;  %vm4823_vm8 = vweird.f32 %v8812_v46  ;;  %v5261_v63 = vld [vmem:[%s7283_s24 + $0xa8] sm:$0xff] }
 0xbe5   : > { %v4747_v8 = vadd.f32 %v8827_v3, %v4746_v62  ;;  %6501 = vrcp.f32 %v8901_v25  ;;  %v8927_v53 = vmul.f32 %v4741_v51, %v8713_v13  ;;  %vm4794_vm10 = vweird.f32 %v8877_v61  ;;  %v4582_v13 = vpop.f32.mrf.mxu2  ;;  %5355 = vmatpush.msra.mxu3 %v5261_v63  ;;  %v5241_v49 = vld [vmem:[%s7283_s24 + $0x8] sm:$0xff]  ;;  %v5291_v63 = vld [vmem:[%s7283_s24 + $0x198] sm:$0xff] }
 0xbe6   : > { %v4777_v43 = vadd.f32 %v8837_v42, %v4776_v6  ;;  %v4791_v35 = vmul.f32 %v8877_v61, %v4790_v28  ;;  %v8932_v36 = vmul.f32 %v4771_v10, %v8717_v56  ;;  %vm4824_vm12 = vweird.f32 %v8892_v21  ;;  %vm8964_vm14 = vmor %vm4793_vm2, %vm4794_vm10  ;;  %5318 = vmatpush.msrb.mxu0 %v5241_v49  ;;  %v5292_v10 = vld [vmem:[%s7283_s24 + $0x1a0] sm:$0xff] }
 0xbe7   : > { %v4751_v32 = vsel %vm8908_vm6, %v8827_v3, %v4747_v8  ;;  %v4820_v3 = vsub.f32 1.0, %v4819_v26  ;;  %vm8935_vm13 = vcmp.eq.f32.partialorder %v4827_v45, 8.507059e+37  ;;  %v8939_v14 = vor.u32 1.1754944e-38, %v4829_v34  ;;  %v5273_v34 = vld [vmem:[%s7283_s24 + $0x108] sm:$0xff]  ;;  %5438 = vmatpush.msrb.mxu2 %v5292_v10  ;;  %v5256_v10 = vld [vmem:[%s7283_s24 + $0x80] sm:$0xff] }
 0xbe8   : > { %v4756_v9 = vsel %vm8859_vm15, %v4755_v24, %v4751_v32  ;;  %v4792_v62 = vadd.f32 %v8877_v61, %v4791_v35  ;;  %6503 = vpow2.f32 %v4646_v47  ;;  %v4781_v24 = vsel %vm8950_vm9, %v8837_v42, %v4777_v43  ;;  %v4544_v43 = vpop.f32.mrf.mxu1  ;;  %5400 = vmatpush.msra.mxu1 %v5273_v34  ;;  %v5240_v35 = vld [vmem:[%s7283_s24] sm:$0xff]  ;;  %vm9001_vm15 = vmor %vm4823_vm8, %vm4824_vm12 }
 0xbe9   : > { %v4821_v60 = vmul.f32 %v8892_v21, %v4820_v3  ;;  %v4648_v47 = vmul.f32 1.442695, %v8832_v44  ;;  %v4610_v51 = vmul.f32 -1.702, %v8835_v23  ;;  %v8971_v6 = vadd.f32 %v4500_v55, %v8720_v7  ;;  %v5260_v44 = vld [vmem:[%s7283_s24 + $0xa0] sm:$0xff]  ;;  %v5259_v3 = vld [vmem:[%s7283_s24 + $0x98] sm:$0xff]  ;;  %5319 = vmatpush.msrb.mxu0 %v5240_v35  ;;  %5439 = vmatpush.msrb.mxu2 %v5291_v63 }
 0xbea   : > { %v4812_v8 = vand.u32 2147483647, %v8901_v25  ;;  %v8977_v48 = vadd.f32 %v4582_v13, %v8723_v50  ;;  %v8980_v45 = vadd.f32 %v4462_v58, %v8705_v39  ;;  %v4796_v28 = vsel %vm8964_vm14, %v8877_v61, %v4792_v62  ;;  %5356 = vmatpush.msra.mxu3 %v5260_v44  ;;  %5320 = vmatmul.f32.vlgmr.msrb.gmra.mxu0 %v8927_v53 }
 0xbeb   : > { %v4822_v42 = vadd.f32 %v8892_v21, %v4821_v60  ;;  %v8985_v17 = vpop.eup %6501  ;;  %6505 = vpow2.f32 %v4648_v47  ;;  %v4652_v26 = vmul.f32 1.442695, %v4610_v51  ;;  %v4609_v32 = vmul.f32 -1.702, %v8971_v6 }
 0xbec   : > { %v5209_v55 = vmul.f32 %v4756_v9, %v8726_v41  ;;  %v4786_v13 = vsel %vm8895_vm5, %v8873_v1, %v4781_v24  ;;  %v4804_v58 = vmul.f32 %v8985_v17, %v8901_v25  ;;  %v4814_v59 = vand.u32 2147483648, %v8901_v25  ;;  %v5272_v41 = vld [vmem:[%s7283_s24 + $0x100] sm:$0xff]  ;;  %5357 = vmatpush.msra.mxu3 %v5259_v3  ;;  %v5290_v9 = vld [vmem:[%s7283_s24 + $0x190] sm:$0xff] }
 0xbed   : > { %v4826_v1 = vsel %vm9001_vm15, %v8892_v21, %v4822_v42  ;;  %6507 = vpow2.f32 %v4652_v26  ;;  %v4650_v22 = vmul.f32 1.442695, %v4609_v32  ;;  %v4611_v46 = vmul.f32 -1.702, %v8977_v48  ;;  %5401 = vmatpush.msra.mxu1 %v5272_v41  ;;  %v4503_v42 = vpop.f32.mrf.mxu3  ;;  %5440 = vmatpush.msrb.mxu2 %v5290_v9  ;;  %v4585_v3 = vpop.f32.mrf.mxu2 }
 0xbee   : > { %v6504_v56 = vpop.eup %6503  ;;  %v4801_v62 = vsel %vm8920_vm7, %v8912_v2, %v4796_v28  ;;  %v4805_v60 = vsub.f32 1.0, %v4804_v58  ;;  %v4612_v0 = vmul.f32 -1.702, %v8980_v45  ;;  %v9021_v21 = vadd.f32 %v4544_v43, %v8707_v52  ;;  %5402 = vmatmul.f32.vlgmr.msra.gmra.mxu1 %v8932_v36  ;;  %5358 = vmatpush.msra.mxu3 %v5258_v11  ;;  %v5257_v2 = vld [vmem:[%s7283_s24 + $0x88] sm:$0xff] }
 0xbef   : > { %vm4809_vm0 = vweird.f32 %v8985_v17  ;;  %v9025_v24 = vadd.f32 1.0, %v6504_v56  ;;  %6509 = vpow2.f32 %v4650_v22  ;;  %v4654_v15 = vmul.f32 1.442695, %v4611_v46  ;;  %5441 = vmatpush.msrb.mxu2 %v5289_v27 }
 0xbf0   : > { %v4831_v47 = vsel %vm8935_vm13, %v8939_v14, %v4826_v1  ;;  %v4806_v51 = vmul.f32 %v8985_v17, %v4805_v60  ;;  %v4656_v53 = vmul.f32 1.442695, %v4612_v0  ;;  %v4614_v49 = vmul.f32 -1.702, %v9021_v21  ;;  %5359 = vmatpush.msra.mxu3 %v5257_v2 }
 0xbf1   : > { %v6506_v44 = vpop.eup %6505  ;;  %v5211_v34 = vmul.f32 %v4786_v13, %v8732_v18  ;;  %v5212_v36 = vmul.f32 %v4801_v62, %v8737_v54  ;;  %vm4808_vm1 = vweird.f32 %v8901_v25  ;;  %6511 = vrcp.f32 %v9025_v24  ;;  %5442 = vmatpush.msrb.mxu2 %v5288_v31 }
 0xbf2   : > { %v4807_v14 = vadd.f32 %v8985_v17, %v4806_v51  ;;  %v9042_v28 = vadd.f32 1.0, %v6506_v44  ;;  %6513 = vpow2.f32 %v4654_v15  ;;  %v4660_v26 = vmul.f32 1.442695, %v4614_v49  ;;  %vm4810_vm2 = vmor %vm4808_vm1, %vm4809_vm0  ;;  %5360 = vmatpush.msra.mxu3 %v5256_v10 }
 0xbf3   : > { %v6508_v32 = vpop.eup %6507  ;;  %v5214_v43 = vmul.f32 %v4831_v47, %v8744_v12  ;;  %v4815_v18 = vor.u32 1.1754944e-38, %v4814_v59  ;;  %6515 = vpow2.f32 %v4656_v53  ;;  %v9048_v54 = vadd.f32 %v4503_v42, %v8720_v7  ;;  %5361 = vmatmul.f32.vlgmr.msra.gmra.mxu3 %v5209_v55  ;;  %5443 = vmatmul.f32.vlgmr.msrb.gmra.mxu2 %v5211_v34 }
 0xbf4   : > { %v4811_v35 = vsel %vm4810_vm2, %v8985_v17, %v4807_v14  ;;  %vm4813_vm3 = vcmp.eq.f32.partialorder %v4812_v8, 8.507059e+37  ;;  %6517 = vrcp.f32 %v9042_v28  ;;  %v4842_v61 = vand.u32 2147483647, %v9025_v24  ;;  %5323 = vmatmul.f32.gmra.mxu0 %v5212_v36 }
 0xbf5   : > { %v6510_v12 = vpop.eup %6509  ;;  %v4816_v13 = vsel %vm4813_vm3, %v4815_v18, %v4811_v35  ;;  %v4844_v58 = vand.u32 2147483648, %v9025_v24  ;;  %v9056_v59 = vadd.f32 1.0, %v6508_v32  ;;  %6519 = vpow2.f32 %v4660_v26 }
 0xbf6   : > { %v9058_v41 = vadd.f32 1.0, %v6510_v12  ;;  %v4857_v8 = vand.u32 2147483647, %v9042_v28  ;;  %v4613_v17 = vmul.f32 -1.702, %v9048_v54  ;;  %v9064_v55 = vadd.f32 %v4585_v3, %v8723_v50  ;;  %5405 = vmatmul.f32.gmra.mxu1 %v5214_v43 }
 0xbf7   : > { %v6512_v25 = vpop.eup %6511  ;;  %6521 = vrcp.f32 %v9056_v59  ;;  %v5213_v1 = vmul.f32 %v4816_v13, %v8762_v40  ;;  %vm4838_vm4 = vweird.f32 %v9025_v24  ;;  %vm9070_vm5 = vcmp.eq.f32.partialorder %v4842_v61, 8.507059e+37 }
 0xbf8   : > { %v6514_v63 = vpop.eup %6513  ;;  %v4834_v22 = vmul.f32 %v6512_v25, %v9025_v24  ;;  %6523 = vrcp.f32 %v9058_v41  ;;  %v4845_v9 = vor.u32 1.1754944e-38, %v4844_v58  ;;  %vm4853_vm6 = vweird.f32 %v9042_v28 }
 0xbf9   : > { %v6516_v46 = vpop.eup %6515  ;;  %v4859_v56 = vand.u32 2147483648, %v9042_v28  ;;  %v4887_v40 = vand.u32 2147483647, %v9056_v59  ;;  %v9077_v0 = vadd.f32 1.0, %v6514_v63  ;;  %vm4839_vm7 = vweird.f32 %v6512_v25 }
 0xbfa   : > { %v6518_v62 = vpop.eup %6517  ;;  %v4835_v60 = vsub.f32 1.0, %v4834_v22  ;;  %v9079_v15 = vadd.f32 1.0, %v6516_v46  ;;  %vm9082_vm8 = vcmp.eq.f32.partialorder %v4857_v8, 8.507059e+37  ;;  %v4889_v47 = vand.u32 2147483648, %v9056_v59  ;;  %vm4840_vm9 = vmor %vm4838_vm4, %vm4839_vm7 }
 0xbfb   : > { %v4849_v2 = vmul.f32 %v6518_v62, %v9042_v28  ;;  %v9087_v51 = vmul.f32 1.442695, %v4613_v17  ;;  %v6520_v53 = vpop.eup %6519  ;;  %v4872_v42 = vand.u32 2147483647, %v9058_v41  ;;  %v4874_v44 = vand.u32 2147483648, %v9058_v41  ;;  %5364 = vmatmul.f32.gmra.mxu3 %v5213_v1 }
 0xbfc   : > { %v4836_v49 = vmul.f32 %v6512_v25, %v4835_v60  ;;  %6525 = vrcp.f32 %v9077_v0  ;;  %v4860_v10 = vor.u32 1.1754944e-38, %v4859_v56  ;;  %vm4883_vm10 = vweird.f32 %v9056_v59 }
 0xbfd   : > { %v6522_v34 = vpop.eup %6521  ;;  %v4850_v36 = vsub.f32 1.0, %v4849_v2  ;;  %6527 = vrcp.f32 %v9079_v15  ;;  %vm9095_vm12 = vcmp.eq.f32.partialorder %v4887_v40, 8.507059e+37  ;;  %vm4868_vm13 = vweird.f32 %v9058_v41 }
 0xbfe   : > { %v6524_v31 = vpop.eup %6523  ;;  %v4837_v14 = vadd.f32 %v6512_v25, %v4836_v49  ;;  %v4879_v26 = vmul.f32 %v6522_v34, %v9056_v59  ;;  %vm4854_vm14 = vweird.f32 %v6518_v62  ;;  %v4890_v18 = vor.u32 1.1754944e-38, %v4889_v47 }
 0xbff   : > { %v4851_v43 = vmul.f32 %v6518_v62, %v4850_v36  ;;  %v4864_v35 = vmul.f32 %v6524_v31, %v9058_v41  ;;  %vm9104_vm15 = vcmp.eq.f32.partialorder %v4872_v42, 8.507059e+37  ;;  %v4875_v61 = vor.u32 1.1754944e-38, %v4874_v44  ;;  %vm4855_vm0 = vmor %vm4853_vm6, %vm4854_vm14 }
 0xc00   : > { %v4841_v3 = vsel %vm4840_vm9, %v6512_v25, %v4837_v14  ;;  %v4880_v12 = vsub.f32 1.0, %v4879_v26  ;;  %v9110_v63 = vadd.f32 1.0, %v6520_v53  ;;  %vm4884_vm1 = vweird.f32 %v6522_v34 }
 0xc01   : > { %v4846_v58 = vsel %vm9070_vm5, %v4845_v9, %v4841_v3  ;;  %v4852_v8 = vadd.f32 %v6518_v62, %v4851_v43  ;;  %v4865_v17 = vsub.f32 1.0, %v4864_v35  ;;  %v4902_v22 = vand.u32 2147483647, %v9077_v0  ;;  %vm4885_vm3 = vmor %vm4883_vm10, %vm4884_vm1 }
 0xc02   : > { %v6526_v24 = vpop.eup %6525  ;;  %v5215_v1 = vmul.f32 %v4846_v58, %v8775_v57  ;;  %v4881_v25 = vmul.f32 %v6522_v34, %v4880_v12  ;;  %vm4869_vm2 = vweird.f32 %v6524_v31  ;;  %v4904_v2 = vand.u32 2147483648, %v9077_v0 }
 0xc03   : > { %v6528_v46 = vpop.eup %6527  ;;  %v4856_v56 = vsel %vm4855_vm0, %v6518_v62, %v4852_v8  ;;  %v4866_v60 = vmul.f32 %v6524_v31, %v4865_v17  ;;  %v4894_v11 = vmul.f32 %v6526_v24, %v9077_v0  ;;  %6529 = vrcp.f32 %v9110_v63  ;;  %vm4870_vm4 = vmor %vm4868_vm13, %vm4869_vm2 }
 0xc04   : > { %v4861_v9 = vsel %vm9082_vm8, %v4860_v10, %v4856_v56  ;;  %v4882_v40 = vadd.f32 %v6522_v34, %v4881_v25  ;;  %v4909_v57 = vmul.f32 %v6528_v46, %v9079_v15  ;;  %5446 = vmatmul.f32.gmra.mxu2 %v5215_v1  ;;  %v4917_v49 = vand.u32 2147483647, %v9079_v15 }
 0xc05   : > { %v5216_v28 = vmul.f32 %v4861_v9, %v8797_v16  ;;  %v4867_v47 = vadd.f32 %v6524_v31, %v4866_v60  ;;  %v4895_v62 = vsub.f32 1.0, %v4894_v11  ;;  %v4919_v42 = vand.u32 2147483648, %v9079_v15 }
 0xc06   : > { %v4886_v53 = vsel %vm4885_vm3, %v6522_v34, %v4882_v40  ;;  %v4910_v27 = vsub.f32 1.0, %v4909_v57  ;;  %vm4899_vm5 = vweird.f32 %v6526_v24  ;;  %vm4914_vm6 = vweird.f32 %v6528_v46 }
 0xc07   : > { %v4891_v44 = vsel %vm9095_vm12, %v4890_v18, %v4886_v53  ;;  %v4871_v16 = vsel %vm4870_vm4, %v6524_v31, %v4867_v47  ;;  %v4896_v36 = vmul.f32 %v6526_v24, %v4895_v62  ;;  %5326 = vmatmul.f32.gmra.mxu0 %v5216_v28  ;;  %vm4898_vm7 = vweird.f32 %v9077_v0 }
 0xc08   : > { %v5218_v59 = vmul.f32 %v4891_v44, %v8835_v23  ;;  %v4876_v34 = vsel %vm9104_vm15, %v4875_v61, %v4871_v16  ;;  %v4911_v10 = vmul.f32 %v6528_v46, %v4910_v27  ;;  %6531 = vpow2.f32 %v9087_v51  ;;  %vm4900_vm8 = vmor %vm4898_vm7, %vm4899_vm5  ;;  %v4547_v61 = vpop.f32.mrf.mxu1 }
 0xc09   : > { %v5217_v41 = vmul.f32 %v4876_v34, %v8971_v6  ;;  %v4897_v14 = vadd.f32 %v6526_v24, %v4896_v36  ;;  %v4905_v26 = vor.u32 1.1754944e-38, %v4904_v2  ;;  %vm4913_vm10 = vweird.f32 %v9079_v15  ;;  %v6530_v23 = vpop.eup %6529  ;;  %v4465_v6 = vpop.f32.mrf.mxu0 }
 0xc0a   : > { %v4912_v31 = vadd.f32 %v6528_v46, %v4911_v10  ;;  %v4615_v32 = vmul.f32 -1.702, %v9064_v55  ;;  %5408 = vmatmul.f32.gmra.mxu1 %v5218_v59  ;;  %vm4903_vm12 = vcmp.eq.f32.partialorder %v4902_v22, 8.507059e+37  ;;  %vm4915_vm13 = vmor %vm4913_vm10, %vm4914_vm6  ;;  %v4920_v18 = vor.u32 1.1754944e-38, %v4919_v42 }
 0xc0b   : > { %v4901_v43 = vsel %vm4900_vm8, %v6526_v24, %v4897_v14  ;;  %5367 = vmatmul.f32.gmra.mxu3 %v5217_v41  ;;  %vm4918_vm9 = vcmp.eq.f32.partialorder %v4917_v49, 8.507059e+37  ;;  %v4939_v0 = vmul.f32 %v6530_v23, %v9110_v63  ;;  %v9142_v15 = vadd.f32 %v4465_v6, %v8705_v39  ;;  %v4506_v56 = vpop.f32.mrf.mxu3 }
 0xc0c   : > { %v4906_v35 = vsel %vm4903_vm12, %v4905_v26, %v4901_v43  ;;  %v4916_v3 = vsel %vm4915_vm13, %v6528_v46, %v4912_v31  ;;  %v4662_v13 = vmul.f32 1.442695, %v4615_v32  ;;  %v9146_v17 = vadd.f32 %v4547_v61, %v8707_v52  ;;  %v4588_v9 = vpop.f32.mrf.mxu2 }
 0xc0d   : > { %v5219_v51 = vmul.f32 %v4906_v35, %v8977_v48  ;;  %v4921_v12 = vsel %vm4918_vm9, %v4920_v18, %v4916_v3  ;;  %v4940_v8 = vsub.f32 1.0, %v4939_v0  ;;  %v4947_v1 = vand.u32 2147483647, %v9110_v63 }
 0xc0e   : > { %v5220_v58 = vmul.f32 %v4921_v12, %v8980_v45  ;;  %v6532_v24 = vpop.eup %6531  ;;  %v4949_v25 = vand.u32 2147483648, %v9110_v63  ;;  %6533 = vpow2.f32 %v4662_v13  ;;  %v4616_v48 = vmul.f32 -1.702, %v9142_v15 }
 0xc0f   : > { %5449 = vmatmul.f32.gmra.mxu2 %v5219_v51  ;;  %v4941_v22 = vmul.f32 %v6530_v23, %v4940_v8  ;;  %vm4944_vm14 = vweird.f32 %v6530_v23  ;;  %v9151_v46 = vadd.f32 1.0, %v6532_v24  ;;  %v4618_v45 = vmul.f32 -1.702, %v9146_v17 }
 0xc10   : > { %5329 = vmatmul.f32.gmra.mxu0 %v5220_v58  ;;  %v4664_v60 = vmul.f32 1.442695, %v4616_v48  ;;  %v9155_v11 = vadd.f32 %v4506_v56, %v8720_v7  ;;  %vm4943_vm15 = vweird.f32 %v9110_v63  ;;  %v4950_v2 = vor.u32 1.1754944e-38, %v4949_v25  ;;  %v4550_v59 = vpop.f32.mrf.mxu1 }
 0xc11   : > { %v4942_v40 = vadd.f32 %v6530_v23, %v4941_v22  ;;  %6535 = vrcp.f32 %v9151_v46  ;;  %vm4945_vm0 = vmor %vm4943_vm15, %vm4944_vm14  ;;  %v4668_v57 = vmul.f32 1.442695, %v4618_v45  ;;  %vm4948_vm1 = vcmp.eq.f32.partialorder %v4947_v1, 8.507059e+37  ;;  %v4468_v42 = vpop.f32.mrf.mxu0 }
 0xc12   : > { %6537 = vpow2.f32 %v4664_v60  ;;  %v4617_v28 = vmul.f32 -1.702, %v9155_v11  ;;  %v9161_v62 = vadd.f32 %v4588_v9, %v8723_v50  ;;  %v9168_v36 = vadd.f32 %v4468_v42, %v8705_v39 }
 0xc13   : > { %v4946_v47 = vsel %vm4945_vm0, %v6530_v23, %v4942_v40  ;;  %6539 = vpow2.f32 %v4668_v57  ;;  %v4932_v34 = vand.u32 2147483647, %v9151_v46  ;;  %v9175_v31 = vadd.f32 %v4550_v59, %v8707_v52 }
 0xc14   : > { %v6534_v53 = vpop.eup %6533  ;;  %v4951_v27 = vsel %vm4948_vm1, %v4950_v2, %v4946_v47  ;;  %v4666_v49 = vmul.f32 1.442695, %v4617_v28  ;;  %v4619_v16 = vmul.f32 -1.702, %v9161_v62  ;;  %vm4928_vm2 = vweird.f32 %v9151_v46  ;;  %v4509_v28 = vpop.f32.mrf.mxu3 }
 0xc15   : > { %v5222_v63 = vmul.f32 %v4951_v27, %v9021_v21  ;;  %v9164_v44 = vadd.f32 1.0, %v6534_v53  ;;  %v4620_v21 = vmul.f32 -1.702, %v9168_v36  ;;  %v4934_v32 = vand.u32 2147483648, %v9151_v46 }
 0xc16   : > { %6541 = vpow2.f32 %v4666_v49  ;;  %v4670_v26 = vmul.f32 1.442695, %v4619_v16  ;;  %vm9181_vm3 = vcmp.eq.f32.partialorder %v4932_v34, 8.507059e+37  ;;  %v4622_v61 = vmul.f32 -1.702, %v9175_v31 }
 0xc17   : > { %v6536_v10 = vpop.eup %6535  ;;  %6543 = vrcp.f32 %v9164_v44  ;;  %5411 = vmatmul.f32.gmra.mxu1 %v5222_v63  ;;  %v4672_v35 = vmul.f32 1.442695, %v4620_v21  ;;  %v4962_v3 = vand.u32 2147483647, %v9164_v44  ;;  %v4964_v0 = vand.u32 2147483648, %v9164_v44 }
 0xc18   : > { %v6538_v41 = vpop.eup %6537  ;;  %v4924_v14 = vmul.f32 %v6536_v10, %v9151_v46  ;;  %6545 = vpow2.f32 %v4670_v26  ;;  %vm4929_vm4 = vweird.f32 %v6536_v10  ;;  %v4935_v8 = vor.u32 1.1754944e-38, %v4934_v32 }
 0xc19   : > { %v9179_v23 = vadd.f32 1.0, %v6538_v41  ;;  %v6540_v43 = vpop.eup %6539  ;;  %vm4958_vm5 = vweird.f32 %v9164_v44  ;;  %vm4930_vm6 = vmor %vm4928_vm2, %vm4929_vm4  ;;  %vm9201_vm7 = vcmp.eq.f32.partialorder %v4962_v3, 8.507059e+37  ;;  %v4965_v56 = vor.u32 1.1754944e-38, %v4964_v0 }
 0xc1a   : > { %v4925_v18 = vsub.f32 1.0, %v4924_v14  ;;  %v9188_v13 = vadd.f32 1.0, %v6540_v43  ;;  %v4676_v57 = vmul.f32 1.442695, %v4622_v61  ;;  %v9222_v14 = vadd.f32 %v4509_v28, %v8720_v7 }
 0xc1b   : > { %6547 = vrcp.f32 %v9179_v23  ;;  %v4979_v24 = vand.u32 2147483648, %v9179_v23  ;;  %v4977_v22 = vand.u32 2147483647, %v9179_v23  ;;  %vm4973_vm8 = vweird.f32 %v9179_v23 }
 0xc1c   : > { %v6542_v51 = vpop.eup %6541  ;;  %v4926_v12 = vmul.f32 %v6536_v10, %v4925_v18  ;;  %6549 = vpow2.f32 %v4672_v35  ;;  %v5009_v60 = vand.u32 2147483648, %v9188_v13  ;;  %v5007_v27 = vand.u32 2147483647, %v9188_v13 }
 0xc1d   : > { %v6544_v58 = vpop.eup %6543  ;;  %v9193_v1 = vadd.f32 1.0, %v6542_v51  ;;  %6551 = vrcp.f32 %v9188_v13  ;;  %v4980_v53 = vor.u32 1.1754944e-38, %v4979_v24  ;;  %vm9213_vm12 = vcmp.eq.f32.partialorder %v4977_v22, 8.507059e+37 }
 0xc1e   : > { %v4927_v25 = vadd.f32 %v6536_v10, %v4926_v12  ;;  %v4954_v48 = vmul.f32 %v6544_v58, %v9164_v44  ;;  %v6546_v9 = vpop.eup %6545  ;;  %vm4959_vm10 = vweird.f32 %v6544_v58  ;;  %vm5003_vm13 = vweird.f32 %v9188_v13 }
 0xc1f   : > { %6553 = vrcp.f32 %v9193_v1  ;;  %v4992_v34 = vand.u32 2147483647, %v9193_v1  ;;  %v9219_v41 = vadd.f32 1.0, %v6546_v9  ;;  %vm4988_vm9 = vweird.f32 %v9193_v1  ;;  %vm4960_vm14 = vmor %vm4958_vm5, %vm4959_vm10 }
 0xc20   : > { %v4931_v40 = vsel %vm4930_vm6, %v6536_v10, %v4927_v25  ;;  %v4955_v2 = vsub.f32 1.0, %v4954_v48  ;;  %v5010_v10 = vor.u32 1.1754944e-38, %v5009_v60  ;;  %6555 = vpow2.f32 %v4676_v57  ;;  %v4471_v57 = vpop.f32.mrf.mxu0 }
 0xc21   : > { %v6548_v47 = vpop.eup %6547  ;;  %v4936_v46 = vsel %vm9181_vm3, %v4935_v8, %v4931_v40  ;;  %vm9231_vm0 = vcmp.eq.f32.partialorder %v5007_v27, 8.507059e+37  ;;  %v4994_v35 = vand.u32 2147483648, %v9193_v1  ;;  %6557 = vrcp.f32 %v9219_v41 }
 0xc22   : > { %v6550_v49 = vpop.eup %6549  ;;  %v5221_v42 = vmul.f32 %v4936_v46, %v9048_v54  ;;  %v4956_v63 = vmul.f32 %v6544_v58, %v4955_v2  ;;  %v4969_v16 = vmul.f32 %v6548_v47, %v9179_v23  ;;  %vm4974_vm15 = vweird.f32 %v6548_v47  ;;  %v4591_v23 = vpop.f32.mrf.mxu2 }
 0xc23   : > { %v6552_v26 = vpop.eup %6551  ;;  %v9225_v32 = vadd.f32 1.0, %v6550_v49  ;;  %vm9238_vm1 = vcmp.eq.f32.partialorder %v4992_v34, 8.507059e+37  ;;  %v5022_v8 = vand.u32 2147483647, %v9219_v41  ;;  %v5024_v24 = vand.u32 2147483648, %v9219_v41  ;;  %vm9251_vm2 = vmor %vm4973_vm8, %vm4974_vm15 }
 0xc24   : > { %v4957_v21 = vadd.f32 %v6544_v58, %v4956_v63  ;;  %5370 = vmatmul.f32.gmra.mxu3 %v5221_v42  ;;  %v4970_v54 = vsub.f32 1.0, %v4969_v16  ;;  %v4999_v18 = vmul.f32 %v6552_v26, %v9188_v13  ;;  %vm5004_vm3 = vweird.f32 %v6552_v26 }
 0xc25   : > { %v6554_v43 = vpop.eup %6553  ;;  %6559 = vrcp.f32 %v9225_v32  ;;  %v4621_v60 = vmul.f32 -1.702, %v9222_v14  ;;  %vm5018_vm5 = vweird.f32 %v9219_v41  ;;  %v5025_v2 = vor.u32 1.1754944e-38, %v5024_v24  ;;  %vm5005_vm6 = vmor %vm5003_vm13, %vm5004_vm3 }
 0xc26   : > { %v4961_v3 = vsel %vm4960_vm14, %v6544_v58, %v4957_v21  ;;  %v4971_v0 = vmul.f32 %v6548_v47, %v4970_v54  ;;  %v4984_v51 = vmul.f32 %v6554_v43, %v9193_v1  ;;  %v5000_v61 = vsub.f32 1.0, %v4999_v18  ;;  %v6556_v9 = vpop.eup %6555 }
 0xc27   : > { %v4966_v44 = vsel %vm9201_vm7, %v4965_v56, %v4961_v3  ;;  %v4995_v56 = vor.u32 1.1754944e-38, %v4994_v35  ;;  %vm4989_vm4 = vweird.f32 %v6554_v43  ;;  %v6558_v28 = vpop.eup %6557  ;;  %v5037_v49 = vand.u32 2147483647, %v9225_v32 }
 0xc28   : > { %v5223_v25 = vmul.f32 %v4966_v44, %v9064_v55  ;;  %v4972_v48 = vadd.f32 %v6548_v47, %v4971_v0  ;;  %v4985_v22 = vsub.f32 1.0, %v4984_v51  ;;  %v5001_v45 = vmul.f32 %v6552_v26, %v5000_v61  ;;  %vm4990_vm8 = vmor %vm4988_vm9, %vm4989_vm4  ;;  %v4553_v0 = vpop.f32.mrf.mxu1 }
 0xc29   : > { %v9262_v42 = vadd.f32 1.0, %v6556_v9  ;;  %v5014_v16 = vmul.f32 %v6558_v28, %v9219_v41  ;;  %vm9269_vm7 = vcmp.eq.f32.partialorder %v5022_v8, 8.507059e+37  ;;  %vm5033_vm10 = vweird.f32 %v9225_v32 }
 0xc2a   : > { %5452 = vmatmul.f32.gmra.mxu2 %v5223_v25  ;;  %v4976_v55 = vsel %vm9251_vm2, %v6548_v47, %v4972_v48  ;;  %v4986_v40 = vmul.f32 %v6554_v43, %v4985_v22  ;;  %v5002_v27 = vadd.f32 %v6552_v26, %v5001_v45  ;;  %vm9285_vm13 = vcmp.eq.f32.partialorder %v5037_v49, 8.507059e+37 }
 0xc2b   : > { %v4981_v46 = vsel %vm9213_vm12, %v4980_v53, %v4976_v55  ;;  %v5039_v53 = vand.u32 2147483648, %v9225_v32  ;;  %6561 = vrcp.f32 %v9262_v42  ;;  %v6560_v13 = vpop.eup %6559  ;;  %v5015_v18 = vsub.f32 1.0, %v5014_v16  ;;  %v4594_v55 = vpop.f32.mrf.mxu2 }
 0xc2c   : > { %v5224_v63 = vmul.f32 %v4981_v46, %v9142_v15  ;;  %v4987_v47 = vadd.f32 %v6554_v43, %v4986_v40  ;;  %v5006_v59 = vsel %vm5005_vm6, %v6552_v26, %v5002_v27  ;;  %v4674_v15 = vmul.f32 1.442695, %v4621_v60  ;;  %v4474_v40 = vpop.f32.mrf.mxu0 }
 0xc2d   : > { %v5011_v21 = vsel %vm9231_vm0, %v5010_v10, %v5006_v59  ;;  %vm5019_vm12 = vweird.f32 %v6558_v28  ;;  %v5029_v1 = vmul.f32 %v6560_v13, %v9225_v32  ;;  %v5016_v6 = vmul.f32 %v6558_v28, %v5015_v18 }
 0xc2e   : > { %v4991_v54 = vsel %vm4990_vm8, %v6554_v43, %v4987_v47  ;;  %5332 = vmatmul.f32.gmra.mxu0 %v5224_v63  ;;  %v5226_v35 = vmul.f32 %v5011_v21, %v9146_v17  ;;  %vm5034_vm9 = vweird.f32 %v6560_v13  ;;  %v5040_v10 = vor.u32 1.1754944e-38, %v5039_v53  ;;  %v4512_v43 = vpop.f32.mrf.mxu3  ;;  %vm5020_vm14 = vmor %vm5018_vm5, %vm5019_vm12 }
 0xc2f   : > { %v4996_v26 = vsel %vm9238_vm1, %v4995_v56, %v4991_v54  ;;  %v5030_v44 = vsub.f32 1.0, %v5029_v1  ;;  %6563 = vpow2.f32 %v4674_v15  ;;  %v9291_v17 = vadd.f32 %v4591_v23, %v8723_v50  ;;  %vm5035_vm0 = vmor %vm5033_vm10, %vm5034_vm9 }
 0xc30   : > { %v5225_v51 = vmul.f32 %v4996_v26, %v9155_v11  ;;  %v9294_v12 = vadd.f32 %v4471_v57, %v8705_v39  ;;  %5414 = vmatmul.f32.gmra.mxu1 %v5226_v35  ;;  %v5017_v61 = vadd.f32 %v6558_v28, %v5016_v6  ;;  %v5067_v8 = vand.u32 2147483647, %v9262_v42  ;;  %v4556_v18 = vpop.f32.mrf.mxu1 }
 0xc31   : > { %v5069_v24 = vand.u32 2147483648, %v9262_v42  ;;  %v9299_v11 = vadd.f32 %v4553_v0, %v8707_v52  ;;  %v6562_v25 = vpop.eup %6561  ;;  %v5031_v48 = vmul.f32 %v6560_v13, %v5030_v44  ;;  %v4623_v22 = vmul.f32 -1.702, %v9291_v17 }
 0xc32   : > { %5373 = vmatmul.f32.gmra.mxu3 %v5225_v51  ;;  %v4624_v58 = vmul.f32 -1.702, %v9294_v12  ;;  %v9307_v45 = vadd.f32 %v4512_v43, %v8720_v7  ;;  %v5021_v56 = vsel %vm5020_vm14, %v6558_v28, %v5017_v61  ;;  %v5059_v60 = vmul.f32 %v6562_v25, %v9262_v42 }
 0xc33   : > { %vm5064_vm15 = vweird.f32 %v6562_v25  ;;  %v4626_v9 = vmul.f32 -1.702, %v9299_v11  ;;  %v5026_v41 = vsel %vm9269_vm7, %v5025_v2, %v5021_v56  ;;  %v5032_v23 = vadd.f32 %v6560_v13, %v5031_v48 }
 0xc34   : > { %v4678_v57 = vmul.f32 1.442695, %v4623_v22  ;;  %v4680_v46 = vmul.f32 1.442695, %v4624_v58  ;;  %v5227_v27 = vmul.f32 %v5026_v41, %v9161_v62  ;;  %v5060_v28 = vsub.f32 1.0, %v5059_v60  ;;  %v4597_v41 = vpop.f32.mrf.mxu2 }
 0xc35   : > { %v4684_v49 = vmul.f32 1.442695, %v4626_v9  ;;  %v4625_v63 = vmul.f32 -1.702, %v9307_v45  ;;  %v6564_v47 = vpop.eup %6563  ;;  %v5036_v16 = vsel %vm5035_vm0, %v6560_v13, %v5032_v23  ;;  %v9319_v53 = vadd.f32 %v4594_v55, %v8723_v50 }
 0xc36   : > { %6565 = vpow2.f32 %v4678_v57  ;;  %v9322_v2 = vadd.f32 %v4474_v40, %v8705_v39  ;;  %v5041_v62 = vsel %vm9285_vm13, %v5040_v10, %v5036_v16  ;;  %v5061_v34 = vmul.f32 %v6562_v25, %v5060_v28  ;;  %5455 = vmatmul.f32.gmra.mxu2 %v5227_v27  ;;  %v4515_v0 = vpop.f32.mrf.mxu3 }
 0xc37   : > { %v9326_v59 = vadd.f32 1.0, %v6564_v47  ;;  %6567 = vpow2.f32 %v4680_v46  ;;  %v5228_v32 = vmul.f32 %v5041_v62, %v9168_v36  ;;  %v4682_v15 = vmul.f32 1.442695, %v4625_v63 }
 0xc38   : > { %6569 = vpow2.f32 %v4684_v49  ;;  %v4627_v13 = vmul.f32 -1.702, %v9319_v53  ;;  %v5062_v21 = vadd.f32 %v6562_v25, %v5061_v34  ;;  %vm5063_vm1 = vweird.f32 %v9262_v42 }
 0xc39   : > { %6571 = vrcp.f32 %v9326_v59  ;;  %vm5065_vm2 = vmor %vm5063_vm1, %vm5064_vm15  ;;  %v5070_v39 = vor.u32 1.1754944e-38, %v5069_v24  ;;  %5335 = vmatmul.f32.gmra.mxu0 %v5228_v32  ;;  %vm5068_vm3 = vcmp.eq.f32.partialorder %v5067_v8, 8.507059e+37  ;;  %v4628_v36 = vmul.f32 -1.702, %v9322_v2 }
 0xc3a   : > { %6573 = vpow2.f32 %v4682_v15  ;;  %v4686_v54 = vmul.f32 1.442695, %v4627_v13  ;;  %v5066_v35 = vsel %vm5065_vm2, %v6562_v25, %v5062_v21  ;;  %v5052_v3 = vand.u32 2147483647, %v9326_v59 }
 0xc3b   : > { %v5071_v1 = vsel %vm5068_vm3, %v5070_v39, %v5066_v35  ;;  %v5054_v6 = vand.u32 2147483648, %v9326_v59  ;;  %v9340_v43 = vadd.f32 %v4556_v18, %v8707_v52  ;;  %v4688_v24 = vmul.f32 1.442695, %v4628_v36 }
 0xc3c   : > { %v6566_v26 = vpop.eup %6565  ;;  %6575 = vpow2.f32 %v4686_v54  ;;  %v5230_v51 = vmul.f32 %v5071_v1, %v9175_v31  ;;  %v9346_v25 = vadd.f32 %v4515_v0, %v8720_v7  ;;  %vm5048_vm4 = vweird.f32 %v9326_v59 }
 0xc3d   : > { %v6568_v42 = vpop.eup %6567  ;;  %v9337_v10 = vadd.f32 1.0, %v6566_v26  ;;  %vm9351_vm5 = vcmp.eq.f32.partialorder %v5052_v3, 8.507059e+37  ;;  %v5055_v22 = vor.u32 1.1754944e-38, %v5054_v6  ;;  %v4630_v56 = vmul.f32 -1.702, %v9340_v43 }
 0xc3e   : > { %v6570_v44 = vpop.eup %6569  ;;  %v9342_v61 = vadd.f32 1.0, %v6568_v42  ;;  %5417 = vmatmul.f32.gmra.mxu1 %v5230_v51  ;;  %v4629_v57 = vmul.f32 -1.702, %v9346_v25  ;;  %v9372_v63 = vadd.f32 %v4597_v41, %v8723_v50 }
 0xc3f   : > { %v6572_v8 = vpop.eup %6571  ;;  %6577 = vrcp.f32 %v9337_v10  ;;  %v5082_v58 = vand.u32 2147483647, %v9337_v10  ;;  %v5084_v9 = vand.u32 2147483648, %v9337_v10  ;;  %v9358_v55 = vadd.f32 1.0, %v6570_v44 }
 0xc40   : > { %v6574_v48 = vpop.eup %6573  ;;  %v5044_v31 = vmul.f32 %v6572_v8, %v9326_v59  ;;  %6579 = vrcp.f32 %v9342_v61  ;;  %vm5049_vm6 = vweird.f32 %v6572_v8  ;;  %v5097_v23 = vand.u32 2147483647, %v9342_v61 }
 0xc41   : > { %v9360_v40 = vadd.f32 1.0, %v6574_v48  ;;  %6581 = vpow2.f32 %v4688_v24  ;;  %v5099_v27 = vand.u32 2147483648, %v9342_v61  ;;  %vm5078_vm7 = vweird.f32 %v9337_v10  ;;  %vm5050_vm12 = vmor %vm5048_vm4, %vm5049_vm6 }
 0xc42   : > { %v6576_v60 = vpop.eup %6575  ;;  %v5045_v7 = vsub.f32 1.0, %v5044_v31  ;;  %6583 = vrcp.f32 %v9358_v55  ;;  %vm5093_vm8 = vweird.f32 %v9342_v61  ;;  %vm9375_vm10 = vcmp.eq.f32.partialorder %v5082_v58, 8.507059e+37 }
 0xc43   : > { %v9366_v28 = vadd.f32 1.0, %v6576_v60  ;;  %6585 = vrcp.f32 %v9360_v40  ;;  %v5085_v32 = vor.u32 1.1754944e-38, %v5084_v9  ;;  %v4692_v15 = vmul.f32 1.442695, %v4630_v56 }
 0xc44   : > { %v5046_v46 = vmul.f32 %v6572_v8, %v5045_v7  ;;  %vm9383_vm13 = vcmp.eq.f32.partialorder %v5097_v23, 8.507059e+37  ;;  %v5127_v50 = vand.u32 2147483647, %v9358_v55  ;;  %v5129_v39 = vand.u32 2147483648, %v9358_v55 }
 0xc45   : > { %v6578_v49 = vpop.eup %6577  ;;  %v5100_v35 = vor.u32 1.1754944e-38, %v5099_v27  ;;  %6587 = vrcp.f32 %v9366_v28  ;;  %vm5123_vm9 = vweird.f32 %v9358_v55  ;;  %v4690_v1 = vmul.f32 1.442695, %v4629_v57 }
 0xc46   : > { %v6580_v47 = vpop.eup %6579  ;;  %v5047_v16 = vadd.f32 %v6572_v8, %v5046_v46  ;;  %v5074_v62 = vmul.f32 %v6578_v49, %v9337_v10  ;;  %vm5079_vm14 = vweird.f32 %v6578_v49  ;;  %vm5108_vm15 = vweird.f32 %v9360_v40 }
 0xc47   : > { %v5089_v13 = vmul.f32 %v6580_v47, %v9342_v61  ;;  %v6582_v36 = vpop.eup %6581  ;;  %v5112_v51 = vand.u32 2147483647, %v9360_v40  ;;  %vm5094_vm0 = vweird.f32 %v6580_v47  ;;  %vm9397_vm1 = vcmp.eq.f32.partialorder %v5127_v50, 8.507059e+37  ;;  %vm5080_vm3 = vmor %vm5078_vm7, %vm5079_vm14 }
 0xc48   : > { %v5051_v54 = vsel %vm5050_vm12, %v6572_v8, %v5047_v16  ;;  %v5075_v18 = vsub.f32 1.0, %v5074_v62  ;;  %v6584_v3 = vpop.eup %6583  ;;  %v5130_v48 = vor.u32 1.1754944e-38, %v5129_v39  ;;  %v5114_v52 = vand.u32 2147483648, %v9360_v40  ;;  %vm5095_vm4 = vmor %vm5093_vm8, %vm5094_vm0 }
 0xc49   : > { %v5056_v59 = vsel %vm9351_vm5, %v5055_v22, %v5051_v54  ;;  %v5090_v26 = vsub.f32 1.0, %v5089_v13  ;;  %v6586_v6 = vpop.eup %6585  ;;  %v5119_v8 = vmul.f32 %v6584_v3, %v9358_v55  ;;  %vm5124_vm2 = vweird.f32 %v6584_v3 }
 0xc4a   : > { %v5229_v0 = vmul.f32 %v5056_v59, %v9222_v14  ;;  %v5076_v42 = vmul.f32 %v6578_v49, %v5075_v18  ;;  %v5104_v14 = vmul.f32 %v6586_v6, %v9360_v40  ;;  %v9405_v56 = vadd.f32 1.0, %v6582_v36  ;;  %vm5125_vm6 = vmor %vm5123_vm9, %vm5124_vm2 }
 0xc4b   : > { %v5091_v44 = vmul.f32 %v6580_v47, %v5090_v26  ;;  %v5120_v58 = vsub.f32 1.0, %v5119_v8  ;;  %6589 = vpow2.f32 %v4692_v15  ;;  %v6588_v60 = vpop.eup %6587  ;;  %v4631_v41 = vmul.f32 -1.702, %v9372_v63 }
 0xc4c   : > { %v5077_v31 = vadd.f32 %v6578_v49, %v5076_v42  ;;  %5376 = vmatmul.f32.gmra.mxu3 %v5229_v0  ;;  %v5105_v9 = vsub.f32 1.0, %v5104_v14  ;;  %6591 = vpow2.f32 %v4690_v1  ;;  %v5134_v46 = vmul.f32 %v6588_v60, %v9366_v28 }
 0xc4d   : > { %v5092_v22 = vadd.f32 %v6580_v47, %v5091_v44  ;;  %v5121_v57 = vmul.f32 %v6584_v3, %v5120_v58  ;;  %vm5109_vm5 = vweird.f32 %v6586_v6  ;;  %6593 = vrcp.f32 %v9405_v56 }
 0xc4e   : > { %v5081_v7 = vsel %vm5080_vm3, %v6578_v49, %v5077_v31  ;;  %v5106_v16 = vmul.f32 %v6586_v6, %v5105_v9  ;;  %v5135_v15 = vsub.f32 1.0, %v5134_v46  ;;  %v5115_v34 = vor.u32 1.1754944e-38, %v5114_v52  ;;  %vm5110_vm7 = vmor %vm5108_vm15, %vm5109_vm5 }
 0xc4f   : > { %v5086_v23 = vsel %vm9375_vm10, %v5085_v32, %v5081_v7  ;;  %v5096_v10 = vsel %vm5095_vm4, %v6580_v47, %v5092_v22  ;;  %v5122_v62 = vadd.f32 %v6584_v3, %v5121_v57  ;;  %v5142_v32 = vand.u32 2147483647, %v9366_v28 }
 0xc50   : > { %v5231_v27 = vmul.f32 %v5086_v23, %v9291_v17  ;;  %v5101_v49 = vsel %vm9383_vm13, %v5100_v35, %v5096_v10  ;;  %v5107_v47 = vadd.f32 %v6586_v6, %v5106_v16  ;;  %v5144_v17 = vand.u32 2147483648, %v9366_v28 }
 0xc51   : > { %v5232_v61 = vmul.f32 %v5101_v49, %v9294_v12  ;;  %v6590_v13 = vpop.eup %6589  ;;  %v5126_v21 = vsel %vm5125_vm6, %v6584_v3, %v5122_v62  ;;  %v5136_v12 = vmul.f32 %v6588_v60, %v5135_v15  ;;  %vm5139_vm8 = vweird.f32 %v6588_v60 }
 0xc52   : > { %5458 = vmatmul.f32.gmra.mxu2 %v5231_v27  ;;  %v4694_v50 = vmul.f32 1.442695, %v4631_v41  ;;  %v6592_v39 = vpop.eup %6591  ;;  %v5131_v55 = vsel %vm9397_vm1, %v5130_v48, %v5126_v21  ;;  %v5111_v54 = vsel %vm5110_vm7, %v6586_v6, %v5107_v47  ;;  %vm5113_vm10 = vcmp.eq.f32.partialorder %v5112_v51, 8.507059e+37 }
 0xc53   : > { %5338 = vmatmul.f32.gmra.mxu0 %v5232_v61  ;;  %vm5138_vm12 = vweird.f32 %v9366_v28  ;;  %v5234_v18 = vmul.f32 %v5131_v55, %v9299_v11  ;;  %v5116_v35 = vsel %vm5113_vm10, %v5115_v34, %v5111_v54  ;;  %v5137_v36 = vadd.f32 %v6588_v60, %v5136_v12  ;;  %v6594_v3 = vpop.eup %6593 }
 0xc54   : > { %v4726_v59 = vadd.f32 1.0, %v6590_v13  ;;  %v5233_v40 = vmul.f32 %v5116_v35, %v9307_v45  ;;  %vm5140_vm13 = vmor %vm5138_vm12, %vm5139_vm8  ;;  %v5145_v26 = vor.u32 1.1754944e-38, %v5144_v17  ;;  %v4725_v1 = vadd.f32 1.0, %v6592_v39 }
 0xc55   : > { %6595 = vpow2.f32 %v4694_v50  ;;  %v5141_v0 = vsel %vm5140_vm13, %v6588_v60, %v5137_v36  ;;  %vm5143_vm9 = vcmp.eq.f32.partialorder %v5142_v32, 8.507059e+37  ;;  %5420 = vmatmul.f32.gmra.mxu1 %v5234_v18  ;;  %v5149_v51 = vmul.f32 %v6594_v3, %v9405_v56 }
 0xc56   : > { %6597 = vrcp.f32 %v4726_v59  ;;  %v5146_v42 = vsel %vm5143_vm9, %v5145_v26, %v5141_v0  ;;  %5379 = vmatmul.f32.gmra.mxu3 %v5233_v40  ;;  %v5159_v6 = vand.u32 2147483648, %v9405_v56  ;;  %vm5154_vm14 = vweird.f32 %v6594_v3 }
 0xc57   : > { %v5235_v11 = vmul.f32 %v5146_v42, %v9319_v53  ;;  %6599 = vrcp.f32 %v4725_v1  ;;  %v5150_v28 = vsub.f32 1.0, %v5149_v51  ;;  %v5157_v8 = vand.u32 2147483647, %v9405_v56  ;;  %v9445_v42 = vld [vmem:[%s922_s16] ss:$0 sm:$0xff]  ;;  %s9725_s16 = sld [smem:[#allocation25_spill]] }
 0xc58   : > { %vm5153_vm15 = vweird.f32 %v9405_v56  ;;  %v5160_v22 = vor.u32 1.1754944e-38, %v5159_v6  ;;  %v5187_v9 = vand.u32 2147483647, %v4726_v59  ;;  %v5189_v41 = vand.u32 2147483648, %v4726_v59 }
 0xc59   : > { %v5151_v44 = vmul.f32 %v6594_v3, %v5150_v28  ;;  %vm5155_vm0 = vmor %vm5153_vm15, %vm5154_vm14  ;;  %vm5158_vm1 = vcmp.eq.f32.partialorder %v5157_v8, 8.507059e+37  ;;  %vm5183_vm3 = vweird.f32 %v4726_v59  ;;  %v5174_v46 = vand.u32 2147483648, %v4725_v1 }
 0xc5a   : > { %5461 = vmatmul.f32.gmra.mxu2 %v5235_v11  ;;  %v5172_v49 = vand.u32 2147483647, %v4725_v1  ;;  %vm5188_vm6 = vcmp.eq.f32.partialorder %v5187_v9, 8.507059e+37  ;;  %v5190_v61 = vor.u32 1.1754944e-38, %v5189_v41  ;;  %vm5168_vm7 = vweird.f32 %v4725_v1 }
 0xc5b   : > { %v6596_v45 = vpop.eup %6595  ;;  %v5152_v31 = vadd.f32 %v6594_v3, %v5151_v44 }
 0xc5c   : > { %v6598_v24 = vpop.eup %6597  ;;  %v4727_v48 = vadd.f32 1.0, %v6596_v45  ;;  %vm5173_vm10 = vcmp.eq.f32.partialorder %v5172_v49, 8.507059e+37 }
 0xc5d   : > { %v5179_v14 = vmul.f32 %v6598_v24, %v4726_v59  ;;  %v6600_v52 = vpop.eup %6599  ;;  %v5156_v53 = vsel %vm5155_vm0, %v6594_v3, %v5152_v31  ;;  %vm5184_vm2 = vweird.f32 %v6598_v24  ;;  %p6076_p12 = scmp.ne.s32.totalorder %s9725_s16, 1 }
 0xc5e   : > { %6601 = vrcp.f32 %v4727_v48  ;;  %v5164_v60 = vmul.f32 %v6600_v52, %v4725_v1  ;;  %v5161_v7 = vsel %vm5158_vm1, %v5160_v22, %v5156_v53  ;;  %vm5169_vm4 = vweird.f32 %v6600_v52  ;;  %vm5185_vm5 = vmor %vm5183_vm3, %vm5184_vm2  ;;  %s9728_s30 = sld [smem:[#allocation54_spill]] (!%p6076_p12) }
 0xc5f   : > { %v5180_v58 = vsub.f32 1.0, %v5179_v14  ;;  %v5236_v23 = vmul.f32 %v5161_v7, %v9322_v2  ;;  %vm5170_vm8 = vmor %vm5168_vm7, %vm5169_vm4  ;;  %v5175_v2 = vor.u32 1.1754944e-38, %v5174_v46  ;;  %v5204_v12 = vand.u32 2147483648, %v4727_v48  ;;  %s9729_s15 = sld [smem:[#allocation55_spill]] (!%p6076_p12) }
 0xc60   : > { %v5165_v57 = vsub.f32 1.0, %v5164_v60  ;;  %v5202_v55 = vand.u32 2147483647, %v4727_v48  ;;  %vm5198_vm13 = vweird.f32 %v4727_v48 }
 0xc61   : > { %v5181_v10 = vmul.f32 %v6598_v24, %v5180_v58  ;;  %5341 = vmatmul.f32.gmra.mxu0 %v5236_v23  ;;  %v5205_v18 = vor.u32 1.1754944e-38, %v5204_v12 }
 0xc62   : > { %v5166_v27 = vmul.f32 %v6600_v52, %v5165_v57  ;;  %vm5203_vm14 = vcmp.eq.f32.partialorder %v5202_v55, 8.507059e+37 }
 0xc63   : > { %v5182_v56 = vadd.f32 %v6598_v24, %v5181_v10 }
 0xc64   : > { %v6602_v16 = vpop.eup %6601  ;;  %v5167_v15 = vadd.f32 %v6600_v52, %v5166_v27 }
 0xc65   : > { %v5186_v62 = vsel %vm5185_vm5, %v6598_v24, %v5182_v56  ;;  %v5194_v47 = vmul.f32 %v6602_v16, %v4727_v48  ;;  %vm5199_vm12 = vweird.f32 %v6602_v16 }
 0xc66   : > { %v5191_v34 = vsel %vm5188_vm6, %v5190_v61, %v5186_v62  ;;  %v5171_v17 = vsel %vm5170_vm8, %v6600_v52, %v5167_v15  ;;  %vm5200_vm9 = vmor %vm5198_vm13, %vm5199_vm12 }
 0xc67   : > { %v5238_v32 = vmul.f32 %v5191_v34, %v9340_v43  ;;  %v5195_v13 = vsub.f32 1.0, %v5194_v47  ;;  %v5176_v21 = vsel %vm5173_vm10, %v5175_v2, %v5171_v17  ;;  %v5321_v59 = vpop.f32.mrf.mxu0 }
 0xc68   : > { %v5237_v50 = vmul.f32 %v5176_v21, %v9346_v25 }
 0xc69   : > { %v5196_v39 = vmul.f32 %v6602_v16, %v5195_v13  ;;  %5423 = vmatmul.f32.gmra.mxu1 %v5238_v32 }
 0xc6a   : > { %5382 = vmatmul.f32.gmra.mxu3 %v5237_v50 }
 0xc6b   : > { %v5197_v54 = vadd.f32 %v6602_v16, %v5196_v39  ;;  %v5403_v25 = vpop.f32.mrf.mxu1 }
 0xc6d   : > { %v5201_v35 = vsel %vm5200_vm9, %v6602_v16, %v5197_v54 }
 0xc6e   : > { %v5206_v43 = vsel %vm5203_vm14, %v5205_v18, %v5201_v35 }
 0xc6f   : > { %v5239_v36 = vmul.f32 %v5206_v43, %v9372_v63 }
 0xc71   : > { %5464 = vmatmul.f32.gmra.mxu2 %v5239_v36  ;;  %v5324_v11 = vpop.f32.mrf.mxu0 }
 0xc73   : > { %v5406_v45 = vpop.f32.mrf.mxu1 }
 0xc76   : > { %v5362_v40 = vpop.f32.mrf.mxu3  ;;  %v5444_v3 = vpop.f32.mrf.mxu2 }
 0xc77   : > { %v5363_v26 = vadd.f32 %v5362_v40, %v5321_v59 }
 0xc79   : > { %v5404_v1 = vadd.f32 %v5403_v25, %v5363_v26 }
 0xc7b   : > { %v5445_v0 = vadd.f32 %v5444_v3, %v5404_v1 }
 0xc7d   : > { %v5468_v51 = vadd.f32 %v5445_v0, %v8494_v20 }
 0xc7e   : > { %v5365_v28 = vpop.f32.mrf.mxu3 }
 0xc7f   : > { %v5480_v63 = vadd.f32 %v9445_v42, %v5468_v51  ;;  %v5366_v6 = vadd.f32 %v5365_v28, %v5324_v11 }
 0xc81   : > { %5488 = vst [vmem:[#allocation2 + $0x30] sm:$0xff] %v5480_v63  ;;  %v5407_v44 = vadd.f32 %v5406_v45, %v5366_v6 }
 0xc84   : > { %v5327_v14 = vpop.f32.mrf.mxu0 }
 0xc87   : > { %v5447_v8 = vpop.f32.mrf.mxu2  ;;  %v5409_v53 = vpop.f32.mrf.mxu1 }
 0xc88   : > { %v5448_v24 = vadd.f32 %v5447_v8, %v5407_v44 }
 0xc8a   : > { %v5469_v48 = vadd.f32 %v5448_v24, %v8499_v5 }
 0xc8c   : > { %v5481_v31 = vadd.f32 %v9445_v42, %v5469_v48 }
 0xc8d   : > { %v5330_v41 = vpop.f32.mrf.mxu0 }
 0xc8e   : > { %5489 = vst [vmem:[#allocation2] sm:$0xff] %v5481_v31  ;;  %v5368_v52 = vpop.f32.mrf.mxu3 }
 0xc8f   : > { %v5369_v22 = vadd.f32 %v5368_v52, %v5327_v14 }
 0xc91   : > { %v5410_v20 = vadd.f32 %v5409_v53, %v5369_v22 }
 0xc92   : > { %v5450_v58 = vpop.f32.mrf.mxu2 }
 0xc93   : > { %v5451_v60 = vadd.f32 %v5450_v58, %v5410_v20 }
 0xc94   : > { %v5412_v57 = vpop.f32.mrf.mxu1 }
 0xc95   : > { %v5470_v7 = vadd.f32 %v5451_v60, %v8504_v33 }
 0xc97   : > { %v5482_v9 = vadd.f32 %v9445_v42, %v5470_v7 }
 0xc99   : > { %5490 = vst [vmem:[#allocation2 + $0x18] sm:$0xff] %v5482_v9 }
 0xca7   : > { %v5371_v23 = vpop.f32.mrf.mxu3 }
 0xca8   : > { %v5372_v10 = vadd.f32 %v5371_v23, %v5330_v41 }
 0xcaa   : > { %v5413_v5 = vadd.f32 %v5412_v57, %v5372_v10 }
 0xcab   : > { %v5333_v16 = vpop.f32.mrf.mxu0 }
 0xcad   : > { %v5453_v46 = vpop.f32.mrf.mxu2  ;;  %v5415_v15 = vpop.f32.mrf.mxu1 }
 0xcae   : > { %v5454_v56 = vadd.f32 %v5453_v46, %v5413_v5 }
 0xcb0   : > { %v5471_v27 = vadd.f32 %v5454_v56, %v8508_v38 }
 0xcb2   : > { %v5483_v49 = vadd.f32 %v9445_v42, %v5471_v27 }
 0xcb4   : > { %5491 = vst [vmem:[#allocation2 + $0x10] sm:$0xff] %v5483_v49 }
 0xcb5   : > { %v5374_v61 = vpop.f32.mrf.mxu3 }
 0xcb6   : > { %v5375_v62 = vadd.f32 %v5374_v61, %v5333_v16  ;;  %v5336_v17 = vpop.f32.mrf.mxu0 }
 0xcb8   : > { %v5416_v33 = vadd.f32 %v5415_v15, %v5375_v62 }
 0xcb9   : > { %v5456_v47 = vpop.f32.mrf.mxu2 }
 0xcba   : > { %v5457_v34 = vadd.f32 %v5456_v47, %v5416_v33 }
 0xcbb   : > { %v5418_v12 = vpop.f32.mrf.mxu1 }
 0xcbc   : > { %v5472_v2 = vadd.f32 %v5457_v34, %v8514_v29 }
 0xcbe   : > { %v5484_v32 = vadd.f32 %v9445_v42, %v5472_v2 }
 0xcc0   : > { %5492 = vst [vmem:[#allocation2 + $0x8] sm:$0xff] %v5484_v32 }
 0xccf   : > { %v5377_v13 = vpop.f32.mrf.mxu3 }
 0xcd0   : > { %v5378_v21 = vadd.f32 %v5377_v13, %v5336_v17  ;;  %v5339_v18 = vpop.f32.mrf.mxu0 }
 0xcd2   : > { %v5419_v38 = vadd.f32 %v5418_v12, %v5378_v21  ;;  %v5421_v36 = vpop.f32.mrf.mxu1 }
 0xcd5   : > { %v5459_v50 = vpop.f32.mrf.mxu2 }
 0xcd6   : > { %v5460_v39 = vadd.f32 %v5459_v50, %v5419_v38 }
 0xcd8   : > { %v5473_v55 = vadd.f32 %v5460_v39, %v8519_v19 }
 0xcd9   : > { %v5380_v35 = vpop.f32.mrf.mxu3 }
 0xcda   : > { %v5485_v54 = vadd.f32 %v9445_v42, %v5473_v55  ;;  %v5381_v43 = vadd.f32 %v5380_v35, %v5339_v18 }
 0xcdc   : > { %5493 = vst [vmem:[#allocation2 + $0x20] sm:$0xff] %v5485_v54  ;;  %v5422_v29 = vadd.f32 %v5421_v36, %v5381_v43 }
 0xcdd   : > { %v5462_v59 = vpop.f32.mrf.mxu2 }
 0xcde   : > { %v5463_v40 = vadd.f32 %v5462_v59, %v5422_v29  ;;  %v5342_v1 = vpop.f32.mrf.mxu0 }
 0xce0   : > { %v5474_v26 = vadd.f32 %v5463_v40, %v8525_v37 }
 0xce2   : > { %v5486_v25 = vadd.f32 %v9445_v42, %v5474_v26 }
 0xce4   : > { %5494 = vst [vmem:[#allocation2 + $0x28] sm:$0xff] %v5486_v25 }
 0xce6   : > { %v5424_v51 = vpop.f32.mrf.mxu1 }
 0xced   : > { %v5383_v3 = vpop.f32.mrf.mxu3 }
 0xcee   : > { %v5384_v0 = vadd.f32 %v5383_v3, %v5342_v1 }
 0xcf0   : > { %v5425_v19 = vadd.f32 %v5424_v51, %v5384_v0 }
 0xcf4   : > { %v5465_v11 = vpop.f32.mrf.mxu2 }
 0xcf5   : > { %v5466_v28 = vadd.f32 %v5465_v11, %v5425_v19 }
 0xcf7   : > { %v5475_v63 = vadd.f32 %v5466_v28, %v8529_v4  ;;  %5499 = sbr.rel (%p6076_p12) target bundleno = 4336 (0x10f0), region = 124 }
 0xcf9   : > { %v5487_v6 = vadd.f32 %v9445_v42, %v5475_v63 }
 0xcfb   : > { %5495 = vst [vmem:[#allocation2 + $0x38] sm:$0xff] %v5487_v6 }
 0xcfc   : > { %v5508_v37 = vld [vmem:[%s7299_s13] sm:$0xff]  ;;  %v9726_v20 = vld [vmem:[#allocation38_spill] sm:$0xff]  ;;  %v5506_v23 = vld [vmem:[#allocation2 + $0x28] sm:$0xff]  ;;  %v6943_v21 = vmov 0.0  }
 0xcfd   : > { %v5509_v45 = vsel %vm1577_vm11, %v5508_v37, 2147483648  ;;  %v5505_v10 = vld [vmem:[#allocation2 + $0x20] sm:$0xff]  ;;  %v5504_v27 = vld [vmem:[#allocation2 + $0x8] sm:$0xff]  ;;  %v5503_v49 = vld [vmem:[#allocation2 + $0x10] sm:$0xff] }
 0xcfe   : > { %v5511_v44 = vshra.s32 %v5509_v45, 16  ;;  %v5510_v24 = vand.u32 65535, %v5509_v45  ;;  %v5502_v16 = vld [vmem:[#allocation2 + $0x18] sm:$0xff]  ;;  %v5501_v61 = vld [vmem:[#allocation2] sm:$0xff]  ;;  %v5500_v62 = vld [vmem:[#allocation2 + $0x30] sm:$0xff] }
 0xcff   : > { %v9727_v2 = vld [vmem:[#allocation37_spill] sm:$0xff]  ;;  %v5615_v50 = vld [vmem:[#allocation12 + $0x78] sm:$0xff]  ;;  %v5613_v43 = vld [vmem:[#allocation12 + $0x68] sm:$0xff] }
 0xd00   : > { %v5513_v8 = vcvt.s32.f32 %v5511_v44  ;;  %v5512_v48 = vcvt.s32.f32 %v5510_v24  ;;  %v5541_v32 = vmul.u32 8, %v9727_v2  ;;  %v5614_v39 = vld [vmem:[#allocation12 + $0x70] sm:$0xff]  ;;  %5616 = vmatpush.msra.mxu1 %v5615_v50  ;;  %v5612_v36 = vld [vmem:[#allocation12 + $0x60] sm:$0xff]  ;;  %v5611_v29 = vld [vmem:[#allocation12 + $0x58] sm:$0xff] }
 0xd01   : > { %v5610_v59 = vld [vmem:[#allocation12 + $0x50] sm:$0xff]  ;;  %v5609_v40 = vld [vmem:[#allocation12 + $0x48] sm:$0xff]  ;;  %v5608_v26 = vld [vmem:[#allocation12 + $0x40] sm:$0xff] }
 0xd02   : > { %5514 = vmax.xlane.f32.xlu0 %v5513_v8  ;;  %v5507_v41 = vld [vmem:[#allocation2 + $0x38] sm:$0xff]  ;;  %5617 = vmatpush.msra.mxu1 %v5614_v39  ;;  %v5606_v1 = vld [vmem:[#allocation12 + $0x30] sm:$0xff]  ;;  %v5605_v3 = vld [vmem:[#allocation12 + $0x28] sm:$0xff] }
 0xd03   : > { %5558 = vmatpush.msra.mxu0 %v5507_v41  ;;  %v5607_v25 = vld [vmem:[#allocation12 + $0x38] sm:$0xff]  ;;  %v5604_v0 = vld [vmem:[#allocation12 + $0x20] sm:$0xff]  ;;  %v5602_v19 = vld [vmem:[#allocation12 + $0x10] sm:$0xff] }
 0xd04   : > { %5618 = vmatpush.msra.mxu1 %v5613_v43  ;;  %v5603_v51 = vld [vmem:[#allocation12 + $0x18] sm:$0xff]  ;;  %v5601_v11 = vld [vmem:[#allocation12 + $0x8] sm:$0xff]  ;;  %v5600_v28 = vld [vmem:[#allocation12] sm:$0xff] }
 0xd05   : > { %5559 = vmatpush.msra.mxu0 %v5506_v23 }
 0xd06   : > { %5619 = vmatpush.msra.mxu1 %v5612_v36 }
 0xd07   : > { %5560 = vmatpush.msra.mxu0 %v5505_v10 }
 0xd08   : > { %5620 = vmatpush.msra.mxu1 %v5611_v29 }
 0xd09   : > { %5561 = vmatpush.msra.mxu0 %v5504_v27 }
 0xd0a   : > { %5621 = vmatpush.msra.mxu1 %v5610_v59 }
 0xd0b   : > { %5562 = vmatpush.msra.mxu0 %v5503_v49 }
 0xd0c   : > { %5622 = vmatpush.msra.mxu1 %v5609_v40 }
 0xd0d   : > { %5563 = vmatpush.msra.mxu0 %v5502_v16 }
 0xd0e   : > { %5623 = vmatpush.msra.mxu1 %v5608_v26 }
 0xd0f   : > { %5564 = vmatpush.msra.mxu0 %v5501_v61 }
 0xd10   : > { %5624 = vmatpush.msra.mxu1 %v5607_v25 }
 0xd11   : > { %5565 = vmatpush.msra.mxu0 %v5500_v62 }
 0xd12   : > { %5625 = vmatpush.msra.mxu1 %v5606_v1 }
 0xd14   : > { %5626 = vmatpush.msra.mxu1 %v5605_v3 }
 0xd16   : > { %5627 = vmatpush.msra.mxu1 %v5604_v0 }
 0xd18   : > { %5628 = vmatpush.msra.mxu1 %v5603_v51 }
 0xd1a   : > { %5629 = vmatpush.msra.mxu1 %v5602_v19 }
 0xd1c   : > { %5630 = vmatpush.msra.mxu1 %v5601_v11 }
 0xd1e   : > { %5631 = vmatpush.msra.mxu1 %v5600_v28 }
 0xd75   : > { %v5515_v31 = vpop.xlane.xlu0 %5514 }
 0xd76   : > { %vm5516_vm15 = vcmp.eq.f32.partialorder %v5513_v8, %v5515_v31  ;;  %v5521_v4 = vcvt.f32.s32 %v5515_v31 }
 0xd77   : > { %v5517_v14 = vsel %vm5516_vm15, %v5512_v48, -inf }
 0xd78   : > { %5518 = vmax.xlane.f32.xlu0 %v5517_v14  ;;  %v5522_v42 = vshll.u32 %v5521_v4, 16  ;;  %v6611_v14 = vld [vmem:[%s9728_s30] ss:$0 sm:$0xff] }
 0xdeb   : > { %v5519_v52 = vpop.xlane.xlu0 %5518 }
 0xdec   : > { %v5520_v22 = vcvt.f32.s32 %v5519_v52 }
 0xdee   : > { %v5523_v53 = vadd.s32 %v5522_v42, %v5520_v22 }
 0xdf0   : > { %vm5524_vm0 = vcmp.eq.s32.totalorder %v5508_v37, %v5523_v53 }
 0xdf1   : > { %v5525_v58 = vsel %vm5524_vm0, %v9726_v20, 8 }
 0xdf2   : > { %v5526_v60 = vsel %vm1577_vm11, %v5525_v58, 2147483647  ;;  %vm5546_vm11 = vcmask 523264  }
 0xdf3   : > { %v5528_v7 = vshra.s32 %v5526_v60, 16  ;;  %v5527_v57 = vand.u32 65535, %v5526_v60 }
 0xdf5   : > { %v5530_v9 = vcvt.s32.f32 %v5528_v7  ;;  %v5529_v46 = vcvt.s32.f32 %v5527_v57 }
 0xdf7   : > { %5531 = vmin.xlane.f32.xlu1 %v5530_v9 }
 0xe6a   : > { %v5532_v5 = vpop.xlane.xlu1 %5531 }
 0xe6b   : > { %vm5533_vm1 = vcmp.eq.f32.partialorder %v5530_v9, %v5532_v5  ;;  %v5538_v15 = vcvt.f32.s32 %v5532_v5 }
 0xe6c   : > { %v5534_v56 = vsel %vm5533_vm1, %v5529_v46, inf }
 0xe6d   : > { %5535 = vmin.xlane.f32.xlu1 %v5534_v56  ;;  %v5539_v47 = vshll.u32 %v5538_v15, 16 }
 0xee0   : > { %v5536_v33 = vpop.xlane.xlu1 %5535 }
 0xee1   : > { %v5537_v34 = vcvt.f32.s32 %v5536_v33 }
 0xee3   : > { %v5540_v17 = vadd.s32 %v5539_v47, %v5537_v34 }
 0xee5   : > { %v5542_v13 = vadd.s32 %v5541_v32, %v5540_v17 }
 0xee7   : > { %vm5543_vm2 = vcmp.eq.s32.totalorder %v9726_v20, %v5542_v13 }
 0xee8   : > { %v6077_v12 = vsel %vm5543_vm2, 1.0, %v6943_v21 }
 0xee9   : > { %6078 = vmatmul.msk.f32.vlgmr.msra.gmra.mxu0 %vm5546_vm11, %v6077_v12 }
 0xf66   : > { %v5567_v38 = vpop.f32.mrf.mxu0 }
 0xf67   : > { %5572 = vadd.xlane.f32.xlu2 %v5567_v38 }
 0xfda   : > { %v5573_v55 = vpop.xlane.xlu2 %5572 }
 0xfdb   : > { %v5574_v54 = vmul.f32 %v5573_v55, %v7351_v30 }
 0xfdd   : > { %v5575_v18 = vsub.f32 %v5567_v38, %v5574_v54 }
 0xfdf   : > { %v5576_v35 = vmul.f32 %v5575_v18, %v5575_v18 }
 0xfe1   : > { %5577 = vadd.xlane.f32.xlu2 %v5576_v35 }
0x1054   : > { %v5578_v63 = vpop.xlane.xlu2 %5577 }
0x1055   : > { %v5579_v6 = vmul.f32 %v5578_v63, %v7351_v30  ;;  %v6612_v30 = vld [vmem:[%s9729_s15] ss:$0 sm:$0xff] }
0x1057   : > { %v5580_v37 = vadd.f32 1e-05, %v5579_v6 }
0x1059   : > { %6613 = vrsqrt.f32 %v5580_v37  ;;  %vm5587_vm4 = vweird.f32 %v5580_v37 }
0x105f   : > { %v6614_v45 = vpop.eup %6613 }
0x1060   : > { %v5582_v44 = vmul.f32 %v6614_v45, %v5580_v37  ;;  %vm5588_vm3 = vweird.f32 %v6614_v45 }
0x1061   : > { %vm5589_vm5 = vmor %vm5587_vm4, %vm5588_vm3 }
0x1062   : > { %v5583_v8 = vmul.f32 %v6614_v45, %v5582_v44 }
0x1064   : > { %v5584_v24 = vmul.f32 0.5, %v5583_v8 }
0x1066   : > { %v5585_v48 = vsub.f32 1.5, %v5584_v24 }
0x1068   : > { %v5586_v31 = vmul.f32 %v6614_v45, %v5585_v48 }
0x106a   : > { %v5590_v4 = vsel %vm5589_vm5, %v6614_v45, %v5586_v31 }
0x106b   : > { %v5591_v52 = vmul.f32 %v5590_v4, %v5575_v18 }
0x106d   : > { %v5595_v42 = vmul.f32 %v6611_v14, %v5591_v52 }
0x106f   : > { %v5599_v22 = vadd.f32 %v6612_v30, %v5595_v42 }
0x1071   : > { %5632 = vmatmul.f32.vlgmr.msra.gmra.mxu1 %v5599_v22 }
0x10ee   : > { %v5633_v53 = vpop.f32.mrf.mxu1 }
0x10ef   : > { %5636 = vst [vmem:[%s7337_s28] sm:$0xff] %v5633_v53 }
0x10f0 PF: > { %s9730_s26 = sld [smem:[#allocation26_spill]]  ;;  %s5650_s17 = sshll.u32 %s7337_s28, 4  ;;  %s5651_s17 = int_to_ptr.vmem [resolvable:$true] %s5650_s17 }
0x10f1   : > { %s9731_s4 = sld [smem:[#allocation36_spill]] }
0x10f2   : > { %s9733_s5 = sld [smem:[#allocation57_spill]] }
0x10f6   : > { %s6080_s12 = sshll.u32 %s9730_s26, 3 }
0x10f7   : > { %s5638_s29 = scalar_lea.sflag [#allocation5], %s9731_s4 }
0x10f8   : > { %s5648_s11 = scalar_lea.hbm %s9733_s5, %s6080_s12  ;;  %s6815_s19 = scalar_lea.hbm %s9733_s5, 16 }
0x10f9   : > { %s5652_s8 = sshll.u32 %s5648_s11, 4  ;;  %s5653_s8 = int_to_ptr.hbm [resolvable:$true] %s5652_s8 }
0x10fa   : > { %s6809_s7 = sshra.s32 %s5653_s8, 4  ;;  %s6810_s7 = int_to_ptr.hbm [resolvable:$true] %s6809_s7 }
0x10fb   : > { %s6811_s22 = scalar_lea.hbm %s6810_s7, 8  ;;  %p6816_p11 = scmp.lt.s32.totalorder %s6810_s7, %s9733_s5 }
0x10fc   : > { %p6812_p13 = scmp.ne.s32.totalorder %s6810_s7, %s6811_s22  ;;  %p6817_p2 = scmp.lt.s32.totalorder %s6815_s19, %s6811_s22 }
0x10fe   : > { %p6813_p6 = pnand %p6812_p13, %p7210_p1  ;;  %p6818_p3 = por %p6817_p2, %p6816_p11 }
0x1100   : > { %p6814_p10 = pneg %p6813_p6 }
0x1102   : > { %p6819_p9 = pnand %p6818_p3, %p6814_p10 }
0x1104   : > { %6822 = shalt.err (!%p6819_p9)
}
0x1105   : > { %6121 = dma.vmem_to_hbm [thread:$0]  (%p7210_p1), %s5651_s17, 128, %s5653_s8, %s5638_s29  }
0x1106 PF: > { %s9734_s28 = sld [smem:[#allocation29_spill]] }
0x1107   : > { %s9735_s1 = sld [smem:[#allocation22_spill]] }
0x110c   : > { %p6150_p4 = scmp.ge.s32.totalorder %s9734_s28, 2 }
0x110d   : > { %s5664_s21 = sand.u32 1, %s9735_s1  }
0x110e   : > { %p6144_p5 = pnand %p6150_p4, %p7214_p0  ;;  %s5665_s2 = scalar_lea.sflag [#allocation5], %s5664_s21 }
0x1110   : > { %p6145_p7 = pneg %p6144_p5 }
0x1112   : > { %6884 = dma.done.wait (%p6145_p7), %s5665_s2, 128  }
0x1113   : > { %6886 = vsyncadd (%p6145_p7), %s5665_s2, 4294967168  ;;  %s41_s2 = sadd.s32 1, %s9734_s28   ;;  %s9737_s27 = sld [smem:[#allocation20_spill]] }
0x1114   : > { %p38_p8 = scmp.ge.s32.totalorder %s41_s2, 6   ;;  %s9738_s28 = sld [smem:[#allocation21_spill]] }
0x1115   : > { %s9739_s29 = sld [smem:[#allocation31_spill]] }
0x1116   : > { %s9740_s30 = sld [smem:[#allocation23_spill]] }
0x1117   : > { %s9741_s0 = sld [smem:[#allocation24_spill]] }
0x1118   : > { %s9742_s19 = sld [smem:[#allocation35_spill]]  ;;  %40 = sbr.rel (!%p38_p8) target bundleno = 34 (0x22), region = 224 }
0x1119   : > { %s9743_s1 = sld [smem:[#allocation27_spill]] }
0x111a   : > { %s9744_s20 = sld [smem:[#allocation28_spill]] }
0x111b   : > { %s9745_s21 = sld [smem:[#allocation30_spill]] }
0x111c   : > { %s9746_s22 = sld [smem:[#allocation32_spill]] }
0x111d   :  { %5671 = vsyncpa [#allocation4], 1 }
0x111e   :  { %5673 = vsyncpa [#allocation4 + $0x1], 1 }
0x111f   :  { %5674 = vsyncpa [#allocation7], 1 }
0x1120   :  { %5676 = vsyncpa [#allocation7 + $0x1], 1 }
0x1121   :  { %5677 = vsyncpa [#allocation10], 1 }
0x1122   :  { %5679 = vsyncpa [#allocation10 + $0x1], 1 }
0x1123   :  { %5680 = vsyncpa [#allocation13], 1 }
0x1124   :  { %5681 = vsyncpa [#allocation5], 1 }
0x1125   :  { %5683 = vsyncpa [#allocation5 + $0x1], 1 }

</bundles_post_ra>
